<compile_context>
chip_gen: v7x
topology: tpu7x:2x2x1
jax: 0.10.0
libtpu: 0.0.40
codegen_flags: <defaults>
</compile_context>

<pallas_src>
import jax
import jax.numpy as jnp
from jax import lax
from jax.experimental import pallas as pl
from jax.experimental.pallas import tpu as pltpu

_EPS = 1e-5  # PyTorch BatchNorm2d default eps


# --------------------------- fused BasicBlock kernel ------------------------

def _make_basic_block_kernel(N, H, W, Cin, Cout, stride, equal):
    """Build a fused kernel for one pre-activation BasicBlock (static config)."""
    Ho = (H - 1) // stride + 1
    Wo = (W - 1) // stride + 1
    M = Ho * Wo * N  # batch folded into the matmul M dimension

    def tap(ref, kh, kw):
        # (Ho, Wo, N, C) window of a zero-padded VMEM scratch, strided along the
        # two untiled spatial dims. This is how conv stride is applied in-kernel.
        if stride == 1:
            return ref[kh:kh + Ho, kw:kw + Wo, :, :]
        return ref[pl.ds(kh, Ho, stride), pl.ds(kw, Wo, stride), :, :]

    def kernel(x_ref, s1_ref, b1_ref, w1_ref, s2_ref, b2_ref, w2_ref, *rest):
        if equal:
            o_ref, pad1_ref, pad2_ref = rest
            ws_ref = None
        else:
            ws_ref, o_ref, pad1_ref, pad2_ref = rest

        # ---- bn1 + relu (fused, stays in VMEM) ----
        x = x_ref[...]                                            # (H, W, N, Cin)
        act1 = jnp.maximum(x * s1_ref[...] + b1_ref[...], 0.0)

        # ---- conv1: 3x3, stride s, pad 1, as ONE im2col matmul ----
        pad1_ref[...] = jnp.zeros_like(pad1_ref)                  # in-kernel zero pad
        pad1_ref[1:H + 1, 1:W + 1, :, :] = act1
        taps1 = [tap(pad1_ref, kh, kw) for kh in range(3) for kw in range(3)]
        patches1 = jnp.concatenate(taps1, axis=-1)                # (Ho, Wo, N, 9*Cin)
        out1 = jnp.dot(patches1.reshape(M, 9 * Cin), w1_ref[...],
                       preferred_element_type=jnp.float32)        # (M, Cout)

        # ---- bn2 + relu epilogue (free VPU work under the matmul) ----
        act2 = jnp.maximum(out1 * s2_ref[...] + b2_ref[...], 0.0)
        # TODO(synk): dropout skipped -- dropRate=0.0 (identity at inference).

        # ---- conv2: 3x3, stride 1, pad 1, as ONE im2col matmul ----
        pad2_ref[...] = jnp.zeros_like(pad2_ref)
        pad2_ref[1:Ho + 1, 1:Wo + 1, :, :] = act2.reshape(Ho, Wo, N, Cout)
        taps2 = [pad2_ref[kh:kh + Ho, kw:kw + Wo, :, :]
                 for kh in range(3) for kw in range(3)]
        patches2 = jnp.concatenate(taps2, axis=-1)                # (Ho, Wo, N, 9*Cout)
        out2 = jnp.dot(patches2.reshape(M, 9 * Cout), w2_ref[...],
                       preferred_element_type=jnp.float32)        # (M, Cout)

        # ---- shortcut + residual add epilogue (fused) ----
        if equal:
            res = x.reshape(M, Cin)                               # identity shortcut
        else:
            # 1x1 conv on relu(bn1(x)) with the same stride, read in-kernel.
            a1s = tap(pad1_ref, 1, 1)                             # act1 at strided pos
            res = jnp.dot(a1s.reshape(M, Cin), ws_ref[...],
                          preferred_element_type=jnp.float32)

        y = (res + out2).astype(o_ref.dtype)
        o_ref[...] = y.reshape(Ho, Wo, N, Cout)

    return kernel, (Ho, Wo)


# ------------------------------- wrappers ------------------------------------

def _bn_fold(gamma, beta, mean, var):
    scale = gamma / jnp.sqrt(var + _EPS)
    shift = beta - mean * scale
    return scale, shift


def basic_block_forward(x_hwnc, p):
    """One BasicBlock. x_hwnc: (H, W, N, Cin) kernel layout -> (Ho, Wo, N, Cout)."""
    H, W, N, Cin = x_hwnc.shape
    Cout = p["w1"].shape[3]
    stride, equal = p["stride"], p["equal"]
    if equal and stride != 1:
        # Guard for the latent hazard: identity shortcut cannot be strided.
        raise ValueError("in_planes == out_planes with stride > 1 is unsupported "
                         "(same limitation as the PyTorch reference).")

    kernel, (Ho, Wo) = _make_basic_block_kernel(N, H, W, Cin, Cout, stride, equal)

    s1, b1 = _bn_fold(p["bn1_gamma"], p["bn1_beta"], p["bn1_mean"], p["bn1_var"])
    s2, b2 = _bn_fold(p["bn2_gamma"], p["bn2_beta"], p["bn2_mean"], p["bn2_var"])
    dt = x_hwnc.dtype
    args = [
        x_hwnc,
        s1.reshape(1, Cin).astype(dt), b1.reshape(1, Cin).astype(dt),
        p["w1"].reshape(9 * Cin, Cout).astype(dt),     # HWIO -> (9*Cin, Cout) im2col weight
        s2.reshape(1, Cout).astype(jnp.float32), b2.reshape(1, Cout).astype(jnp.float32),
        p["w2"].reshape(9 * Cout, Cout).astype(dt),
    ]
    if not equal:
        args.append(p["ws"].astype(dt))                # (Cin, Cout) shortcut 1x1 weight

    def full_spec(a):
        nd = a.ndim
        return pl.BlockSpec(a.shape, lambda i, nd=nd: (0,) * nd)

    in_specs = [full_spec(a) for a in args]
    out_specs = pl.BlockSpec((Ho, Wo, N, Cout), lambda i: (0, 0, 0, 0))

    return pl.pallas_call(
        kernel,
        out_shape=jax.ShapeDtypeStruct((Ho, Wo, N, Cout), dt),
        grid=(1,),  # whole batch processed in one step (batch folded into matmul M)
        in_specs=in_specs,
        out_specs=out_specs,
        scratch_shapes=[
            pltpu.VMEM((H + 2, W + 2, N, Cin), jnp.float32),   # padded act1
            pltpu.VMEM((Ho + 2, Wo + 2, N, Cout), jnp.float32),  # padded act2
        ],
        compiler_params=pltpu.CompilerParams(dimension_semantics=("arbitrary",)),
    )(*args)


def network_block_forward(x_hwnc, params_list):
    for p in params_list:
        x_hwnc = basic_block_forward(x_hwnc, p)
    return x_hwnc


# ------------------------- parameter initialization --------------------------

def make_basic_block_params(key, cin, cout, stride):
    ks = jax.random.split(key, 10)
    p = {
        "stride": stride,
        "equal": (cin == cout),
        "bn1_gamma": 1.0 + 0.1 * jax.random.normal(ks[0], (cin,), jnp.float32),
        "bn1_beta": 0.1 * jax.random.normal(ks[1], (cin,), jnp.float32),
        "bn1_mean": 0.05 * jax.random.normal(ks[2], (cin,), jnp.float32),
        "bn1_var": 1.0 + 0.1 * jax.random.uniform(ks[3], (cin,), jnp.float32),
        "w1": 0.1 * jax.random.normal(ks[4], (3, 3, cin, cout), jnp.float32),   # HWIO
        "bn2_gamma": 1.0 + 0.1 * jax.random.normal(ks[5], (cout,), jnp.float32),
        "bn2_beta": 0.1 * jax.random.normal(ks[6], (cout,), jnp.float32),
        "bn2_mean": 0.05 * jax.random.normal(ks[7], (cout,), jnp.float32),
        "bn2_var": 1.0 + 0.1 * jax.random.uniform(ks[8], (cout,), jnp.float32),
        "w2": 0.1 * jax.random.normal(ks[9], (3, 3, cout, cout), jnp.float32),  # HWIO
    }
    if cin != cout:
        kss = jax.random.split(ks[0], 2)[1]
        p["ws"] = 0.1 * jax.random.normal(kss, (cin, cout), jnp.float32)        # 1x1 (IO)
    return p


def init_network_block_params(key, nb_layers, in_planes, out_planes, stride):
    params = []
    for i in range(nb_layers):
        key, sub = jax.random.split(key)
        cin = in_planes if i == 0 else out_planes
        s = stride if i == 0 else 1
        params.append(make_basic_block_params(sub, cin, out_planes, s))
    return params


# ----------------------------- pure-JAX reference ----------------------------

def _conv_ref(x, w, stride, pad):
    return lax.conv_general_dilated(
        x, w, (stride, stride), ((pad, pad), (pad, pad)),
        dimension_numbers=("NHWC", "HWIO", "NHWC"),
        precision=lax.Precision.HIGHEST)


def basic_block_ref(x, p):
    stride, equal = p["stride"], p["equal"]
    s1, b1 = _bn_fold(p["bn1_gamma"], p["bn1_beta"], p["bn1_mean"], p["bn1_var"])
    act1 = jnp.maximum(x * s1 + b1, 0.0)
    out = _conv_ref(act1, p["w1"], stride, 1)
    s2, b2 = _bn_fold(p["bn2_gamma"], p["bn2_beta"], p["bn2_mean"], p["bn2_var"])
    out = jnp.maximum(out * s2 + b2, 0.0)
    out = _conv_ref(out, p["w2"], 1, 1)
    if equal:
        res = x
    else:
        w11 = p["ws"].reshape(1, 1, *p["ws"].shape)
        res = _conv_ref(act1, w11, stride, 0)
    return res + out


def network_block_ref(x_nhwc, params_list):
    for p in params_list:
        x_nhwc = basic_block_ref(x_nhwc, p)
    return x_nhwc


# ----------------------------------- main ------------------------------------

if __name__ == "__main__":
    key = jax.random.PRNGKey(0)
    key, xkey, pkey = jax.random.split(key, 3)

    # WideResNet NetworkBlock group: nb_layers=2, in=8 -> out=16, stride=2,
    # 8x8 spatial, batch 2.
    N, C_IN, H, W = 2, 8, 8, 8
    C_OUT, NB_LAYERS, STRIDE = 16, 2, 2

    x_nchw = jax.random.normal(xkey, (N, C_IN, H, W), jnp.float32)  # PyTorch layout
    params = init_network_block_params(pkey, NB_LAYERS, C_IN, C_OUT, STRIDE)

    # NCHW -> (H, W, N, C) kernel layout (single boundary transpose; blocks then
    # chain with no intermediate XLA ops).
    x_hwnc = jnp.transpose(x_nchw, (2, 3, 0, 1))
    out_hwnc = network_block_forward(x_hwnc, params)
    out_nchw = jnp.transpose(out_hwnc, (2, 3, 0, 1))                # back to NCHW
    jax.block_until_ready(out_nchw)

    # Reference (NHWC pure JAX).
    x_nhwc = jnp.transpose(x_nchw, (0, 2, 3, 1))
    ref_nchw = jnp.transpose(network_block_ref(x_nhwc, params), (0, 3, 1, 2))

    assert out_nchw.shape == (N, C_OUT, H // STRIDE, W // STRIDE), out_nchw.shape
    err = float(jnp.max(jnp.abs(out_nchw - ref_nchw)))
    assert jnp.allclose(out_nchw, ref_nchw, atol=2e-3, rtol=2e-3), f"mismatch: {err}"

    print("KERNEL_OK")
</pallas_src>

<mosaic_0001>
module attributes {stable_mosaic.version = 11 : i64} {
  func.func @kernel(%arg0: i32, %arg1: memref<8x8x2x8xf32, #tpu.memory_space<vmem>>, %arg2: memref<1x8xf32, #tpu.memory_space<vmem>>, %arg3: memref<1x8xf32, #tpu.memory_space<vmem>>, %arg4: memref<72x16xf32, #tpu.memory_space<vmem>>, %arg5: memref<1x16xf32, #tpu.memory_space<vmem>>, %arg6: memref<1x16xf32, #tpu.memory_space<vmem>>, %arg7: memref<144x16xf32, #tpu.memory_space<vmem>>, %arg8: memref<8x16xf32, #tpu.memory_space<vmem>>, %arg9: memref<4x4x2x16xf32, #tpu.memory_space<vmem>>, %arg10: memref<10x10x2x8xf32, #tpu.memory_space<vmem>>, %arg11: memref<6x6x2x16xf32, #tpu.memory_space<vmem>>) attributes {dimension_semantics = [#tpu.dimension_semantics<arbitrary>], iteration_bounds = array<i64: 1>, scalar_prefetch = 0 : i64, scratch_operands = 2 : i64, tpu.core_type = #tpu.core_type<tc>, window_params = [{pipeline_mode = #tpu.pipeline_mode<synchronous>, transform_indices = @transform_0, window_bounds = array<i64: 8, 8, 2, 8>}, {pipeline_mode = #tpu.pipeline_mode<synchronous>, transform_indices = @transform_1, window_bounds = array<i64: 1, 8>}, {pipeline_mode = #tpu.pipeline_mode<synchronous>, transform_indices = @transform_2, window_bounds = array<i64: 1, 8>}, {pipeline_mode = #tpu.pipeline_mode<synchronous>, transform_indices = @transform_3, window_bounds = array<i64: 72, 16>}, {pipeline_mode = #tpu.pipeline_mode<synchronous>, transform_indices = @transform_4, window_bounds = array<i64: 1, 16>}, {pipeline_mode = #tpu.pipeline_mode<synchronous>, transform_indices = @transform_5, window_bounds = array<i64: 1, 16>}, {pipeline_mode = #tpu.pipeline_mode<synchronous>, transform_indices = @transform_6, window_bounds = array<i64: 144, 16>}, {pipeline_mode = #tpu.pipeline_mode<synchronous>, transform_indices = @transform_7, window_bounds = array<i64: 8, 16>}, {pipeline_mode = #tpu.pipeline_mode<synchronous>, transform_indices = @transform_8, window_bounds = array<i64: 4, 4, 2, 16>}]} {
    %c0 = arith.constant 0 : index
    %c0_0 = arith.constant 0 : index
    %c0_1 = arith.constant 0 : index
    %c0_2 = arith.constant 0 : index
    %0 = vector.load %arg1[%c0, %c0_0, %c0_1, %c0_2] : memref<8x8x2x8xf32, #tpu.memory_space<vmem>>, vector<8x8x2x8xf32>
    %c0_3 = arith.constant 0 : index
    %c0_4 = arith.constant 0 : index
    %1 = vector.load %arg2[%c0_3, %c0_4] : memref<1x8xf32, #tpu.memory_space<vmem>>, vector<1x8xf32>
    %2 = vector.shape_cast %1 : vector<1x8xf32> to vector<1x1x1x8xf32>
    %3 = vector.broadcast %2 : vector<1x1x1x8xf32> to vector<8x8x2x8xf32>
    %4 = arith.mulf %0, %3 : vector<8x8x2x8xf32>
    %c0_5 = arith.constant 0 : index
    %c0_6 = arith.constant 0 : index
    %5 = vector.load %arg3[%c0_5, %c0_6] : memref<1x8xf32, #tpu.memory_space<vmem>>, vector<1x8xf32>
    %6 = vector.shape_cast %5 : vector<1x8xf32> to vector<1x1x1x8xf32>
    %7 = vector.broadcast %6 : vector<1x1x1x8xf32> to vector<8x8x2x8xf32>
    %8 = arith.addf %4, %7 : vector<8x8x2x8xf32>
    %cst = arith.constant 0.000000e+00 : f32
    %9 = vector.broadcast %cst : f32 to vector<8x8x2x8xf32>
    %10 = arith.maximumf %8, %9 : vector<8x8x2x8xf32>
    %cst_7 = arith.constant 0.000000e+00 : f32
    %11 = vector.broadcast %cst_7 : f32 to vector<10x10x2x8xf32>
    %c0_8 = arith.constant 0 : index
    %c0_9 = arith.constant 0 : index
    %c0_10 = arith.constant 0 : index
    %c0_11 = arith.constant 0 : index
    %12 = vector.load %arg10[%c0_8, %c0_9, %c0_10, %c0_11] : memref<10x10x2x8xf32, #tpu.memory_space<vmem>>, vector<10x10x2x8xf32>
    tpu.vector_store %arg10[%c0_8, %c0_9, %c0_10, %c0_11], %11 {strides = array<i32>} : memref<10x10x2x8xf32, #tpu.memory_space<vmem>>, vector<10x10x2x8xf32>,
    %c1 = arith.constant 1 : index
    %c1_12 = arith.constant 1 : index
    %c0_13 = arith.constant 0 : index
    %c0_14 = arith.constant 0 : index
    %13 = vector.load %arg10[%c1, %c1_12, %c0_13, %c0_14] : memref<10x10x2x8xf32, #tpu.memory_space<vmem>>, vector<8x8x2x8xf32>
    tpu.vector_store %arg10[%c1, %c1_12, %c0_13, %c0_14], %10 {strides = array<i32>} : memref<10x10x2x8xf32, #tpu.memory_space<vmem>>, vector<8x8x2x8xf32>,
    %c0_15 = arith.constant 0 : index
    %c0_16 = arith.constant 0 : index
    %c0_17 = arith.constant 0 : index
    %c0_18 = arith.constant 0 : index
    %14 = tpu.strided_load %arg10[%c0_15, %c0_16, %c0_17, %c0_18] {strides = array<i32: 2, 2, 1, 1>} : memref<10x10x2x8xf32, #tpu.memory_space<vmem>>, vector<4x4x2x8xf32>
    %c0_19 = arith.constant 0 : index
    %c1_20 = arith.constant 1 : index
    %c0_21 = arith.constant 0 : index
    %c0_22 = arith.constant 0 : index
    %15 = tpu.strided_load %arg10[%c0_19, %c1_20, %c0_21, %c0_22] {strides = array<i32: 2, 2, 1, 1>} : memref<10x10x2x8xf32, #tpu.memory_space<vmem>>, vector<4x4x2x8xf32>
    %c0_23 = arith.constant 0 : index
    %c2 = arith.constant 2 : index
    %c0_24 = arith.constant 0 : index
    %c0_25 = arith.constant 0 : index
    %16 = tpu.strided_load %arg10[%c0_23, %c2, %c0_24, %c0_25] {strides = array<i32: 2, 2, 1, 1>} : memref<10x10x2x8xf32, #tpu.memory_space<vmem>>, vector<4x4x2x8xf32>
    %c1_26 = arith.constant 1 : index
    %c0_27 = arith.constant 0 : index
    %c0_28 = arith.constant 0 : index
    %c0_29 = arith.constant 0 : index
    %17 = tpu.strided_load %arg10[%c1_26, %c0_27, %c0_28, %c0_29] {strides = array<i32: 2, 2, 1, 1>} : memref<10x10x2x8xf32, #tpu.memory_space<vmem>>, vector<4x4x2x8xf32>
    %c1_30 = arith.constant 1 : index
    %c1_31 = arith.constant 1 : index
    %c0_32 = arith.constant 0 : index
    %c0_33 = arith.constant 0 : index
    %18 = tpu.strided_load %arg10[%c1_30, %c1_31, %c0_32, %c0_33] {strides = array<i32: 2, 2, 1, 1>} : memref<10x10x2x8xf32, #tpu.memory_space<vmem>>, vector<4x4x2x8xf32>
    %c1_34 = arith.constant 1 : index
    %c2_35 = arith.constant 2 : index
    %c0_36 = arith.constant 0 : index
    %c0_37 = arith.constant 0 : index
    %19 = tpu.strided_load %arg10[%c1_34, %c2_35, %c0_36, %c0_37] {strides = array<i32: 2, 2, 1, 1>} : memref<10x10x2x8xf32, #tpu.memory_space<vmem>>, vector<4x4x2x8xf32>
    %c2_38 = arith.constant 2 : index
    %c0_39 = arith.constant 0 : index
    %c0_40 = arith.constant 0 : index
    %c0_41 = arith.constant 0 : index
    %20 = tpu.strided_load %arg10[%c2_38, %c0_39, %c0_40, %c0_41] {strides = array<i32: 2, 2, 1, 1>} : memref<10x10x2x8xf32, #tpu.memory_space<vmem>>, vector<4x4x2x8xf32>
    %c2_42 = arith.constant 2 : index
    %c1_43 = arith.constant 1 : index
    %c0_44 = arith.constant 0 : index
    %c0_45 = arith.constant 0 : index
    %21 = tpu.strided_load %arg10[%c2_42, %c1_43, %c0_44, %c0_45] {strides = array<i32: 2, 2, 1, 1>} : memref<10x10x2x8xf32, #tpu.memory_space<vmem>>, vector<4x4x2x8xf32>
    %c2_46 = arith.constant 2 : index
    %c2_47 = arith.constant 2 : index
    %c0_48 = arith.constant 0 : index
    %c0_49 = arith.constant 0 : index
    %22 = tpu.strided_load %arg10[%c2_46, %c2_47, %c0_48, %c0_49] {strides = array<i32: 2, 2, 1, 1>} : memref<10x10x2x8xf32, #tpu.memory_space<vmem>>, vector<4x4x2x8xf32>
    %23 = tpu.concatenate %14, %15, %16, %17, %18, %19, %20, %21, %22 in 3 : vector<4x4x2x8xf32>, vector<4x4x2x8xf32>, vector<4x4x2x8xf32>, vector<4x4x2x8xf32>, vector<4x4x2x8xf32>, vector<4x4x2x8xf32>, vector<4x4x2x8xf32>, vector<4x4x2x8xf32>, vector<4x4x2x8xf32> -> vector<4x4x2x72xf32>
    %24 = vector.shape_cast %23 : vector<4x4x2x72xf32> to vector<32x72xf32>
    %c0_50 = arith.constant 0 : index
    %c0_51 = arith.constant 0 : index
    %25 = vector.load %arg4[%c0_50, %c0_51] : memref<72x16xf32, #tpu.memory_space<vmem>>, vector<72x16xf32>
    %cst_52 = arith.constant dense<0.000000e+00> : vector<32x16xf32>
    %26 = tpu.matmul %24, %25, %cst_52 {dimension_numbers = #tpu.dot_dimension_numbers<[1], [0], [0], [1], [0, 0, 1, 1], [], []>} : vector<32x72xf32>, vector<72x16xf32>, vector<32x16xf32> -> vector<32x16xf32>
    %c0_53 = arith.constant 0 : index
    %c0_54 = arith.constant 0 : index
    %27 = vector.load %arg5[%c0_53, %c0_54] : memref<1x16xf32, #tpu.memory_space<vmem>>, vector<1x16xf32>
    %28 = vector.broadcast %27 : vector<1x16xf32> to vector<32x16xf32>
    %29 = arith.mulf %26, %28 : vector<32x16xf32>
    %c0_55 = arith.constant 0 : index
    %c0_56 = arith.constant 0 : index
    %30 = vector.load %arg6[%c0_55, %c0_56] : memref<1x16xf32, #tpu.memory_space<vmem>>, vector<1x16xf32>
    %31 = vector.broadcast %30 : vector<1x16xf32> to vector<32x16xf32>
    %32 = arith.addf %29, %31 : vector<32x16xf32>
    %cst_57 = arith.constant 0.000000e+00 : f32
    %33 = vector.broadcast %cst_57 : f32 to vector<32x16xf32>
    %34 = arith.maximumf %32, %33 : vector<32x16xf32>
    %cst_58 = arith.constant 0.000000e+00 : f32
    %35 = vector.broadcast %cst_58 : f32 to vector<6x6x2x16xf32>
    %c0_59 = arith.constant 0 : index
    %c0_60 = arith.constant 0 : index
    %c0_61 = arith.constant 0 : index
    %c0_62 = arith.constant 0 : index
    %36 = vector.load %arg11[%c0_59, %c0_60, %c0_61, %c0_62] : memref<6x6x2x16xf32, #tpu.memory_space<vmem>>, vector<6x6x2x16xf32>
    tpu.vector_store %arg11[%c0_59, %c0_60, %c0_61, %c0_62], %35 {strides = array<i32>} : memref<6x6x2x16xf32, #tpu.memory_space<vmem>>, vector<6x6x2x16xf32>,
    %37 = vector.shape_cast %34 : vector<32x16xf32> to vector<4x4x2x16xf32>
    %c1_63 = arith.constant 1 : index
    %c1_64 = arith.constant 1 : index
    %c0_65 = arith.constant 0 : index
    %c0_66 = arith.constant 0 : index
    %38 = vector.load %arg11[%c1_63, %c1_64, %c0_65, %c0_66] : memref<6x6x2x16xf32, #tpu.memory_space<vmem>>, vector<4x4x2x16xf32>
    tpu.vector_store %arg11[%c1_63, %c1_64, %c0_65, %c0_66], %37 {strides = array<i32>} : memref<6x6x2x16xf32, #tpu.memory_space<vmem>>, vector<4x4x2x16xf32>,
    %c0_67 = arith.constant 0 : index
    %c0_68 = arith.constant 0 : index
    %c0_69 = arith.constant 0 : index
    %c0_70 = arith.constant 0 : index
    %39 = vector.load %arg11[%c0_67, %c0_68, %c0_69, %c0_70] : memref<6x6x2x16xf32, #tpu.memory_space<vmem>>, vector<4x4x2x16xf32>
    %c0_71 = arith.constant 0 : index
    %c1_72 = arith.constant 1 : index
    %c0_73 = arith.constant 0 : index
    %c0_74 = arith.constant 0 : index
    %40 = vector.load %arg11[%c0_71, %c1_72, %c0_73, %c0_74] : memref<6x6x2x16xf32, #tpu.memory_space<vmem>>, vector<4x4x2x16xf32>
    %c0_75 = arith.constant 0 : index
    %c2_76 = arith.constant 2 : index
    %c0_77 = arith.constant 0 : index
    %c0_78 = arith.constant 0 : index
    %41 = vector.load %arg11[%c0_75, %c2_76, %c0_77, %c0_78] : memref<6x6x2x16xf32, #tpu.memory_space<vmem>>, vector<4x4x2x16xf32>
    %c1_79 = arith.constant 1 : index
    %c0_80 = arith.constant 0 : index
    %c0_81 = arith.constant 0 : index
    %c0_82 = arith.constant 0 : index
    %42 = vector.load %arg11[%c1_79, %c0_80, %c0_81, %c0_82] : memref<6x6x2x16xf32, #tpu.memory_space<vmem>>, vector<4x4x2x16xf32>
    %c1_83 = arith.constant 1 : index
    %c1_84 = arith.constant 1 : index
    %c0_85 = arith.constant 0 : index
    %c0_86 = arith.constant 0 : index
    %43 = vector.load %arg11[%c1_83, %c1_84, %c0_85, %c0_86] : memref<6x6x2x16xf32, #tpu.memory_space<vmem>>, vector<4x4x2x16xf32>
    %c1_87 = arith.constant 1 : index
    %c2_88 = arith.constant 2 : index
    %c0_89 = arith.constant 0 : index
    %c0_90 = arith.constant 0 : index
    %44 = vector.load %arg11[%c1_87, %c2_88, %c0_89, %c0_90] : memref<6x6x2x16xf32, #tpu.memory_space<vmem>>, vector<4x4x2x16xf32>
    %c2_91 = arith.constant 2 : index
    %c0_92 = arith.constant 0 : index
    %c0_93 = arith.constant 0 : index
    %c0_94 = arith.constant 0 : index
    %45 = vector.load %arg11[%c2_91, %c0_92, %c0_93, %c0_94] : memref<6x6x2x16xf32, #tpu.memory_space<vmem>>, vector<4x4x2x16xf32>
    %c2_95 = arith.constant 2 : index
    %c1_96 = arith.constant 1 : index
    %c0_97 = arith.constant 0 : index
    %c0_98 = arith.constant 0 : index
    %46 = vector.load %arg11[%c2_95, %c1_96, %c0_97, %c0_98] : memref<6x6x2x16xf32, #tpu.memory_space<vmem>>, vector<4x4x2x16xf32>
    %c2_99 = arith.constant 2 : index
    %c2_100 = arith.constant 2 : index
    %c0_101 = arith.constant 0 : index
    %c0_102 = arith.constant 0 : index
    %47 = vector.load %arg11[%c2_99, %c2_100, %c0_101, %c0_102] : memref<6x6x2x16xf32, #tpu.memory_space<vmem>>, vector<4x4x2x16xf32>
    %48 = tpu.concatenate %39, %40, %41, %42, %43, %44, %45, %46, %47 in 3 : vector<4x4x2x16xf32>, vector<4x4x2x16xf32>, vector<4x4x2x16xf32>, vector<4x4x2x16xf32>, vector<4x4x2x16xf32>, vector<4x4x2x16xf32>, vector<4x4x2x16xf32>, vector<4x4x2x16xf32>, vector<4x4x2x16xf32> -> vector<4x4x2x144xf32>
    %49 = vector.shape_cast %48 : vector<4x4x2x144xf32> to vector<32x144xf32>
    %c0_103 = arith.constant 0 : index
    %c0_104 = arith.constant 0 : index
    %50 = vector.load %arg7[%c0_103, %c0_104] : memref<144x16xf32, #tpu.memory_space<vmem>>, vector<144x16xf32>
    %cst_105 = arith.constant dense<0.000000e+00> : vector<32x16xf32>
    %51 = tpu.matmul %49, %50, %cst_105 {dimension_numbers = #tpu.dot_dimension_numbers<[1], [0], [0], [1], [0, 0, 1, 1], [], []>} : vector<32x144xf32>, vector<144x16xf32>, vector<32x16xf32> -> vector<32x16xf32>
    %c1_106 = arith.constant 1 : index
    %c1_107 = arith.constant 1 : index
    %c0_108 = arith.constant 0 : index
    %c0_109 = arith.constant 0 : index
    %52 = tpu.strided_load %arg10[%c1_106, %c1_107, %c0_108, %c0_109] {strides = array<i32: 2, 2, 1, 1>} : memref<10x10x2x8xf32, #tpu.memory_space<vmem>>, vector<4x4x2x8xf32>
    %53 = vector.shape_cast %52 : vector<4x4x2x8xf32> to vector<32x8xf32>
    %c0_110 = arith.constant 0 : index
    %c0_111 = arith.constant 0 : index
    %54 = vector.load %arg8[%c0_110, %c0_111] : memref<8x16xf32, #tpu.memory_space<vmem>>, vector<8x16xf32>
    %cst_112 = arith.constant dense<0.000000e+00> : vector<32x16xf32>
    %55 = tpu.matmul %53, %54, %cst_112 {dimension_numbers = #tpu.dot_dimension_numbers<[1], [0], [0], [1], [0, 0, 1, 1], [], []>} : vector<32x8xf32>, vector<8x16xf32>, vector<32x16xf32> -> vector<32x16xf32>
    %56 = arith.addf %55, %51 : vector<32x16xf32>
    %57 = vector.shape_cast %56 : vector<32x16xf32> to vector<4x4x2x16xf32>
    %c0_113 = arith.constant 0 : index
    %c0_114 = arith.constant 0 : index
    %c0_115 = arith.constant 0 : index
    %c0_116 = arith.constant 0 : index
    %58 = vector.load %arg9[%c0_113, %c0_114, %c0_115, %c0_116] : memref<4x4x2x16xf32, #tpu.memory_space<vmem>>, vector<4x4x2x16xf32>
    tpu.vector_store %arg9[%c0_113, %c0_114, %c0_115, %c0_116], %57 {strides = array<i32>} : memref<4x4x2x16xf32, #tpu.memory_space<vmem>>, vector<4x4x2x16xf32>,
    return
  }
  func.func @transform_0(%arg0: i32) -> (i32, i32, i32, i32) {
    %c0_i32 = arith.constant 0 : i32
    %c0_i32_0 = arith.constant 0 : i32
    %c0_i32_1 = arith.constant 0 : i32
    %c0_i32_2 = arith.constant 0 : i32
    %c0_i32_3 = arith.constant 0 : i32
    return %c0_i32, %c0_i32_0, %c0_i32_1, %c0_i32_2 : i32, i32, i32, i32
  }
  func.func @transform_1(%arg0: i32) -> (i32, i32) {
    %c0_i32 = arith.constant 0 : i32
    %c0_i32_0 = arith.constant 0 : i32
    %c0_i32_1 = arith.constant 0 : i32
    return %c0_i32, %c0_i32_0 : i32, i32
  }
  func.func @transform_2(%arg0: i32) -> (i32, i32) {
    %c0_i32 = arith.constant 0 : i32
    %c0_i32_0 = arith.constant 0 : i32
    %c0_i32_1 = arith.constant 0 : i32
    return %c0_i32, %c0_i32_0 : i32, i32
  }
  func.func @transform_3(%arg0: i32) -> (i32, i32) {
    %c0_i32 = arith.constant 0 : i32
    %c0_i32_0 = arith.constant 0 : i32
    %c0_i32_1 = arith.constant 0 : i32
    return %c0_i32, %c0_i32_0 : i32, i32
  }
  func.func @transform_4(%arg0: i32) -> (i32, i32) {
    %c0_i32 = arith.constant 0 : i32
    %c0_i32_0 = arith.constant 0 : i32
    %c0_i32_1 = arith.constant 0 : i32
    return %c0_i32, %c0_i32_0 : i32, i32
  }
  func.func @transform_5(%arg0: i32) -> (i32, i32) {
    %c0_i32 = arith.constant 0 : i32
    %c0_i32_0 = arith.constant 0 : i32
    %c0_i32_1 = arith.constant 0 : i32
    return %c0_i32, %c0_i32_0 : i32, i32
  }
  func.func @transform_6(%arg0: i32) -> (i32, i32) {
    %c0_i32 = arith.constant 0 : i32
    %c0_i32_0 = arith.constant 0 : i32
    %c0_i32_1 = arith.constant 0 : i32
    return %c0_i32, %c0_i32_0 : i32, i32
  }
  func.func @transform_7(%arg0: i32) -> (i32, i32) {
    %c0_i32 = arith.constant 0 : i32
    %c0_i32_0 = arith.constant 0 : i32
    %c0_i32_1 = arith.constant 0 : i32
    return %c0_i32, %c0_i32_0 : i32, i32
  }
  func.func @transform_8(%arg0: i32) -> (i32, i32, i32, i32) {
    %c0_i32 = arith.constant 0 : i32
    %c0_i32_0 = arith.constant 0 : i32
    %c0_i32_1 = arith.constant 0 : i32
    %c0_i32_2 = arith.constant 0 : i32
    %c0_i32_3 = arith.constant 0 : i32
    return %c0_i32, %c0_i32_0, %c0_i32_1, %c0_i32_2 : i32, i32, i32, i32
  }
}

</mosaic_0001>

<bundles_post_ra>
// kernel: tpu_custom_call.1
= control target key start
LH: loop header
LB: loop body
LE: loop exit
PB: predicated region body
PF: predicated region fallthrough
CT: control target
= control target key end

     0   :  { %vm300_vm0 = vcmask 58368   ;;  %v5061_v1 = vmov 0.0   ;;  %s3162_s10 = smov 16   ;;  %s3163_s13 = smov 24   ;;  %s5052_s0 = inlined_call_operand.vmem [shape: f32[8,8,2,8], index: 0, kind: input, shape index: {}]   ;;  %s5053_s1 = inlined_call_operand.vmem [shape: f32[1,8], index: 1, kind: input, shape index: {}]   ;;  %s5054_s2 = inlined_call_operand.vmem [shape: f32[1,8], index: 2, kind: input, shape index: {}]   ;;  %s5055_s3 = inlined_call_operand.vmem [shape: f32[72,16], index: 3, kind: input, shape index: {}]   ;;  %s5056_s4 = inlined_call_operand.vmem [shape: f32[1,16], index: 4, kind: input, shape index: {}]   ;;  %s5057_s5 = inlined_call_operand.vmem [shape: f32[1,16], index: 5, kind: input, shape index: {}]   ;;  %s5058_s6 = inlined_call_operand.vmem [shape: f32[144,16], index: 6, kind: input, shape index: {}]   ;;  %s5059_s7 = inlined_call_operand.vmem [shape: f32[8,16], index: 7, kind: input, shape index: {}]   ;;  %s5060_s8 = inlined_call_operand.hbm [shape: f32[4,4,2,16], index: 8, kind: output, shape index: {}]  }
   0x1   :  { %v3224_v0 = vld [vmem:[%s5052_s0 + $0x14] sm:$0x3]  ;;  %306 = vst.msk [vmem:[#allocation2 + $0xa] sm:$0x3] %vm300_vm0, %v5061_v1  ;;  %301 = vst.msk [vmem:[#allocation2] sm:$0x3] %vm300_vm0, %v5061_v1 }
   0x2   :  { %302 = vst.msk [vmem:[#allocation2 + $0x2] sm:$0x3] %vm300_vm0, %v5061_v1  ;;  %303 = vst.msk [vmem:[#allocation2 + $0x4] sm:$0x3] %vm300_vm0, %v5061_v1  ;;  %v3391_v2 = vld [vmem:[%s5053_s1] ss:$0 sm:$0xff] }
   0x3   :  { %304 = vst.msk [vmem:[#allocation2 + $0x6] sm:$0x3] %vm300_vm0, %v5061_v1  ;;  %305 = vst.msk [vmem:[#allocation2 + $0x8] sm:$0x3] %vm300_vm0, %v5061_v1  ;;  %v3396_v3 = vld [vmem:[%s5054_s2] ss:$0 sm:$0xff]  ;;  %v111_v5 = vmul.f32 %v3391_v2, %v3224_v0 }
   0x4   :  { %307 = vst.msk [vmem:[#allocation2 + $0xc] sm:$0x3] %vm300_vm0, %v5061_v1  ;;  %308 = vst.msk [vmem:[#allocation2 + $0xe] sm:$0x3] %vm300_vm0, %v5061_v1  ;;  %v38_v4 = vld [vmem:[%s5052_s0 + $0x10] sm:$0x3] }
   0x5   :  { %309 = vst.msk [vmem:[#allocation2 + $0x10] sm:$0x3] %vm300_vm0, %v5061_v1  ;;  %311 = vst.msk [vmem:[#allocation2 + $0x14] sm:$0x3] %vm300_vm0, %v5061_v1  ;;  %v109_v6 = vmul.f32 %v3391_v2, %v38_v4  ;;  %v44_v7 = vld [vmem:[%s5052_s0 + $0x1c] sm:$0x3]  ;;  %v182_v16 = vadd.f32 %v3396_v3, %v111_v5 }
   0x6   :  { %312 = vst.msk [vmem:[#allocation2 + $0x16] sm:$0x3] %vm300_vm0, %v5061_v1  ;;  %313 = vst.msk [vmem:[#allocation2 + $0x18] sm:$0x3] %vm300_vm0, %v5061_v1  ;;  %v42_v8 = vld [vmem:[%s5052_s0 + $0x18] sm:$0x3]  ;;  %v115_v10 = vmul.f32 %v3391_v2, %v44_v7 }
   0x7   :  { %314 = vst.msk [vmem:[#allocation2 + $0x1a] sm:$0x3] %vm300_vm0, %v5061_v1  ;;  %315 = vst.msk [vmem:[#allocation2 + $0x1c] sm:$0x3] %vm300_vm0, %v5061_v1  ;;  %v41_v9 = vld [vmem:[%s5052_s0 + $0x16] sm:$0x3]  ;;  %v113_v11 = vmul.f32 %v3391_v2, %v42_v8  ;;  %v180_v17 = vadd.f32 %v3396_v3, %v109_v6 }
   0x8   :  { %316 = vst.msk [vmem:[#allocation2 + $0x1e] sm:$0x3] %vm300_vm0, %v5061_v1  ;;  %317 = vst.msk [vmem:[#allocation2 + $0x20] sm:$0x3] %vm300_vm0, %v5061_v1  ;;  %v112_v12 = vmul.f32 %v3391_v2, %v41_v9  ;;  %v39_v13 = vld [vmem:[%s5052_s0 + $0x12] sm:$0x3]  ;;  %v186_v22 = vadd.f32 %v3396_v3, %v115_v10 }
   0x9   :  { %318 = vst.msk [vmem:[#allocation2 + $0x22] sm:$0x3] %vm300_vm0, %v5061_v1  ;;  %319 = vst.msk [vmem:[#allocation2 + $0x24] sm:$0x3] %vm300_vm0, %v5061_v1  ;;  %v45_v14 = vld [vmem:[%s5052_s0 + $0x1e] sm:$0x3]  ;;  %v110_v18 = vmul.f32 %v3391_v2, %v39_v13  ;;  %v184_v23 = vadd.f32 %v3396_v3, %v113_v11 }
   0xa   :  { %321 = vst.msk [vmem:[#allocation2 + $0x28] sm:$0x3] %vm300_vm0, %v5061_v1  ;;  %322 = vst.msk [vmem:[#allocation2 + $0x2a] sm:$0x3] %vm300_vm0, %v5061_v1  ;;  %v43_v15 = vld [vmem:[%s5052_s0 + $0x1a] sm:$0x3]  ;;  %v116_v19 = vmul.f32 %v3391_v2, %v45_v14  ;;  %v183_v24 = vadd.f32 %v3396_v3, %v112_v12 }
   0xb   :  { %323 = vst.msk [vmem:[#allocation2 + $0x2c] sm:$0x3] %vm300_vm0, %v5061_v1  ;;  %324 = vst.msk [vmem:[#allocation2 + $0x2e] sm:$0x3] %vm300_vm0, %v5061_v1  ;;  %v31_v20 = vld [vmem:[%s5052_s0 + $0x2] sm:$0x3]  ;;  %v114_v25 = vmul.f32 %v3391_v2, %v43_v15  ;;  %v181_v31 = vadd.f32 %v3396_v3, %v110_v18 }
   0xc   :  { %325 = vst.msk [vmem:[#allocation2 + $0x30] sm:$0x3] %vm300_vm0, %v5061_v1  ;;  %326 = vst.msk [vmem:[#allocation2 + $0x32] sm:$0x3] %vm300_vm0, %v5061_v1  ;;  %v33_v21 = vld [vmem:[%s5052_s0 + $0x6] sm:$0x3]  ;;  %v187_v32 = vadd.f32 %v3396_v3, %v116_v19  ;;  %v102_v41 = vmul.f32 %v3391_v2, %v31_v20 }
   0xd   :  { %327 = vst.msk [vmem:[#allocation2 + $0x34] sm:$0x3] %vm300_vm0, %v5061_v1  ;;  %328 = vst.msk [vmem:[#allocation2 + $0x36] sm:$0x3] %vm300_vm0, %v5061_v1  ;;  %v35_v26 = vld [vmem:[%s5052_s0 + $0xa] sm:$0x3]  ;;  %v185_v38 = vadd.f32 %v3396_v3, %v114_v25  ;;  %v104_v42 = vmul.f32 %v3391_v2, %v33_v21 }
   0xe   :  { %329 = vst.msk [vmem:[#allocation2 + $0x38] sm:$0x3] %vm300_vm0, %v5061_v1  ;;  %331 = vst.msk [vmem:[#allocation2 + $0x3c] sm:$0x3] %vm300_vm0, %v5061_v1  ;;  %v47_v27 = vld [vmem:[%s5052_s0 + $0x22] sm:$0x3]  ;;  %v106_v43 = vmul.f32 %v3391_v2, %v35_v26  ;;  %v173_v53 = vadd.f32 %v3396_v3, %v102_v41 }
   0xf   :  { %332 = vst.msk [vmem:[#allocation2 + $0x3e] sm:$0x3] %vm300_vm0, %v5061_v1  ;;  %333 = vst.msk [vmem:[#allocation2 + $0x40] sm:$0x3] %vm300_vm0, %v5061_v1  ;;  %v49_v28 = vld [vmem:[%s5052_s0 + $0x26] sm:$0x3]  ;;  %v118_v44 = vmul.f32 %v3391_v2, %v47_v27  ;;  %v175_v54 = vadd.f32 %v3396_v3, %v104_v42 }
  0x10   :  { %334 = vst.msk [vmem:[#allocation2 + $0x42] sm:$0x3] %vm300_vm0, %v5061_v1  ;;  %335 = vst.msk [vmem:[#allocation2 + $0x44] sm:$0x3] %vm300_vm0, %v5061_v1  ;;  %v246_v29 = vmax.f32 %v182_v16, 0.0  ;;  %v244_v30 = vmax.f32 %v180_v17, 0.0  ;;  %v120_v45 = vmul.f32 %v3391_v2, %v49_v28  ;;  %v177_v56 = vadd.f32 %v3396_v3, %v106_v43 }
  0x11   :  { %336 = vst.msk [vmem:[#allocation2 + $0x46] sm:$0x3] %vm300_vm0, %v5061_v1  ;;  %337 = vst.msk [vmem:[#allocation2 + $0x48] sm:$0x3] %vm300_vm0, %v5061_v1  ;;  %v51_v33 = vld [vmem:[%s5052_s0 + $0x2a] sm:$0x3]  ;;  %v189_v57 = vadd.f32 %v3396_v3, %v118_v44 }
  0x12   :  { %338 = vst.msk [vmem:[#allocation2 + $0x4a] sm:$0x3] %vm300_vm0, %v5061_v1  ;;  %339 = vst.msk [vmem:[#allocation2 + $0x4c] sm:$0x3] %vm300_vm0, %v5061_v1  ;;  %v32_v34 = vld [vmem:[%s5052_s0 + $0x4] sm:$0x3]  ;;  %v122_v46 = vmul.f32 %v3391_v2, %v51_v33  ;;  %v191_v58 = vadd.f32 %v3396_v3, %v120_v45 }
  0x13   :  { %341 = vst.msk [vmem:[#allocation2 + $0x50] sm:$0x3] %vm300_vm0, %v5061_v1  ;;  %342 = vst.msk [vmem:[#allocation2 + $0x52] sm:$0x3] %vm300_vm0, %v5061_v1  ;;  %v250_v35 = vmax.f32 %v186_v22, 0.0  ;;  %v248_v36 = vmax.f32 %v184_v23, 0.0  ;;  %v103_v47 = vmul.f32 %v3391_v2, %v32_v34 }
  0x14   :  { %343 = vst.msk [vmem:[#allocation2 + $0x54] sm:$0x3] %vm300_vm0, %v5061_v1  ;;  %344 = vst.msk [vmem:[#allocation2 + $0x56] sm:$0x3] %vm300_vm0, %v5061_v1  ;;  %v247_v37 = vmax.f32 %v183_v24, 0.0  ;;  %s3161_s1 = smov 8   ;;  %v193_v61 = vadd.f32 %v3396_v3, %v122_v46 }
  0x15   :  { %345 = vst.msk [vmem:[#allocation2 + $0x58] sm:$0x3] %vm300_vm0, %v5061_v1  ;;  %346 = vst.msk [vmem:[#allocation2 + $0x5a] sm:$0x3] %vm300_vm0, %v5061_v1  ;;  %v485_v39 = vld [vmem:[#allocation2 + $0xa] sm:$0x3]  ;;  %v174_v62 = vadd.f32 %v3396_v3, %v103_v47 }
  0x16   :  { %347 = vst.msk [vmem:[#allocation2 + $0x5c] sm:$0x3] %vm300_vm0, %v5061_v1  ;;  %348 = vst.msk [vmem:[#allocation2 + $0x5e] sm:$0x3] %vm300_vm0, %v5061_v1  ;;  %v483_v40 = vld [vmem:[#allocation2 + $0x2] sm:$0x3]  ;;  %637 = vrot.lane.b32.xlu1 %v485_v39, %s3161_s1 }
  0x17   :  { %349 = vst.msk [vmem:[#allocation2 + $0x60] sm:$0x3] %vm300_vm0, %v5061_v1  ;;  %351 = vst.msk [vmem:[#allocation2 + $0x64] sm:$0x3] %vm300_vm0, %v5061_v1  ;;  %633 = vrot.lane.b32.xlu0 %v483_v40, %s3161_s1  ;;  %v30_v48 = vld [vmem:[%s5052_s0] sm:$0x3] }
  0x18   :  { %352 = vst.msk [vmem:[#allocation2 + $0x66] sm:$0x3] %vm300_vm0, %v5061_v1  ;;  %353 = vst.msk [vmem:[#allocation2 + $0x68] sm:$0x3] %vm300_vm0, %v5061_v1  ;;  %v486_v49 = vld [vmem:[#allocation2 + $0xe] sm:$0x3]  ;;  %v101_v7 = vmul.f32 %v3391_v2, %v30_v48 }
  0x19   :  { %354 = vst.msk [vmem:[#allocation2 + $0x6a] sm:$0x3] %vm300_vm0, %v5061_v1  ;;  %355 = vst.msk [vmem:[#allocation2 + $0x6c] sm:$0x3] %vm300_vm0, %v5061_v1  ;;  %v484_v50 = vld [vmem:[#allocation2 + $0x6] sm:$0x3] }
  0x1a   :  { %356 = vst.msk [vmem:[#allocation2 + $0x6e] sm:$0x3] %vm300_vm0, %v5061_v1  ;;  %357 = vst.msk [vmem:[#allocation2 + $0x70] sm:$0x3] %vm300_vm0, %v5061_v1  ;;  %v245_v51 = vmax.f32 %v181_v31, 0.0  ;;  %v251_v52 = vmax.f32 %v187_v32, 0.0  ;;  %639 = vrot.lane.b32.xlu1 %v486_v49, %s3161_s1  ;;  %v172_v17 = vadd.f32 %v3396_v3, %v101_v7 }
  0x1b   :  { %358 = vst.msk [vmem:[#allocation2 + $0x72] sm:$0x3] %vm300_vm0, %v5061_v1  ;;  %359 = vst.msk [vmem:[#allocation2 + $0x74] sm:$0x3] %vm300_vm0, %v5061_v1  ;;  %v249_v55 = vmax.f32 %v185_v38, 0.0  ;;  %v237_v59 = vmax.f32 %v173_v53, 0.0  ;;  %635 = vrot.lane.b32.xlu0 %v484_v50, %s3161_s1 }
  0x1c   :  { %361 = vst.msk [vmem:[#allocation2 + $0x78] sm:$0x3] %vm300_vm0, %v5061_v1  ;;  %362 = vst.msk [vmem:[#allocation2 + $0x7a] sm:$0x3] %vm300_vm0, %v5061_v1  ;;  %v239_v60 = vmax.f32 %v175_v54, 0.0  ;;  %v241_v4 = vmax.f32 %v177_v56, 0.0 }
  0x1d   :  { %363 = vst.msk [vmem:[#allocation2 + $0x7c] sm:$0x3] %vm300_vm0, %v5061_v1  ;;  %364 = vst.msk [vmem:[#allocation2 + $0x7e] sm:$0x3] %vm300_vm0, %v5061_v1  ;;  %v36_v63 = vld [vmem:[%s5052_s0 + $0xc] sm:$0x3] }
  0x1e   :  { %365 = vst.msk [vmem:[#allocation2 + $0x80] sm:$0x3] %vm300_vm0, %v5061_v1  ;;  %366 = vst.msk [vmem:[#allocation2 + $0x82] sm:$0x3] %vm300_vm0, %v5061_v1  ;;  %v34_v0 = vld [vmem:[%s5052_s0 + $0x8] sm:$0x3]  ;;  %v107_v11 = vmul.f32 %v3391_v2, %v36_v63 }
  0x1f   :  { %367 = vst.msk [vmem:[#allocation2 + $0x84] sm:$0x3] %vm300_vm0, %v5061_v1  ;;  %368 = vst.msk [vmem:[#allocation2 + $0x86] sm:$0x3] %vm300_vm0, %v5061_v1  ;;  %v253_v5 = vmax.f32 %v189_v57, 0.0  ;;  %v255_v6 = vmax.f32 %v191_v58, 0.0  ;;  %v105_v12 = vmul.f32 %v3391_v2, %v34_v0 }
  0x20   :  { %369 = vst.msk [vmem:[#allocation2 + $0x88] sm:$0x3] %vm300_vm0, %v5061_v1  ;;  %371 = vst.msk [vmem:[#allocation2 + $0x8c] sm:$0x3] %vm300_vm0, %v5061_v1  ;;  %v48_v8 = vld [vmem:[%s5052_s0 + $0x24] sm:$0x3]  ;;  %v178_v22 = vadd.f32 %v3396_v3, %v107_v11 }
  0x21   :  { %372 = vst.msk [vmem:[#allocation2 + $0x8e] sm:$0x3] %vm300_vm0, %v5061_v1  ;;  %373 = vst.msk [vmem:[#allocation2 + $0x90] sm:$0x3] %vm300_vm0, %v5061_v1  ;;  %v257_v9 = vmax.f32 %v193_v61, 0.0  ;;  %v238_v10 = vmax.f32 %v174_v62, 0.0  ;;  %v119_v18 = vmul.f32 %v3391_v2, %v48_v8  ;;  %v176_v23 = vadd.f32 %v3396_v3, %v105_v12 }
  0x22   :  { %374 = vst.msk [vmem:[#allocation2 + $0x92] sm:$0x3] %vm300_vm0, %v5061_v1  ;;  %375 = vst.msk [vmem:[#allocation2 + $0x94] sm:$0x3] %vm300_vm0, %v5061_v1  ;;  %v46_v13 = vld [vmem:[%s5052_s0 + $0x20] sm:$0x3] }
  0x23   :  { %376 = vst.msk [vmem:[#allocation2 + $0x96] sm:$0x3] %vm300_vm0, %v5061_v1  ;;  %377 = vst.msk [vmem:[#allocation2 + $0x98] sm:$0x3] %vm300_vm0, %v5061_v1  ;;  %v52_v14 = vld [vmem:[%s5052_s0 + $0x2c] sm:$0x3]  ;;  %v117_v19 = vmul.f32 %v3391_v2, %v46_v13  ;;  %v190_v26 = vadd.f32 %v3396_v3, %v119_v18 }
  0x24   :  { %378 = vst.msk [vmem:[#allocation2 + $0x9a] sm:$0x3] %vm300_vm0, %v5061_v1  ;;  %379 = vst.msk [vmem:[#allocation2 + $0x9c] sm:$0x3] %vm300_vm0, %v5061_v1  ;;  %v123_v20 = vmul.f32 %v3391_v2, %v52_v14  ;;  %v50_v21 = vld [vmem:[%s5052_s0 + $0x28] sm:$0x3] }
  0x25   :  { %381 = vst.msk [vmem:[#allocation2 + $0xa0] sm:$0x3] %vm300_vm0, %v5061_v1  ;;  %382 = vst.msk [vmem:[#allocation2 + $0xa2] sm:$0x3] %vm300_vm0, %v5061_v1  ;;  %v121_v24 = vmul.f32 %v3391_v2, %v50_v21  ;;  %v236_v25 = vmax.f32 %v172_v17, 0.0  ;;  %v188_v27 = vadd.f32 %v3396_v3, %v117_v19  ;;  %v242_v33 = vmax.f32 %v178_v22, 0.0 }
  0x26   :  { %383 = vst.msk [vmem:[#allocation2 + $0xa4] sm:$0x3] %vm300_vm0, %v5061_v1  ;;  %384 = vst.msk [vmem:[#allocation2 + $0xa6] sm:$0x3] %vm300_vm0, %v5061_v1  ;;  %v194_v28 = vadd.f32 %v3396_v3, %v123_v20  ;;  %v240_v34 = vmax.f32 %v176_v23, 0.0  ;;  %s3164_s22 = smov 32  }
  0x27   :  { %385 = vst.msk [vmem:[#allocation2 + $0xa8] sm:$0x3] %vm300_vm0, %v5061_v1  ;;  %386 = vst.msk [vmem:[#allocation2 + $0xaa] sm:$0x3] %vm300_vm0, %v5061_v1  ;;  %v252_v38 = vmax.f32 %v188_v27, 0.0 }
  0x28   :  { %387 = vst.msk [vmem:[#allocation2 + $0xac] sm:$0x3] %vm300_vm0, %v5061_v1  ;;  %388 = vst.msk [vmem:[#allocation2 + $0xae] sm:$0x3] %vm300_vm0, %v5061_v1  ;;  %v258_v40 = vmax.f32 %v194_v28, 0.0 }
  0x29   :  { %389 = vst.msk [vmem:[#allocation2 + $0xb0] sm:$0x3] %vm300_vm0, %v5061_v1  ;;  %412 = vst.msk [vmem:[#allocation2 + $0x2e] sm:$0x3] %vm300_vm0, %v246_v29  ;;  %v37_v29 = vld [vmem:[%s5052_s0 + $0xe] sm:$0x3] }
  0x2a   :  { %410 = vst.msk [vmem:[#allocation2 + $0x2a] sm:$0x3] %vm300_vm0, %v244_v30  ;;  %416 = vst.msk [vmem:[#allocation2 + $0x36] sm:$0x3] %vm300_vm0, %v250_v35  ;;  %v53_v30 = vld [vmem:[%s5052_s0 + $0x2e] sm:$0x3]  ;;  %v192_v35 = vadd.f32 %v3396_v3, %v121_v24 }
  0x2b   :  { %414 = vst.msk [vmem:[#allocation2 + $0x32] sm:$0x3] %vm300_vm0, %v248_v36  ;;  %413 = vst.msk [vmem:[#allocation2 + $0x30] sm:$0x3] %vm300_vm0, %v247_v37  ;;  %v108_v36 = vmul.f32 %v3391_v2, %v37_v29  ;;  %v254_v37 = vmax.f32 %v190_v26, 0.0  ;;  %v124_v39 = vmul.f32 %v3391_v2, %v53_v30 }
  0x2c   :  { %411 = vst.msk [vmem:[#allocation2 + $0x2c] sm:$0x3] %vm300_vm0, %v245_v51  ;;  %417 = vst.msk [vmem:[#allocation2 + $0x38] sm:$0x3] %vm300_vm0, %v251_v52  ;;  %v256_v41 = vmax.f32 %v192_v35, 0.0 }
  0x2d   :  { %415 = vst.msk [vmem:[#allocation2 + $0x34] sm:$0x3] %vm300_vm0, %v249_v55  ;;  %403 = vst.msk [vmem:[#allocation2 + $0x18] sm:$0x3] %vm300_vm0, %v237_v59  ;;  %v179_v42 = vadd.f32 %v3396_v3, %v108_v36  ;;  %v195_v43 = vadd.f32 %v3396_v3, %v124_v39  ;;  %v501_v44 = vld [vmem:[#allocation2 + $0x8] sm:$0x3] }
  0x2e   :  { %405 = vst.msk [vmem:[#allocation2 + $0x1c] sm:$0x3] %vm300_vm0, %v239_v60  ;;  %407 = vst.msk [vmem:[#allocation2 + $0x20] sm:$0x3] %vm300_vm0, %v241_v4  ;;  %v500_v45 = vld [vmem:[#allocation2 + $0x4] sm:$0x3] }
  0x2f   :  { %419 = vst.msk [vmem:[#allocation2 + $0x40] sm:$0x3] %vm300_vm0, %v253_v5  ;;  %421 = vst.msk [vmem:[#allocation2 + $0x44] sm:$0x3] %vm300_vm0, %v255_v6  ;;  %v243_v46 = vmax.f32 %v179_v42, 0.0  ;;  %v259_v47 = vmax.f32 %v195_v43, 0.0 }
  0x30   :  { %v488_v15 = vld [vmem:[#allocation2 + $0x2e] sm:$0x3]  ;;  %423 = vst.msk [vmem:[#allocation2 + $0x48] sm:$0x3] %vm300_vm0, %v257_v9  ;;  %404 = vst.msk [vmem:[#allocation2 + $0x1a] sm:$0x3] %vm300_vm0, %v238_v10 }
  0x31   :  { %v487_v16 = vld [vmem:[#allocation2 + $0x2a] sm:$0x3]  ;;  %643 = vrot.lane.b32.xlu1 %v488_v15, %s3161_s1  ;;  %v490_v31 = vld [vmem:[#allocation2 + $0x36] sm:$0x3]  ;;  %402 = vst.msk [vmem:[#allocation2 + $0x16] sm:$0x3] %vm300_vm0, %v236_v25 }
  0x32   :  { %641 = vrot.lane.b32.xlu0 %v487_v16, %s3161_s1  ;;  %v489_v32 = vld [vmem:[#allocation2 + $0x32] sm:$0x3]  ;;  %408 = vst.msk [vmem:[#allocation2 + $0x22] sm:$0x3] %vm300_vm0, %v242_v33  ;;  %406 = vst.msk [vmem:[#allocation2 + $0x1e] sm:$0x3] %vm300_vm0, %v240_v34 }
  0x33   :  { %420 = vst.msk [vmem:[#allocation2 + $0x42] sm:$0x3] %vm300_vm0, %v254_v37  ;;  %418 = vst.msk [vmem:[#allocation2 + $0x3e] sm:$0x3] %vm300_vm0, %v252_v38  ;;  %v503_v48 = vld [vmem:[#allocation2 + $0x10] sm:$0x3] }
  0x34   :  { %424 = vst.msk [vmem:[#allocation2 + $0x4a] sm:$0x3] %vm300_vm0, %v258_v40  ;;  %422 = vst.msk [vmem:[#allocation2 + $0x46] sm:$0x3] %vm300_vm0, %v256_v41  ;;  %v502_v49 = vld [vmem:[#allocation2 + $0xc] sm:$0x3] }
  0x35   :  { %647 = vrot.lane.b32.xlu1 %v490_v31, %s3161_s1  ;;  %409 = vst.msk [vmem:[#allocation2 + $0x24] sm:$0x3] %vm300_vm0, %v243_v46  ;;  %425 = vst.msk [vmem:[#allocation2 + $0x4c] sm:$0x3] %vm300_vm0, %v259_v47  ;;  %v55_v50 = vld [vmem:[%s5052_s0 + $0x32] sm:$0x3] }
  0x36   :  { %645 = vrot.lane.b32.xlu0 %v489_v32, %s3161_s1  ;;  %v126_v51 = vmul.f32 %v3391_v2, %v55_v50  ;;  %v59_v52 = vld [vmem:[%s5052_s0 + $0x3a] sm:$0x3]  ;;  %v57_v54 = vld [vmem:[%s5052_s0 + $0x36] sm:$0x3]  ;;  %v505_v57 = vld [vmem:[#allocation2 + $0x30] sm:$0x3] }
  0x37   :  { %v130_v53 = vmul.f32 %v3391_v2, %v59_v52  ;;  %v128_v56 = vmul.f32 %v3391_v2, %v57_v54  ;;  %v504_v58 = vld [vmem:[#allocation2 + $0x2c] sm:$0x3]  ;;  %v56_v62 = vld [vmem:[%s5052_s0 + $0x34] sm:$0x3]  ;;  %v54_v63 = vld [vmem:[%s5052_s0 + $0x30] sm:$0x3] }
  0x38   :  { %v197_v55 = vadd.f32 %v3396_v3, %v126_v51  ;;  %v127_v4 = vmul.f32 %v3391_v2, %v56_v62  ;;  %v125_v5 = vmul.f32 %v3391_v2, %v54_v63  ;;  %v60_v6 = vld [vmem:[%s5052_s0 + $0x3c] sm:$0x3]  ;;  %v58_v7 = vld [vmem:[%s5052_s0 + $0x38] sm:$0x3]  ;;  %v506_v12 = vld [vmem:[#allocation2 + $0x34] sm:$0x3] }
  0x39   :  { %699 = vrot.lane.b32.xlu1 %v501_v44, %s3162_s10  ;;  %v201_v59 = vadd.f32 %v3396_v3, %v130_v53  ;;  %v199_v61 = vadd.f32 %v3396_v3, %v128_v56  ;;  %v131_v9 = vmul.f32 %v3391_v2, %v60_v6  ;;  %v129_v10 = vmul.f32 %v3391_v2, %v58_v7  ;;  %v507_v11 = vld [vmem:[#allocation2 + $0x38] sm:$0x3]  ;;  %v517_v21 = vld [vmem:[#allocation2 + $0x14] sm:$0x3]  ;;  %v70_v25 = vld [vmem:[%s5052_s0 + $0x50] sm:$0x3] }
  0x3a   :  { %697 = vrot.lane.b32.xlu0 %v500_v45, %s3162_s10  ;;  %v261_v60 = vmax.f32 %v197_v55, 0.0  ;;  %v198_v13 = vadd.f32 %v3396_v3, %v127_v4  ;;  %v196_v14 = vadd.f32 %v3396_v3, %v125_v5  ;;  %v518_v22 = vld [vmem:[#allocation2 + $0x18] sm:$0x3]  ;;  %v72_v23 = vld [vmem:[%s5052_s0 + $0x54] sm:$0x3]  ;;  %v141_v28 = vmul.f32 %v3391_v2, %v70_v25 }
  0x3b   :  { %v265_v0 = vmax.f32 %v201_v59, 0.0  ;;  %v263_v8 = vmax.f32 %v199_v61, 0.0  ;;  %v202_v15 = vadd.f32 %v3396_v3, %v131_v9  ;;  %v200_v16 = vadd.f32 %v3396_v3, %v129_v10  ;;  %v76_v26 = vld [vmem:[%s5052_s0 + $0x5c] sm:$0x3]  ;;  %v74_v27 = vld [vmem:[%s5052_s0 + $0x58] sm:$0x3] }
  0x3c   :  { %427 = vst.msk [vmem:[#allocation2 + $0x54] sm:$0x3] %vm300_vm0, %v261_v60  ;;  %v262_v17 = vmax.f32 %v198_v13, 0.0  ;;  %v260_v18 = vmax.f32 %v196_v14, 0.0  ;;  %v143_v24 = vmul.f32 %v3391_v2, %v72_v23  ;;  %v147_v29 = vmul.f32 %v3391_v2, %v76_v26  ;;  %v61_v31 = vld [vmem:[%s5052_s0 + $0x3e] sm:$0x3] }
  0x3d   :  { %703 = vrot.lane.b32.xlu1 %v503_v48, %s3162_s10  ;;  %431 = vst.msk [vmem:[#allocation2 + $0x5c] sm:$0x3] %vm300_vm0, %v265_v0  ;;  %429 = vst.msk [vmem:[#allocation2 + $0x58] sm:$0x3] %vm300_vm0, %v263_v8  ;;  %v266_v19 = vmax.f32 %v202_v15, 0.0  ;;  %v264_v20 = vmax.f32 %v200_v16, 0.0  ;;  %v145_v30 = vmul.f32 %v3391_v2, %v74_v27  ;;  %v132_v33 = vmul.f32 %v3391_v2, %v61_v31 }
  0x3e   :  { %701 = vrot.lane.b32.xlu0 %v502_v49, %s3162_s10  ;;  %428 = vst.msk [vmem:[#allocation2 + $0x56] sm:$0x3] %vm300_vm0, %v262_v17  ;;  %426 = vst.msk [vmem:[#allocation2 + $0x52] sm:$0x3] %vm300_vm0, %v260_v18  ;;  %v214_v32 = vadd.f32 %v3396_v3, %v143_v24  ;;  %v519_v34 = vld [vmem:[#allocation2 + $0x1c] sm:$0x3]  ;;  %v212_v36 = vadd.f32 %v3396_v3, %v141_v28  ;;  %v218_v37 = vadd.f32 %v3396_v3, %v147_v29 }
  0x3f   :  { %432 = vst.msk [vmem:[#allocation2 + $0x5e] sm:$0x3] %vm300_vm0, %v266_v19  ;;  %430 = vst.msk [vmem:[#allocation2 + $0x5a] sm:$0x3] %vm300_vm0, %v264_v20  ;;  %v520_v35 = vld [vmem:[#allocation2 + $0x20] sm:$0x3]  ;;  %v216_v38 = vadd.f32 %v3396_v3, %v145_v30  ;;  %v203_v40 = vadd.f32 %v3396_v3, %v132_v33 }
  0x40   :  { %v278_v39 = vmax.f32 %v214_v32, 0.0  ;;  %v73_v41 = vld [vmem:[%s5052_s0 + $0x56] sm:$0x3]  ;;  %v276_v42 = vmax.f32 %v212_v36, 0.0  ;;  %v282_v43 = vmax.f32 %v218_v37, 0.0 }
  0x41   :  { %707 = vrot.lane.b32.xlu1 %v505_v57, %s3162_s10  ;;  %v280_v44 = vmax.f32 %v216_v38, 0.0  ;;  %v144_v45 = vmul.f32 %v3391_v2, %v73_v41  ;;  %v71_v46 = vld [vmem:[%s5052_s0 + $0x52] sm:$0x3]  ;;  %v521_v48 = vld [vmem:[#allocation2 + $0x3c] sm:$0x3]  ;;  %v267_v51 = vmax.f32 %v203_v40, 0.0 }
  0x42   :  { %705 = vrot.lane.b32.xlu0 %v504_v58, %s3162_s10  ;;  %444 = vst.msk [vmem:[#allocation2 + $0x7e] sm:$0x3] %vm300_vm0, %v278_v39  ;;  %v142_v47 = vmul.f32 %v3391_v2, %v71_v46  ;;  %v522_v49 = vld [vmem:[#allocation2 + $0x40] sm:$0x3]  ;;  %442 = vst.msk [vmem:[#allocation2 + $0x7a] sm:$0x3] %vm300_vm0, %v276_v42 }
  0x43   :  { %448 = vst.msk [vmem:[#allocation2 + $0x86] sm:$0x3] %vm300_vm0, %v282_v43  ;;  %446 = vst.msk [vmem:[#allocation2 + $0x82] sm:$0x3] %vm300_vm0, %v280_v44  ;;  %v215_v50 = vadd.f32 %v3396_v3, %v144_v45  ;;  %v523_v53 = vld [vmem:[#allocation2 + $0x44] sm:$0x3] }
  0x44   :  { %v213_v52 = vadd.f32 %v3396_v3, %v142_v47  ;;  %v77_v55 = vld [vmem:[%s5052_s0 + $0x5e] sm:$0x3]  ;;  %v75_v56 = vld [vmem:[%s5052_s0 + $0x5a] sm:$0x3]  ;;  %v524_v57 = vld [vmem:[#allocation2 + $0x48] sm:$0x3] }
  0x45   :  { %711 = vrot.lane.b32.xlu1 %v507_v11, %s3162_s10  ;;  %v279_v54 = vmax.f32 %v215_v50, 0.0  ;;  %433 = vst.msk [vmem:[#allocation2 + $0x60] sm:$0x3] %vm300_vm0, %v267_v51  ;;  %v148_v59 = vmul.f32 %v3391_v2, %v77_v55  ;;  %v146_v60 = vmul.f32 %v3391_v2, %v75_v56  ;;  %v63_v61 = vld [vmem:[%s5052_s0 + $0x42] sm:$0x3] }
  0x46   :  { %709 = vrot.lane.b32.xlu0 %v506_v12, %s3162_s10  ;;  %v277_v58 = vmax.f32 %v213_v52, 0.0  ;;  %v134_v62 = vmul.f32 %v3391_v2, %v63_v61  ;;  %v67_v63 = vld [vmem:[%s5052_s0 + $0x4a] sm:$0x3]  ;;  %v65_v0 = vld [vmem:[%s5052_s0 + $0x46] sm:$0x3] }
  0x47   :  { %445 = vst.msk [vmem:[#allocation2 + $0x80] sm:$0x3] %vm300_vm0, %v279_v54  ;;  %v79_v4 = vld [vmem:[%s5052_s0 + $0x62] sm:$0x3]  ;;  %v219_v5 = vadd.f32 %v3396_v3, %v148_v59  ;;  %v217_v6 = vadd.f32 %v3396_v3, %v146_v60  ;;  %v138_v7 = vmul.f32 %v3391_v2, %v67_v63  ;;  %v136_v8 = vmul.f32 %v3391_v2, %v65_v0  ;;  %v83_v9 = vld [vmem:[%s5052_s0 + $0x6a] sm:$0x3] }
  0x48   :  { %443 = vst.msk [vmem:[#allocation2 + $0x7c] sm:$0x3] %vm300_vm0, %v277_v58  ;;  %v81_v10 = vld [vmem:[%s5052_s0 + $0x66] sm:$0x3]  ;;  %v205_v11 = vadd.f32 %v3396_v3, %v134_v62  ;;  %v150_v12 = vmul.f32 %v3391_v2, %v79_v4  ;;  %v154_v13 = vmul.f32 %v3391_v2, %v83_v9  ;;  %v64_v15 = vld [vmem:[%s5052_s0 + $0x44] sm:$0x3] }
  0x49   :  { %763 = vrot.lane.b32.xlu1 %v518_v22, %s3163_s13  ;;  %v152_v14 = vmul.f32 %v3391_v2, %v81_v10  ;;  %v534_v16 = vld [vmem:[#allocation2 + $0x1a] sm:$0x3]  ;;  %v533_v17 = vld [vmem:[#allocation2 + $0x16] sm:$0x3]  ;;  %v209_v18 = vadd.f32 %v3396_v3, %v138_v7  ;;  %v207_v19 = vadd.f32 %v3396_v3, %v136_v8  ;;  %v135_v20 = vmul.f32 %v3391_v2, %v64_v15  ;;  %v68_v26 = vld [vmem:[%s5052_s0 + $0x4c] sm:$0x3] }
  0x4a   :  { %761 = vrot.lane.b32.xlu0 %v517_v21, %s3163_s13  ;;  %v62_v21 = vld [vmem:[%s5052_s0 + $0x40] sm:$0x3]  ;;  %v283_v22 = vmax.f32 %v219_v5, 0.0  ;;  %v281_v23 = vmax.f32 %v217_v6, 0.0  ;;  %v269_v24 = vmax.f32 %v205_v11, 0.0  ;;  %v221_v25 = vadd.f32 %v3396_v3, %v150_v12 }
  0x4b   :  { %v273_v27 = vmax.f32 %v209_v18, 0.0  ;;  %v271_v28 = vmax.f32 %v207_v19, 0.0  ;;  %v225_v29 = vadd.f32 %v3396_v3, %v154_v13  ;;  %v223_v30 = vadd.f32 %v3396_v3, %v152_v14  ;;  %v66_v31 = vld [vmem:[%s5052_s0 + $0x48] sm:$0x3]  ;;  %v80_v32 = vld [vmem:[%s5052_s0 + $0x64] sm:$0x3] }
  0x4c   :  { %449 = vst.msk [vmem:[#allocation2 + $0x88] sm:$0x3] %vm300_vm0, %v283_v22  ;;  %447 = vst.msk [vmem:[#allocation2 + $0x84] sm:$0x3] %vm300_vm0, %v281_v23  ;;  %v285_v33 = vmax.f32 %v221_v25, 0.0  ;;  %v139_v36 = vmul.f32 %v3391_v2, %v68_v26  ;;  %v137_v40 = vmul.f32 %v3391_v2, %v66_v31  ;;  %v151_v45 = vmul.f32 %v3391_v2, %v80_v32 }
  0x4d   :  { %767 = vrot.lane.b32.xlu1 %v520_v35, %s3163_s13  ;;  %435 = vst.msk [vmem:[#allocation2 + $0x68] sm:$0x3] %vm300_vm0, %v269_v24  ;;  %v133_v35 = vmul.f32 %v3391_v2, %v62_v21  ;;  %v536_v37 = vld [vmem:[#allocation2 + $0x22] sm:$0x3]  ;;  %439 = vst.msk [vmem:[#allocation2 + $0x70] sm:$0x3] %vm300_vm0, %v273_v27 }
  0x4e   :  { %765 = vrot.lane.b32.xlu0 %v519_v34, %s3163_s13  ;;  %v206_v34 = vadd.f32 %v3396_v3, %v135_v20  ;;  %437 = vst.msk [vmem:[#allocation2 + $0x6c] sm:$0x3] %vm300_vm0, %v271_v28  ;;  %v289_v38 = vmax.f32 %v225_v29, 0.0  ;;  %v287_v39 = vmax.f32 %v223_v30, 0.0  ;;  %v535_v41 = vld [vmem:[#allocation2 + $0x1e] sm:$0x3]  ;;  %v210_v44 = vadd.f32 %v3396_v3, %v139_v36 }
  0x4f   :  { %451 = vst.msk [vmem:[#allocation2 + $0x90] sm:$0x3] %vm300_vm0, %v285_v33  ;;  %v204_v43 = vadd.f32 %v3396_v3, %v133_v35  ;;  %v78_v46 = vld [vmem:[%s5052_s0 + $0x60] sm:$0x3]  ;;  %v208_v47 = vadd.f32 %v3396_v3, %v137_v40  ;;  %v82_v50 = vld [vmem:[%s5052_s0 + $0x68] sm:$0x3]  ;;  %v222_v55 = vadd.f32 %v3396_v3, %v151_v45 }
  0x50   :  { %v270_v42 = vmax.f32 %v206_v34, 0.0  ;;  %455 = vst.msk [vmem:[#allocation2 + $0x98] sm:$0x3] %vm300_vm0, %v289_v38  ;;  %453 = vst.msk [vmem:[#allocation2 + $0x94] sm:$0x3] %vm300_vm0, %v287_v39  ;;  %v274_v54 = vmax.f32 %v210_v44, 0.0  ;;  %v153_v59 = vmul.f32 %v3391_v2, %v82_v50 }
  0x51   :  { %771 = vrot.lane.b32.xlu1 %v522_v49, %s3163_s13  ;;  %v84_v49 = vld [vmem:[%s5052_s0 + $0x6c] sm:$0x3]  ;;  %v538_v51 = vld [vmem:[#allocation2 + $0x42] sm:$0x3]  ;;  %v537_v52 = vld [vmem:[#allocation2 + $0x3e] sm:$0x3] }
  0x52   :  { %769 = vrot.lane.b32.xlu0 %v521_v48, %s3163_s13  ;;  %v149_v48 = vmul.f32 %v3391_v2, %v78_v46  ;;  %436 = vst.msk [vmem:[#allocation2 + $0x6a] sm:$0x3] %vm300_vm0, %v270_v42  ;;  %v155_v56 = vmul.f32 %v3391_v2, %v84_v49  ;;  %440 = vst.msk [vmem:[#allocation2 + $0x72] sm:$0x3] %vm300_vm0, %v274_v54  ;;  %v286_v60 = vmax.f32 %v222_v55, 0.0 }
  0x53   :  { %v69_v62 = vld [vmem:[%s5052_s0 + $0x4e] sm:$0x3]  ;;  %v224_v63 = vadd.f32 %v3396_v3, %v153_v59  ;;  %v540_v8 = vld [vmem:[#allocation2 + $0x4a] sm:$0x3]  ;;  %v539_v9 = vld [vmem:[#allocation2 + $0x46] sm:$0x3] }
  0x54   :  { %v220_v58 = vadd.f32 %v3396_v3, %v149_v48  ;;  %v226_v61 = vadd.f32 %v3396_v3, %v155_v56  ;;  %v140_v0 = vmul.f32 %v3391_v2, %v69_v62  ;;  %452 = vst.msk [vmem:[#allocation2 + $0x92] sm:$0x3] %vm300_vm0, %v286_v60 }
  0x55   :  { %775 = vrot.lane.b32.xlu1 %v524_v57, %s3163_s13  ;;  %v272_v57 = vmax.f32 %v208_v47, 0.0  ;;  %v288_v6 = vmax.f32 %v224_v63, 0.0 }
  0x56   :  { %773 = vrot.lane.b32.xlu0 %v523_v53, %s3163_s13  ;;  %v268_v53 = vmax.f32 %v204_v43, 0.0  ;;  %v284_v4 = vmax.f32 %v220_v58, 0.0  ;;  %v290_v5 = vmax.f32 %v226_v61, 0.0  ;;  %v211_v7 = vadd.f32 %v3396_v3, %v140_v0 }
  0x57   :  { %438 = vst.msk [vmem:[#allocation2 + $0x6e] sm:$0x3] %vm300_vm0, %v272_v57  ;;  %454 = vst.msk [vmem:[#allocation2 + $0x96] sm:$0x3] %vm300_vm0, %v288_v6 }
  0x58   :  { %434 = vst.msk [vmem:[#allocation2 + $0x66] sm:$0x3] %vm300_vm0, %v268_v53  ;;  %450 = vst.msk [vmem:[#allocation2 + $0x8e] sm:$0x3] %vm300_vm0, %v284_v4  ;;  %v275_v10 = vmax.f32 %v211_v7, 0.0 }
  0x59   :  { %827 = vrot.lane.b32.xlu1 %v534_v16, %s3164_s22  ;;  %456 = vst.msk [vmem:[#allocation2 + $0x9a] sm:$0x3] %vm300_vm0, %v290_v5 }
  0x5a   :  { %825 = vrot.lane.b32.xlu0 %v533_v17, %s3164_s22 }
  0x5d   :  { %831 = vrot.lane.b32.xlu1 %v536_v37, %s3164_s22 }
  0x5e   :  { %829 = vrot.lane.b32.xlu0 %v535_v41, %s3164_s22 }
  0x61   :  { %835 = vrot.lane.b32.xlu1 %v538_v51, %s3164_s22 }
  0x62   :  { %833 = vrot.lane.b32.xlu0 %v537_v52, %s3164_s22 }
  0x63   :  { %13 = vsyncpa [#allocation5], 0  ;;  %v551_v11 = vld [vmem:[#allocation2 + $0x1c] sm:$0x3]  ;;  %441 = vst.msk [vmem:[#allocation2 + $0x74] sm:$0x3] %vm300_vm0, %v275_v10 }
  0x64   :  { %v550_v12 = vld [vmem:[#allocation2 + $0x18] sm:$0x3]  ;;  %v85_v13 = vld [vmem:[%s5052_s0 + $0x6e] sm:$0x3]  ;;  %s3165_s12 = smov 40   ;;  %s3166_s19 = smov 48  }
  0x65   :  { %839 = vrot.lane.b32.xlu1 %v540_v8, %s3164_s22  ;;  %v156_v14 = vmul.f32 %v3391_v2, %v85_v13  ;;  %v552_v15 = vld [vmem:[#allocation2 + $0x20] sm:$0x3]  ;;  %v553_v17 = vld [vmem:[#allocation2 + $0x24] sm:$0x3]  ;;  %v557_v21 = vld [vmem:[#allocation2 + $0x4c] sm:$0x3] }
  0x66   :  { %837 = vrot.lane.b32.xlu0 %v539_v9, %s3164_s22  ;;  %v555_v19 = vld [vmem:[#allocation2 + $0x44] sm:$0x3]  ;;  %v554_v20 = vld [vmem:[#allocation2 + $0x40] sm:$0x3]  ;;  %v556_v22 = vld [vmem:[#allocation2 + $0x48] sm:$0x3] }
  0x67   :  { %v227_v16 = vadd.f32 %v3396_v3, %v156_v14  ;;  %v87_v23 = vld [vmem:[%s5052_s0 + $0x72] sm:$0x3]  ;;  %v567_v25 = vld [vmem:[#allocation2 + $0x28] sm:$0x3]  ;;  %v568_v27 = vld [vmem:[#allocation2 + $0x2c] sm:$0x3] }
  0x68   :  { %v158_v24 = vmul.f32 %v3391_v2, %v87_v23  ;;  %v91_v28 = vld [vmem:[%s5052_s0 + $0x7a] sm:$0x3]  ;;  %v89_v29 = vld [vmem:[%s5052_s0 + $0x76] sm:$0x3]  ;;  %v570_v35 = vld [vmem:[#allocation2 + $0x34] sm:$0x3] }
  0x69   :  { %891 = vrot.lane.b32.xlu1 %v551_v11, %s3165_s12  ;;  %v291_v18 = vmax.f32 %v227_v16, 0.0  ;;  %v162_v31 = vmul.f32 %v3391_v2, %v91_v28  ;;  %v160_v32 = vmul.f32 %v3391_v2, %v89_v29  ;;  %v569_v36 = vld [vmem:[#allocation2 + $0x30] sm:$0x3]  ;;  %v572_v39 = vld [vmem:[#allocation2 + $0x54] sm:$0x3]  ;;  %s3167_s29 = smov 56  }
  0x6a   :  { %889 = vrot.lane.b32.xlu0 %v550_v12, %s3165_s12  ;;  %v229_v26 = vadd.f32 %v3396_v3, %v158_v24  ;;  %v571_v40 = vld [vmem:[#allocation2 + $0x50] sm:$0x3]  ;;  %v574_v41 = vld [vmem:[#allocation2 + $0x5c] sm:$0x3]  ;;  %v573_v42 = vld [vmem:[#allocation2 + $0x58] sm:$0x3] }
  0x6b   :  { %457 = vst.msk [vmem:[#allocation2 + $0x9c] sm:$0x3] %vm300_vm0, %v291_v18  ;;  %v233_v33 = vadd.f32 %v3396_v3, %v162_v31  ;;  %v231_v34 = vadd.f32 %v3396_v3, %v160_v32  ;;  %v88_v43 = vld [vmem:[%s5052_s0 + $0x74] sm:$0x3]  ;;  %v86_v44 = vld [vmem:[%s5052_s0 + $0x70] sm:$0x3] }
  0x6c   :  { %v293_v30 = vmax.f32 %v229_v26, 0.0  ;;  %v159_v45 = vmul.f32 %v3391_v2, %v88_v43  ;;  %v157_v46 = vmul.f32 %v3391_v2, %v86_v44  ;;  %v585_v47 = vld [vmem:[#allocation2 + $0x2e] sm:$0x3]  ;;  %v584_v50 = vld [vmem:[#allocation2 + $0x2a] sm:$0x3]  ;;  %v1268_v28 = vld [vmem:[%s5055_s3 + $0x18] sm:$0xff] }
  0x6d   :  { %895 = vrot.lane.b32.xlu1 %v553_v17, %s3165_s12  ;;  %v297_v37 = vmax.f32 %v233_v33, 0.0  ;;  %v295_v38 = vmax.f32 %v231_v34, 0.0  ;;  %v92_v51 = vld [vmem:[%s5052_s0 + $0x7c] sm:$0x3]  ;;  %v90_v52 = vld [vmem:[%s5052_s0 + $0x78] sm:$0x3] }
  0x6e   :  { %893 = vrot.lane.b32.xlu0 %v552_v15, %s3165_s12  ;;  %459 = vst.msk [vmem:[#allocation2 + $0xa4] sm:$0x3] %vm300_vm0, %v293_v30  ;;  %v230_v48 = vadd.f32 %v3396_v3, %v159_v45  ;;  %v228_v49 = vadd.f32 %v3396_v3, %v157_v46  ;;  %v163_v55 = vmul.f32 %v3391_v2, %v92_v51  ;;  %v587_v59 = vld [vmem:[#allocation2 + $0x36] sm:$0x3]  ;;  %v586_v60 = vld [vmem:[#allocation2 + $0x32] sm:$0x3] }
  0x6f   :  { %463 = vst.msk [vmem:[#allocation2 + $0xac] sm:$0x3] %vm300_vm0, %v297_v37  ;;  %461 = vst.msk [vmem:[#allocation2 + $0xa8] sm:$0x3] %vm300_vm0, %v295_v38  ;;  %v161_v56 = vmul.f32 %v3391_v2, %v90_v52  ;;  %v492_v63 = vld [vmem:[#allocation2 + $0x56] sm:$0x3] }
  0x70   :  { %v294_v53 = vmax.f32 %v230_v48, 0.0  ;;  %v292_v54 = vmax.f32 %v228_v49, 0.0  ;;  %v234_v57 = vadd.f32 %v3396_v3, %v163_v55  ;;  %v491_v0 = vld [vmem:[#allocation2 + $0x52] sm:$0x3]  ;;  %v494_v4 = vld [vmem:[#allocation2 + $0x5e] sm:$0x3] }
  0x71   :  { %899 = vrot.lane.b32.xlu1 %v555_v19, %s3165_s12  ;;  %v232_v58 = vadd.f32 %v3396_v3, %v161_v56  ;;  %v493_v5 = vld [vmem:[#allocation2 + $0x5a] sm:$0x3]  ;;  %v589_v6 = vld [vmem:[#allocation2 + $0x56] sm:$0x3]  ;;  %v588_v7 = vld [vmem:[#allocation2 + $0x52] sm:$0x3] }
  0x72   :  { %897 = vrot.lane.b32.xlu0 %v554_v20, %s3165_s12  ;;  %460 = vst.msk [vmem:[#allocation2 + $0xa6] sm:$0x3] %vm300_vm0, %v294_v53  ;;  %458 = vst.msk [vmem:[#allocation2 + $0xa2] sm:$0x3] %vm300_vm0, %v292_v54  ;;  %v298_v61 = vmax.f32 %v234_v57, 0.0  ;;  %v1265_v20 = vld [vmem:[%s5055_s3] sm:$0xff] }
  0x73   :  { %v296_v62 = vmax.f32 %v232_v58, 0.0  ;;  %v93_v8 = vld [vmem:[%s5052_s0 + $0x7e] sm:$0x3]  ;;  %v590_v12 = vld [vmem:[#allocation2 + $0x5a] sm:$0x3]  ;;  %s3168_s0 = smov 64  }
  0x74   :  { %464 = vst.msk [vmem:[#allocation2 + $0xae] sm:$0x3] %vm300_vm0, %v298_v61  ;;  %v164_v9 = vmul.f32 %v3391_v2, %v93_v8  ;;  %v591_v11 = vld [vmem:[#allocation2 + $0x5e] sm:$0x3]  ;;  %v602_v2 = vld [vmem:[#allocation2 + $0x30] sm:$0x3] }
  0x75   :  { %903 = vrot.lane.b32.xlu1 %v557_v21, %s3165_s12  ;;  %462 = vst.msk [vmem:[#allocation2 + $0xaa] sm:$0x3] %vm300_vm0, %v296_v62  ;;  %v601_v16 = vld [vmem:[#allocation2 + $0x2c] sm:$0x3]  ;;  %v603_v19 = vld [vmem:[#allocation2 + $0x34] sm:$0x3] }
  0x76   :  { %901 = vrot.lane.b32.xlu0 %v556_v22, %s3165_s12  ;;  %v235_v10 = vadd.f32 %v3396_v3, %v164_v9  ;;  %v604_v3 = vld [vmem:[#allocation2 + $0x38] sm:$0x3]  ;;  %v1266_v21 = vld [vmem:[%s5055_s3 + $0x8] sm:$0xff]  ;;  %v495_v26 = vld [vmem:[#allocation2 + $0x7a] sm:$0x3]  ;;  %vm1129_vm1 = vcmask 64512  }
  0x77   :  { %v3061_v24 = vpack.c.bf16 %v1266_v21, %v1265_v20  ;;  %v498_v32 = vld [vmem:[#allocation2 + $0x86] sm:$0x3]  ;;  %v497_v33 = vld [vmem:[#allocation2 + $0x82] sm:$0x3]  ;;  %v511_v46 = vld [vmem:[#allocation2 + $0x60] sm:$0x3] }
  0x78   :  { %v299_v15 = vmax.f32 %v235_v10, 0.0  ;;  %v1269_v34 = vld [vmem:[%s5055_s3 + $0x20] sm:$0xff]  ;;  %v606_v51 = vld [vmem:[#allocation2 + $0x58] sm:$0x3]  ;;  %v605_v52 = vld [vmem:[#allocation2 + $0x54] sm:$0x3] }
  0x79   :  { %955 = vrot.lane.b32.xlu1 %v568_v27, %s3166_s19  ;;  %3062 = vmatprep.subr.bf16.mxu0 %v3061_v24  ;;  %v1267_v27 = vld [vmem:[%s5055_s3 + $0x10] sm:$0xff]  ;;  %v608_v55 = vld [vmem:[#allocation2 + $0x60] sm:$0x3]  ;;  %v607_v56 = vld [vmem:[#allocation2 + $0x5c] sm:$0x3]  ;;  %vm1146_vm2 = vcmask 130048  }
  0x7a   :  { %953 = vrot.lane.b32.xlu0 %v567_v25, %s3166_s19  ;;  %465 = vst.msk [vmem:[#allocation2 + $0xb0] sm:$0x3] %vm300_vm0, %v299_v15  ;;  %v496_v25 = vld [vmem:[#allocation2 + $0x7e] sm:$0x3]  ;;  %3064 = vmatpush3.bf16.msra.mxu0 %v3061_v24  ;;  %v3065_v31 = vpack.c.bf16 %v1268_v28, %v1267_v27  ;;  %v528_v10 = vld [vmem:[#allocation2 + $0x70] sm:$0x3] }
  0x7b   :  { %v532_v20 = vld [vmem:[#allocation2 + $0x98] sm:$0x3]  ;;  %v531_v21 = vld [vmem:[#allocation2 + $0x94] sm:$0x3]  ;;  %v541_v27 = vld [vmem:[#allocation2 + $0x66] sm:$0x3] }
  0x7c   :  { %3066 = vmatprep.subr.bf16.mxu0 %v3065_v31  ;;  %v594_v1 = vld [vmem:[#allocation2 + $0x82] sm:$0x3]  ;;  %vm1163_vm3 = vcmask 195584   ;;  %vm1180_vm4 = vcmask 261120   ;;  %vm1197_vm5 = vcmask 326656   ;;  %vm1214_vm6 = vcmask 392192  }
  0x7d   :  { %959 = vrot.lane.b32.xlu1 %v570_v35, %s3166_s19  ;;  %v1270_v35 = vld [vmem:[%s5055_s3 + $0x28] sm:$0xff]  ;;  %vm1231_vm7 = vcmask 457728   ;;  %vm1248_vm8 = vcmask 523264   ;;  %vm1358_vm9 = vcmask 588800   ;;  %vm1478_vm10 = vcmask 123904  }
  0x7e   :  { %957 = vrot.lane.b32.xlu0 %v569_v36, %s3166_s19  ;;  %3068 = vmatpush3.bf16.msra.mxu0 %v3065_v31  ;;  %v3069_v38 = vpack.c.bf16 %v1270_v35, %v1269_v34  ;;  %vm2283_vm11 = vcmask 654336   ;;  %vm2300_vm12 = vcmask 785408   ;;  %vm2317_vm13 = vcmask 916480  }
  0x80   :  { %3070 = vmatprep.subr.bf16.mxu0 %v3069_v38 }
  0x81   :  { %963 = vrot.lane.b32.xlu1 %v572_v39, %s3166_s19  ;;  %v508_v39 = vld [vmem:[#allocation2 + $0x54] sm:$0x3] }
  0x82   :  { %961 = vrot.lane.b32.xlu0 %v571_v40, %s3166_s19  ;;  %v509_v40 = vld [vmem:[#allocation2 + $0x58] sm:$0x3]  ;;  %3072 = vmatpush3.bf16.msra.mxu0 %v3069_v38  ;;  %v546_v38 = vld [vmem:[#allocation2 + $0x92] sm:$0x3] }
  0x85   :  { %967 = vrot.lane.b32.xlu1 %v574_v41, %s3166_s19  ;;  %v1271_v41 = vld [vmem:[%s5055_s3 + $0x30] sm:$0xff] }
  0x86   :  { %965 = vrot.lane.b32.xlu0 %v573_v42, %s3166_s19  ;;  %v1272_v42 = vld [vmem:[%s5055_s3 + $0x38] sm:$0xff] }
  0x87   :  { %v3073_v45 = vpack.c.bf16 %v1272_v42, %v1271_v41  ;;  %v548_v42 = vld [vmem:[#allocation2 + $0x9a] sm:$0x3] }
  0x88   :  { %v3837_v13 = vpop.permute.xlu1 %637 }
  0x89   :  { %1019 = vrot.lane.b32.xlu1 %v585_v47, %s3167_s29  ;;  %v3839_v14 = vpop.permute.xlu0 %633  ;;  %v510_v47 = vld [vmem:[#allocation2 + $0x5c] sm:$0x3]  ;;  %3074 = vmatprep.subr.bf16.mxu0 %v3073_v45 }
  0x8a   :  { %1017 = vrot.lane.b32.xlu0 %v584_v50, %s3167_s29  ;;  %3076 = vmatpush3.bf16.msra.mxu0 %v3073_v45  ;;  %v1273_v50 = vld [vmem:[%s5055_s3 + $0x40] sm:$0xff]  ;;  %v547_v45 = vld [vmem:[#allocation2 + $0x96] sm:$0x3]  ;;  %s3170_s3 = smov 80  }
  0x8b   :  { %3045 = vmatprep.subr.mxu0 %v1273_v50 }
  0x8c   :  { %v3844_v17 = vpop.permute.xlu1 %639 }
  0x8d   :  { %1023 = vrot.lane.b32.xlu1 %v587_v59, %s3167_s29  ;;  %v3846_v18 = vpop.permute.xlu0 %635  ;;  %v513_v59 = vld [vmem:[#allocation2 + $0x80] sm:$0x3] }
  0x8e   :  { %1021 = vrot.lane.b32.xlu0 %v586_v60, %s3167_s29  ;;  %3046 = vmatpush3.msra.mxu0 %v1273_v50  ;;  %v512_v60 = vld [vmem:[#allocation2 + $0x7c] sm:$0x3]  ;;  %v559_v50 = vld [vmem:[#allocation2 + $0x6c] sm:$0x3] }
  0x91   :  { %651 = vrot.lane.b32.xlu1 %v492_v63, %s3161_s1  ;;  %v515_v63 = vld [vmem:[#allocation2 + $0x88] sm:$0x3] }
  0x92   :  { %649 = vrot.lane.b32.xlu0 %v491_v0, %s3161_s1  ;;  %v514_v0 = vld [vmem:[#allocation2 + $0x84] sm:$0x3] }
  0x95   :  { %655 = vrot.lane.b32.xlu1 %v494_v4, %s3161_s1 }
  0x96   :  { %653 = vrot.lane.b32.xlu0 %v493_v5, %s3161_s1 }
  0x99   :  { %1027 = vrot.lane.b32.xlu1 %v589_v6, %s3167_s29  ;;  %v526_v6 = vld [vmem:[#allocation2 + $0x68] sm:$0x3] }
  0x9a   :  { %1025 = vrot.lane.b32.xlu0 %v588_v7, %s3167_s29  ;;  %v525_v7 = vld [vmem:[#allocation2 + $0x64] sm:$0x3] }
  0x9d   :  { %1031 = vrot.lane.b32.xlu1 %v591_v11, %s3167_s29  ;;  %v527_v11 = vld [vmem:[#allocation2 + $0x6c] sm:$0x3] }
  0x9e   :  { %1029 = vrot.lane.b32.xlu0 %v590_v12, %s3167_s29 }
  0xa1   :  { %1083 = vrot.lane.b32.xlu1 %v602_v2, %s3168_s0  ;;  %v530_v2 = vld [vmem:[#allocation2 + $0x90] sm:$0x3] }
  0xa2   :  { %1081 = vrot.lane.b32.xlu0 %v601_v16, %s3168_s0  ;;  %v529_v16 = vld [vmem:[#allocation2 + $0x8c] sm:$0x3] }
  0xa3   :  { %v3856_v22 = vpop.permute.xlu1 %643 }
  0xa4   :  { %v3858_v23 = vpop.permute.xlu0 %641 }
  0xa5   :  { %1087 = vrot.lane.b32.xlu1 %v604_v3, %s3168_s0 }
  0xa6   :  { %1085 = vrot.lane.b32.xlu0 %v603_v19, %s3168_s0 }
  0xa7   :  { %v3868_v29 = vpop.permute.xlu1 %647 }
  0xa8   :  { %v3870_v30 = vpop.permute.xlu0 %645 }
  0xa9   :  { %659 = vrot.lane.b32.xlu1 %v496_v25, %s3161_s1 }
  0xaa   :  { %657 = vrot.lane.b32.xlu0 %v495_v26, %s3161_s1  ;;  %v542_v26 = vld [vmem:[#allocation2 + $0x6a] sm:$0x3] }
  0xab   :  { %v3880_v36 = vpop.permute.xlu1 %699 }
  0xac   :  { %v3882_v37 = vpop.permute.xlu0 %697 }
  0xad   :  { %663 = vrot.lane.b32.xlu1 %v498_v32, %s3161_s1  ;;  %v544_v32 = vld [vmem:[#allocation2 + $0x72] sm:$0x3] }
  0xae   :  { %661 = vrot.lane.b32.xlu0 %v497_v33, %s3161_s1  ;;  %v543_v33 = vld [vmem:[#allocation2 + $0x6e] sm:$0x3] }
  0xaf   :  { %v3892_v43 = vpop.permute.xlu1 %703 }
  0xb0   :  { %v3894_v44 = vpop.permute.xlu0 %701 }
  0xb1   :  { %715 = vrot.lane.b32.xlu1 %v509_v40, %s3162_s10 }
  0xb2   :  { %713 = vrot.lane.b32.xlu0 %v508_v39, %s3162_s10  ;;  %v545_v39 = vld [vmem:[#allocation2 + $0x8e] sm:$0x3] }
  0xb3   :  { %v3898_v48 = vpop.permute.xlu1 %707 }
  0xb4   :  { %v3900_v49 = vpop.permute.xlu0 %705 }
  0xb5   :  { %719 = vrot.lane.b32.xlu1 %v511_v46, %s3162_s10 }
  0xb6   :  { %717 = vrot.lane.b32.xlu0 %v510_v47, %s3162_s10 }
  0xb7   :  { %v3907_v53 = vpop.permute.xlu1 %711 }
  0xb8   :  { %v3909_v54 = vpop.permute.xlu0 %709 }
  0xb9   :  { %1091 = vrot.lane.b32.xlu1 %v606_v51, %s3168_s0  ;;  %v558_v51 = vld [vmem:[#allocation2 + $0x68] sm:$0x3] }
  0xba   :  { %1089 = vrot.lane.b32.xlu0 %v605_v52, %s3168_s0 }
  0xbb   :  { %v3915_v58 = vpop.permute.xlu1 %763 }
  0xbc   :  { %v3913_v57 = vpop.permute.xlu0 %761 }
  0xbd   :  { %1095 = vrot.lane.b32.xlu1 %v608_v55, %s3168_s0 }
  0xbe   :  { %1093 = vrot.lane.b32.xlu0 %v607_v56, %s3168_s0  ;;  %v561_v56 = vld [vmem:[#allocation2 + $0x74] sm:$0x3] }
  0xbf   :  { %v3921_v62 = vpop.permute.xlu1 %767 }
  0xc0   :  { %v3919_v61 = vpop.permute.xlu0 %765 }
  0xc1   :  { %723 = vrot.lane.b32.xlu1 %v513_v59, %s3162_s10  ;;  %v560_v59 = vld [vmem:[#allocation2 + $0x70] sm:$0x3] }
  0xc2   :  { %721 = vrot.lane.b32.xlu0 %v512_v60, %s3162_s10 }
  0xc3   :  { %v3927_v5 = vpop.permute.xlu1 %771 }
  0xc4   :  { %v3925_v4 = vpop.permute.xlu0 %769 }
  0xc5   :  { %727 = vrot.lane.b32.xlu1 %v515_v63, %s3162_s10 }
  0xc6   :  { %725 = vrot.lane.b32.xlu0 %v514_v0, %s3162_s10  ;;  %v563_v0 = vld [vmem:[#allocation2 + $0x94] sm:$0x3] }
  0xc7   :  { %v3933_v9 = vpop.permute.xlu1 %775 }
  0xc8   :  { %v3931_v8 = vpop.permute.xlu0 %773 }
  0xc9   :  { %779 = vrot.lane.b32.xlu1 %v526_v6, %s3163_s13  ;;  %v562_v6 = vld [vmem:[#allocation2 + $0x90] sm:$0x3] }
  0xca   :  { %777 = vrot.lane.b32.xlu0 %v525_v7, %s3163_s13 }
  0xcb   :  { %v3937_v12 = vpop.permute.xlu1 %827 }
  0xcc   :  { %v3939_v15 = vpop.permute.xlu0 %825 }
  0xcd   :  { %783 = vrot.lane.b32.xlu1 %v528_v10, %s3163_s13 }
  0xce   :  { %781 = vrot.lane.b32.xlu0 %v527_v11, %s3163_s13  ;;  %v565_v11 = vld [vmem:[#allocation2 + $0x9c] sm:$0x3] }
  0xcf   :  { %v3943_v3 = vpop.permute.xlu1 %831 }
  0xd0   :  { %v3945_v19 = vpop.permute.xlu0 %829 }
  0xd1   :  { %787 = vrot.lane.b32.xlu1 %v530_v2, %s3163_s13  ;;  %v564_v2 = vld [vmem:[#allocation2 + $0x98] sm:$0x3] }
  0xd2   :  { %785 = vrot.lane.b32.xlu0 %v529_v16, %s3163_s13 }
  0xd3   :  { %v3949_v24 = vpop.permute.xlu1 %835 }
  0xd4   :  { %v3951_v25 = vpop.permute.xlu0 %833 }
  0xd5   :  { %791 = vrot.lane.b32.xlu1 %v532_v20, %s3163_s13 }
  0xd6   :  { %789 = vrot.lane.b32.xlu0 %v531_v21, %s3163_s13  ;;  %v576_v21 = vld [vmem:[#allocation2 + $0x7c] sm:$0x3]  ;;  %s3171_s13 = smov 96  }
  0xd7   :  { %v3955_v28 = vpop.permute.xlu1 %839 }
  0xd8   :  { %v3957_v31 = vpop.permute.xlu0 %837 }
  0xd9   :  { %843 = vrot.lane.b32.xlu1 %v542_v26, %s3164_s22  ;;  %v575_v26 = vld [vmem:[#allocation2 + $0x78] sm:$0x3] }
  0xda   :  { %841 = vrot.lane.b32.xlu0 %v541_v27, %s3164_s22 }
  0xdb   :  { %v3961_v34 = vpop.permute.xlu1 %891 }
  0xdc   :  { %v3963_v35 = vpop.permute.xlu0 %889 }
  0xdd   :  { %847 = vrot.lane.b32.xlu1 %v544_v32, %s3164_s22 }
  0xde   :  { %845 = vrot.lane.b32.xlu0 %v543_v33, %s3164_s22  ;;  %v578_v33 = vld [vmem:[#allocation2 + $0x84] sm:$0x3] }
  0xdf   :  { %v3967_v40 = vpop.permute.xlu1 %895 }
  0xe0   :  { %v3969_v41 = vpop.permute.xlu0 %893 }
  0xe1   :  { %851 = vrot.lane.b32.xlu1 %v546_v38, %s3164_s22  ;;  %v577_v38 = vld [vmem:[#allocation2 + $0x80] sm:$0x3] }
  0xe2   :  { %849 = vrot.lane.b32.xlu0 %v545_v39, %s3164_s22 }
  0xe3   :  { %v3973_v46 = vpop.permute.xlu1 %899 }
  0xe4   :  { %v3975_v47 = vpop.permute.xlu0 %897 }
  0xe5   :  { %855 = vrot.lane.b32.xlu1 %v548_v42, %s3164_s22 }
  0xe6   :  { %853 = vrot.lane.b32.xlu0 %v547_v45, %s3164_s22  ;;  %v580_v45 = vld [vmem:[#allocation2 + $0xa4] sm:$0x3] }
  0xe7   :  { %v3979_v52 = vpop.permute.xlu1 %903 }
  0xe8   :  { %v3981_v55 = vpop.permute.xlu0 %901 }
  0xe9   :  { %5063 = vst [vmem:[#allocation7_spill] sm:$0xff] %v3981_v55  ;;  %907 = vrot.lane.b32.xlu1 %v559_v50, %s3165_s12  ;;  %v579_v50 = vld [vmem:[#allocation2 + $0xa0] sm:$0x3]  ;;  %v597_v55 = vld [vmem:[#allocation2 + $0xa6] sm:$0x3] }
  0xea   :  { %905 = vrot.lane.b32.xlu0 %v558_v51, %s3165_s12 }
  0xeb   :  { %v3985_v60 = vpop.permute.xlu1 %955 }
  0xec   :  { %v3987_v63 = vpop.permute.xlu0 %953 }
  0xed   :  { %911 = vrot.lane.b32.xlu1 %v561_v56, %s3165_s12 }
  0xee   :  { %909 = vrot.lane.b32.xlu0 %v560_v59, %s3165_s12  ;;  %v582_v59 = vld [vmem:[#allocation2 + $0xac] sm:$0x3] }
  0xef   :  { %v3991_v7 = vpop.permute.xlu1 %959 }
  0xf0   :  { %v3993_v10 = vpop.permute.xlu0 %957 }
  0xf1   :  { %915 = vrot.lane.b32.xlu1 %v563_v0, %s3165_s12  ;;  %v581_v0 = vld [vmem:[#allocation2 + $0xa8] sm:$0x3] }
  0xf2   :  { %913 = vrot.lane.b32.xlu0 %v562_v6, %s3165_s12 }
  0xf3   :  { %v3997_v16 = vpop.permute.xlu1 %963 }
  0xf4   :  { %v3999_v20 = vpop.permute.xlu0 %961 }
  0xf5   :  { %919 = vrot.lane.b32.xlu1 %v565_v11, %s3165_s12 }
  0xf6   :  { %917 = vrot.lane.b32.xlu0 %v564_v2, %s3165_s12  ;;  %v593_v2 = vld [vmem:[#allocation2 + $0x7e] sm:$0x3] }
  0xf7   :  { %v4003_v27 = vpop.permute.xlu1 %967 }
  0xf8   :  { %5064 = vst [vmem:[#allocation8_spill] sm:$0xff] %v4003_v27  ;;  %v4005_v32 = vpop.permute.xlu0 %965 }
  0xf9   :  { %5065 = vst [vmem:[#allocation9_spill] sm:$0xff] %v4005_v32  ;;  %971 = vrot.lane.b32.xlu1 %v576_v21, %s3166_s19  ;;  %v592_v21 = vld [vmem:[#allocation2 + $0x7a] sm:$0x3]  ;;  %v469_v32 = vld [vmem:[#allocation2 + $0xc] sm:$0x3] }
  0xfa   :  { %969 = vrot.lane.b32.xlu0 %v575_v26, %s3166_s19 }
  0xfb   :  { %v4009_v39 = vpop.permute.xlu1 %1019 }
  0xfc   :  { %v4011_v42 = vpop.permute.xlu0 %1017 }
  0xfd   :  { %975 = vrot.lane.b32.xlu1 %v578_v33, %s3166_s19 }
  0xfe   :  { %973 = vrot.lane.b32.xlu0 %v577_v38, %s3166_s19  ;;  %v466_v38 = vld [vmem:[#allocation2] sm:$0x3] }
  0xff   :  { %v4015_v51 = vpop.permute.xlu1 %1023 }
 0x100   :  { %v4017_v56 = vpop.permute.xlu0 %1021 }
 0x101   :  { %979 = vrot.lane.b32.xlu1 %v580_v45, %s3166_s19  ;;  %v467_v45 = vld [vmem:[#allocation2 + $0x4] sm:$0x3] }
 0x102   :  { %977 = vrot.lane.b32.xlu0 %v579_v50, %s3166_s19  ;;  %v595_v50 = vld [vmem:[#allocation2 + $0x86] sm:$0x3] }
 0x103   :  { %v4021_v6 = vpop.permute.xlu1 %651 }
 0x104   :  { %5066 = vst [vmem:[#allocation10_spill] sm:$0xff] %v4021_v6  ;;  %v4023_v11 = vpop.permute.xlu0 %649 }
 0x105   :  { %5067 = vst [vmem:[#allocation11_spill] sm:$0xff] %v4023_v11  ;;  %983 = vrot.lane.b32.xlu1 %v582_v59, %s3166_s19 }
 0x106   :  { %981 = vrot.lane.b32.xlu0 %v581_v0, %s3166_s19  ;;  %v3169_v0 = vmov 1983009808  }
 0x107   :  { %v4027_v26 = vpop.permute.xlu1 %655  ;;  %v1293_v6 = vunpack.c.l.s4 %v3169_v0 }
 0x108   :  { %5068 = vst [vmem:[#allocation12_spill] sm:$0xff] %v4027_v26  ;;  %v4029_v33 = vpop.permute.xlu0 %653  ;;  %v468_v26 = vld [vmem:[#allocation2 + $0x8] sm:$0x3] }
 0x109   :  { %5069 = vst [vmem:[#allocation13_spill] sm:$0xff] %v4029_v33  ;;  %1035 = vrot.lane.b32.xlu1 %v593_v2, %s3167_s29  ;;  %v1130_v33 = vsel %vm1129_vm1, %v466_v38, %v3839_v14  ;;  %v1131_v2 = vsel %vm1129_vm1, %v467_v45, %v3846_v18  ;;  %v596_v14 = vld [vmem:[#allocation2 + $0xa2] sm:$0x3] }
 0x10a   :  { %1033 = vrot.lane.b32.xlu0 %v592_v21, %s3167_s29  ;;  %v1295_v21 = vlaneseq  ;;  %v1148_v27 = vsel %vm1146_vm2, %v1131_v2, %v3880_v36  ;;  %v1147_v0 = vsel %vm1146_vm2, %v1130_v33, %v3882_v37  ;;  %v1132_v36 = vsel %vm1129_vm1, %v468_v26, %v3837_v13 }
 0x10b   :  { %v4033_v11 = vpop.permute.xlu1 %1027  ;;  %v1164_v38 = vsel %vm1163_vm3, %v1147_v0, %v3913_v57  ;;  %v1165_v18 = vsel %vm1163_vm3, %v1148_v27, %v3915_v58  ;;  %v1133_v57 = vsel %vm1129_vm1, %v469_v32, %v3844_v17  ;;  %v599_v32 = vld [vmem:[#allocation2 + $0xae] sm:$0x3]  ;;  %v609_v0 = vld [vmem:[#allocation2 + $0x7c] sm:$0x3] }
 0x10c   :  { %v4035_v59 = vpop.permute.xlu0 %1025  ;;  %v1182_v37 = vsel %vm1180_vm4, %v1165_v18, %v3937_v12  ;;  %v1181_v33 = vsel %vm1180_vm4, %v1164_v38, %v3939_v15  ;;  %v1296_v13 = vshrl.u32 %v1295_v21, 7  ;;  %v1150_v12 = vsel %vm1146_vm2, %v1133_v57, %v3892_v43  ;;  %v611_v57 = vld [vmem:[#allocation2 + $0x84] sm:$0x3] }
 0x10d   :  { %1039 = vrot.lane.b32.xlu1 %v595_v50, %s3167_s29  ;;  %v1294_v50 = vunpack.c.0.s8 %v1293_v6  ;;  %v1199_v58 = vsel %vm1197_vm5, %v1182_v37, %v3961_v34  ;;  %v1198_v27 = vsel %vm1197_vm5, %v1181_v33, %v3963_v35  ;;  %v1149_v15 = vsel %vm1146_vm2, %v1132_v36, %v3894_v44  ;;  %v598_v6 = vld [vmem:[#allocation2 + $0xaa] sm:$0x3] }
 0x10e   :  { %1037 = vrot.lane.b32.xlu0 %v594_v1, %s3167_s29  ;;  %v1216_v17 = vsel %vm1214_vm6, %v1199_v58, %v3985_v60  ;;  %v1215_v34 = vsel %vm1214_vm6, %v1198_v27, %v3987_v63  ;;  %v1166_v35 = vsel %vm1163_vm3, %v1149_v15, %v3919_v61 }
 0x10f   :  { %v4051_v45 = vpop.permute.xlu1 %1031  ;;  %v1233_v43 = vsel %vm1231_vm7, %v1216_v17, %v4009_v39  ;;  %v1232_v44 = vsel %vm1231_vm7, %v1215_v34, %v4011_v42  ;;  %v1183_v63 = vsel %vm1180_vm4, %v1166_v35, %v3945_v19  ;;  %v610_v42 = vld [vmem:[#allocation2 + $0x80] sm:$0x3]  ;;  %v4105_v36 = vsub.s32 %v1294_v50, %v1296_v13  ;;  %v614_v13 = vld [vmem:[#allocation2 + $0xa8] sm:$0x3]  ;;  %v616_v35 = vld [vmem:[#allocation2 + $0xb0] sm:$0x3] }
 0x110   :  { %v4053_v1 = vpop.permute.xlu0 %1029  ;;  %v1200_v39 = vsel %vm1197_vm5, %v1183_v63, %v3969_v41  ;;  %v5070_v34 = vmov 0.0   ;;  %v472_v63 = vld [vmem:[#allocation2 + $0x30] sm:$0x3] }
 0x111   :  { %1043 = vrot.lane.b32.xlu1 %v597_v55, %s3167_s29  ;;  %v1167_v55 = vsel %vm1163_vm3, %v1150_v12, %v3921_v62  ;;  %v1217_v19 = vsel %vm1214_vm6, %v1200_v39, %v3993_v10  ;;  %v612_v10 = vld [vmem:[#allocation2 + $0x88] sm:$0x3]  ;;  %v613_v12 = vld [vmem:[#allocation2 + $0xa4] sm:$0x3]  ;;  %1480 = vst.msk [vmem:[#allocation3 + $0x2] sm:$0x3] %vm1478_vm10, %v5070_v34 }
 0x112   :  { %1041 = vrot.lane.b32.xlu0 %v596_v14, %s3167_s29  ;;  %v1184_v60 = vsel %vm1180_vm4, %v1167_v55, %v3943_v3  ;;  %1479 = vst.msk [vmem:[#allocation3] sm:$0x3] %vm1478_vm10, %v5070_v34  ;;  %1481 = vst.msk [vmem:[#allocation3 + $0x4] sm:$0x3] %vm1478_vm10, %v5070_v34  ;;  %v615_v55 = vld [vmem:[#allocation2 + $0xac] sm:$0x3] }
 0x113   :  { %v1084_v26 = vpop.permute.xlu1 %1083  ;;  %v1201_v62 = vsel %vm1197_vm5, %v1184_v60, %v3967_v40  ;;  %v1234_v40 = vsel %vm1231_vm7, %v1217_v19, %v4017_v56  ;;  %1482 = vst.msk [vmem:[#allocation3 + $0x6] sm:$0x3] %vm1478_vm10, %v5070_v34  ;;  %1483 = vst.msk [vmem:[#allocation3 + $0x8] sm:$0x3] %vm1478_vm10, %v5070_v34  ;;  %v473_v60 = vld [vmem:[#allocation2 + $0x34] sm:$0x3] }
 0x114   :  { %v1082_v2 = vpop.permute.xlu0 %1081  ;;  %v1250_v21 = vsel %vm1248_vm8, %v1233_v43, %v1084_v26  ;;  %v1218_v3 = vsel %vm1214_vm6, %v1201_v62, %v3991_v7  ;;  %1484 = vst.msk [vmem:[#allocation3 + $0xa] sm:$0x3] %vm1478_vm10, %v5070_v34  ;;  %1485 = vst.msk [vmem:[#allocation3 + $0xc] sm:$0x3] %vm1478_vm10, %v5070_v34 }
 0x115   :  { %v1249_v61 = vsel %vm1248_vm8, %v1232_v44, %v1082_v2  ;;  %1047 = vrot.lane.b32.xlu1 %v599_v32, %s3167_s29  ;;  %v1235_v14 = vsel %vm1231_vm7, %v1218_v3, %v4015_v51  ;;  %1486 = vst.msk [vmem:[#allocation3 + $0xe] sm:$0x3] %vm1478_vm10, %v5070_v34  ;;  %1487 = vst.msk [vmem:[#allocation3 + $0x10] sm:$0x3] %vm1478_vm10, %v5070_v34  ;;  %v471_v32 = vld [vmem:[#allocation2 + $0x2c] sm:$0x3] }
 0x116   :  { %1045 = vrot.lane.b32.xlu0 %v598_v6, %s3167_s29  ;;  %v1290_v38 = vcombine.low %v1249_v61, %v1250_v21  ;;  %1488 = vst.msk [vmem:[#allocation3 + $0x12] sm:$0x3] %vm1478_vm10, %v5070_v34  ;;  %1489 = vst.msk [vmem:[#allocation3 + $0x14] sm:$0x3] %vm1478_vm10, %v5070_v34  ;;  %v470_v6 = vld [vmem:[#allocation2 + $0x28] sm:$0x3]  ;;  %v1135_v26 = vsel %vm1129_vm1, %v471_v32, %v3856_v22 }
 0x117   :  { %v1088_v41 = vpop.permute.xlu1 %1087  ;;  %1490 = vst.msk [vmem:[#allocation3 + $0x16] sm:$0x3] %vm1478_vm10, %v5070_v34  ;;  %1491 = vst.msk [vmem:[#allocation3 + $0x18] sm:$0x3] %vm1478_vm10, %v5070_v34  ;;  %v1134_v2 = vsel %vm1129_vm1, %v470_v6, %v3858_v23  ;;  %v1152_v21 = vsel %vm1146_vm2, %v1135_v26, %v3898_v48 }
 0x118   :  { %v1086_v18 = vpop.permute.xlu0 %1085  ;;  %v1252_v37 = vsel %vm1248_vm8, %v1235_v14, %v1088_v41  ;;  %v1298_v56 = vrot.slane %v1290_v38, %v4105_v36  ;;  %1492 = vst.msk [vmem:[#allocation3 + $0x1a] sm:$0x3] %vm1478_vm10, %v5070_v34  ;;  %1493 = vst.msk [vmem:[#allocation3 + $0x1c] sm:$0x3] %vm1478_vm10, %v5070_v34  ;;  %v1151_v61 = vsel %vm1146_vm2, %v1134_v2, %v3900_v49  ;;  %v1637_v3 = vld [vmem:[#allocation3 + $0x2] sm:$0x3] }
 0x119   :  { %v1251_v7 = vsel %vm1248_vm8, %v1234_v40, %v1086_v18  ;;  %1099 = vrot.lane.b32.xlu1 %v610_v42, %s3168_s0  ;;  %1494 = vst.msk [vmem:[#allocation3 + $0x1e] sm:$0x3] %vm1478_vm10, %v5070_v34  ;;  %1495 = vst.msk [vmem:[#allocation3 + $0x20] sm:$0x3] %vm1478_vm10, %v5070_v34  ;;  %v1168_v62 = vsel %vm1163_vm3, %v1151_v61, %v3925_v4  ;;  %v1169_v22 = vsel %vm1163_vm3, %v1152_v21, %v3927_v5  ;;  %v1638_v19 = vld [vmem:[#allocation3 + $0x4] sm:$0x3] }
 0x11a   :  { %v1291_v33 = vcombine.low %v1251_v7, %v1252_v37  ;;  %1097 = vrot.lane.b32.xlu0 %v609_v0, %s3168_s0  ;;  %1496 = vst.msk [vmem:[#allocation3 + $0x22] sm:$0x3] %vm1478_vm10, %v5070_v34  ;;  %1497 = vst.msk [vmem:[#allocation3 + $0x24] sm:$0x3] %vm1478_vm10, %v5070_v34  ;;  %v1137_v42 = vsel %vm1129_vm1, %v473_v60, %v3868_v29  ;;  %v1186_v48 = vsel %vm1180_vm4, %v1169_v22, %v3949_v24  ;;  %v1640_v14 = vld [vmem:[#allocation3 + $0x8] sm:$0x3] }
 0x11b   :  { %v4111_v51 = vpop.permute.xlu1 %659  ;;  %1498 = vst.msk [vmem:[#allocation3 + $0x26] sm:$0x3] %vm1478_vm10, %v5070_v34  ;;  %1499 = vst.msk [vmem:[#allocation3 + $0x28] sm:$0x3] %vm1478_vm10, %v5070_v34  ;;  %v1185_v49 = vsel %vm1180_vm4, %v1168_v62, %v3951_v25  ;;  %v1136_v4 = vsel %vm1129_vm1, %v472_v63, %v3870_v30  ;;  %v1203_v5 = vsel %vm1197_vm5, %v1186_v48, %v3973_v46  ;;  %v1639_v46 = vld [vmem:[#allocation3 + $0x6] sm:$0x3] }
 0x11c   :  { %v4113_v58 = vpop.permute.xlu0 %657  ;;  %v1305_v50 = vrot.slane %v1291_v33, %v4105_v36  ;;  %1500 = vst.msk [vmem:[#allocation3 + $0x2a] sm:$0x3] %vm1478_vm10, %v5070_v34  ;;  %1501 = vst.msk [vmem:[#allocation3 + $0x2c] sm:$0x3] %vm1478_vm10, %v5070_v34  ;;  %v1202_v0 = vsel %vm1197_vm5, %v1185_v49, %v3975_v47  ;;  %v1154_v29 = vsel %vm1146_vm2, %v1137_v42, %v3907_v53  ;;  %v5071_v37 = vld [vmem:[#allocation7_spill] sm:$0xff]  ;;  %v5073_v7 = vld [vmem:[#allocation9_spill] sm:$0xff] }
 0x11d   :  { %1103 = vrot.lane.b32.xlu1 %v612_v10, %s3168_s0  ;;  %1502 = vst.msk [vmem:[#allocation3 + $0x2e] sm:$0x3] %vm1478_vm10, %v5070_v34  ;;  %1503 = vst.msk [vmem:[#allocation3 + $0x30] sm:$0x3] %vm1478_vm10, %v5070_v34  ;;  %v1153_v24 = vsel %vm1146_vm2, %v1136_v4, %v3909_v54  ;;  %v1220_v25 = vsel %vm1214_vm6, %v1203_v5, %v3997_v16  ;;  %v1219_v30 = vsel %vm1214_vm6, %v1202_v0, %v3999_v20  ;;  %v1654_v33 = vld [vmem:[#allocation3 + $0x4] sm:$0x3] }
 0x11e   :  { %1101 = vrot.lane.b32.xlu0 %v611_v57, %s3168_s0  ;;  %v1306_v27 = vcombine.low %v1298_v56, %v1305_v50  ;;  %1504 = vst.msk [vmem:[#allocation3 + $0x32] sm:$0x3] %vm1478_vm10, %v5070_v34  ;;  %1505 = vst.msk [vmem:[#allocation3 + $0x34] sm:$0x3] %vm1478_vm10, %v5070_v34  ;;  %v1170_v47 = vsel %vm1163_vm3, %v1153_v24, %v3931_v8  ;;  %v1171_v40 = vsel %vm1163_vm3, %v1154_v29, %v3933_v9  ;;  %v1655_v10 = vld [vmem:[#allocation3 + $0x6] sm:$0x3] }
 0x11f   :  { %v4119_v15 = vpop.permute.xlu1 %663  ;;  %1506 = vst.msk [vmem:[#allocation3 + $0x36] sm:$0x3] %vm1478_vm10, %v5070_v34  ;;  %1507 = vst.msk [vmem:[#allocation3 + $0x38] sm:$0x3] %vm1478_vm10, %v5070_v34  ;;  %v1237_v53 = vsel %vm1231_vm7, %v1220_v25, %v4033_v11  ;;  %v1236_v54 = vsel %vm1231_vm7, %v1219_v30, %v4035_v59  ;;  %v1188_v16 = vsel %vm1180_vm4, %v1171_v40, %v3955_v28  ;;  %v5072_v59 = vld [vmem:[#allocation8_spill] sm:$0xff] }
 0x120   :  { %3047 = vmatprep.mubr.msk.f32.mxu0 %vm1358_vm9, %v1306_v27  ;;  %v4122_v17 = vpop.permute.xlu0 %661  ;;  %1508 = vst.msk [vmem:[#allocation3 + $0x3a] sm:$0x3] %vm1478_vm10, %v5070_v34  ;;  %1509 = vst.msk [vmem:[#allocation3 + $0x3c] sm:$0x3] %vm1478_vm10, %v5070_v34  ;;  %v1187_v20 = vsel %vm1180_vm4, %v1170_v47, %v3957_v31  ;;  %v1205_v9 = vsel %vm1197_vm5, %v1188_v16, %v3979_v52  ;;  %v1656_v32 = vld [vmem:[#allocation3 + $0x8] sm:$0x3] }
 0x121   :  { %1510 = vst.msk [vmem:[#allocation3 + $0x3e] sm:$0x3] %vm1478_vm10, %v5070_v34  ;;  %1511 = vst.msk [vmem:[#allocation3 + $0x40] sm:$0x3] %vm1478_vm10, %v5070_v34  ;;  %1107 = vrot.lane.b32.xlu1 %v614_v13, %s3168_s0  ;;  %v1204_v11 = vsel %vm1197_vm5, %v1187_v20, %v5071_v37  ;;  %v1222_v28 = vsel %vm1214_vm6, %v1205_v9, %v5072_v59  ;;  %v1657_v6 = vld [vmem:[#allocation3 + $0xa] sm:$0x3] }
 0x122   :  { %1512 = vst.msk [vmem:[#allocation3 + $0x42] sm:$0x3] %vm1478_vm10, %v5070_v34  ;;  %1513 = vst.msk [vmem:[#allocation3 + $0x44] sm:$0x3] %vm1478_vm10, %v5070_v34  ;;  %1105 = vrot.lane.b32.xlu0 %v613_v12, %s3168_s0  ;;  %v1221_v31 = vsel %vm1214_vm6, %v1204_v11, %v5073_v7  ;;  %v1239_v57 = vsel %vm1231_vm7, %v1222_v28, %v4051_v45  ;;  %v1671_v2 = vld [vmem:[#allocation3 + $0xc] sm:$0x3] }
 0x123   :  { %1514 = vst.msk [vmem:[#allocation3 + $0x46] sm:$0x3] %vm1478_vm10, %v5070_v34  ;;  %v4198_v43 = vpop.permute.xlu1 %715  ;;  %v1238_v52 = vsel %vm1231_vm7, %v1221_v31, %v4053_v1 }
 0x124   :  { %v4200_v44 = vpop.permute.xlu0 %713 }
 0x125   :  { %1111 = vrot.lane.b32.xlu1 %v616_v35, %s3168_s0 }
 0x126   :  { %1109 = vrot.lane.b32.xlu0 %v615_v55, %s3168_s0 }
 0x127   :  { %v4216_v39 = vpop.permute.xlu1 %719 }
 0x128   :  { %v4218_v23 = vpop.permute.xlu0 %717 }
 0x129   :  { %1789 = vrot.lane.b32.xlu1 %v1638_v19, %s3162_s10 }
 0x12a   :  { %1787 = vrot.lane.b32.xlu0 %v1637_v3, %s3162_s10 }
 0x12b   :  { %v1092_v38 = vpop.permute.xlu1 %1091 }
 0x12c   :  { %v1090_v41 = vpop.permute.xlu0 %1089  ;;  %v1254_v18 = vsel %vm1248_vm8, %v1237_v53, %v1092_v38 }
 0x12d   :  { %v1253_v8 = vsel %vm1248_vm8, %v1236_v54, %v1090_v41  ;;  %1793 = vrot.lane.b32.xlu1 %v1640_v14, %s3162_s10 }
 0x12e   :  { %1791 = vrot.lane.b32.xlu0 %v1639_v46, %s3162_s10  ;;  %v1307_v56 = vcombine.low %v1253_v8, %v1254_v18 }
 0x12f   :  { %v1096_v50 = vpop.permute.xlu1 %1095 }
 0x130   :  { %v1094_v27 = vpop.permute.xlu0 %1093  ;;  %v1256_v13 = vsel %vm1248_vm8, %v1239_v57, %v1096_v50  ;;  %v1315_v35 = vrot.slane %v1307_v56, %v4105_v36  ;;  %v474_v57 = vld [vmem:[#allocation2 + $0x50] sm:$0x3]  ;;  %v477_v50 = vld [vmem:[#allocation2 + $0x5c] sm:$0x3] }
 0x131   :  { %v1255_v12 = vsel %vm1248_vm8, %v1238_v52, %v1094_v27  ;;  %1853 = vrot.lane.b32.xlu1 %v1655_v10, %s3164_s22  ;;  %v475_v10 = vld [vmem:[#allocation2 + $0x54] sm:$0x3]  ;;  %v476_v27 = vld [vmem:[#allocation2 + $0x58] sm:$0x3] }
 0x132   :  { %v1308_v34 = vcombine.low %v1255_v12, %v1256_v13  ;;  %1851 = vrot.lane.b32.xlu0 %v1654_v33, %s3164_s22  ;;  %v5079_v13 = vld [vmem:[#allocation10_spill] sm:$0xff] }
 0x133   :  { %v4276_v55 = vpop.permute.xlu1 %723  ;;  %v1139_v12 = vsel %vm1129_vm1, %v475_v10, %v5079_v13 }
 0x134   :  { %v1322_v45 = vrot.slane %v1308_v34, %v4105_v36  ;;  %v4278_v1 = vpop.permute.xlu0 %721  ;;  %v5080_v34 = vld [vmem:[#allocation11_spill] sm:$0xff] }
 0x135   :  { %1857 = vrot.lane.b32.xlu1 %v1657_v6, %s3164_s22  ;;  %v479_v6 = vld [vmem:[#allocation2 + $0x7c] sm:$0x3] }
 0x136   :  { %v1323_v26 = vcombine.low %v1315_v35, %v1322_v45  ;;  %1855 = vrot.lane.b32.xlu0 %v1656_v32, %s3164_s22  ;;  %v1138_v32 = vsel %vm1129_vm1, %v474_v57, %v5080_v34  ;;  %v478_v35 = vld [vmem:[#allocation2 + $0x78] sm:$0x3]  ;;  %v481_v45 = vld [vmem:[#allocation2 + $0x84] sm:$0x3] }
 0x137   :  { %v4282_v60 = vpop.permute.xlu1 %727 }
 0x138   :  { %3048 = vmatmul.mubr.msk.f32.vlgmr.msra.gmra.mrb[0].mxu0 %vm1358_vm9, %v1323_v26  ;;  %v4285_v63 = vpop.permute.xlu0 %725  ;;  %v480_v26 = vld [vmem:[#allocation2 + $0x80] sm:$0x3] }
 0x13a   :  { %1915 = vrot.lane.b32.xlu0 %v1671_v2, %s3166_s19  ;;  %v1156_v2 = vsel %vm1146_vm2, %v1139_v12, %v4198_v43  ;;  %v1143_v43 = vsel %vm1129_vm1, %v479_v6, %v4111_v51  ;;  %v1661_v6 = vld [vmem:[#allocation3 + $0x16] sm:$0x3] }
 0x13b   :  { %v780_v21 = vpop.permute.xlu1 %779 }
 0x13c   :  { %v778_v61 = vpop.permute.xlu0 %777  ;;  %v1173_v10 = vsel %vm1163_vm3, %v1156_v2, %v780_v21  ;;  %v1144_v21 = vsel %vm1129_vm1, %v480_v26, %v4122_v17 }
 0x13f   :  { %v4288_v62 = vpop.permute.xlu1 %783 }
 0x140   :  { %v4290_v22 = vpop.permute.xlu0 %781 }
 0x143   :  { %v4292_v3 = vpop.permute.xlu1 %787 }
 0x144   :  { %v4294_v19 = vpop.permute.xlu0 %785 }
 0x147   :  { %v4296_v42 = vpop.permute.xlu1 %791 }
 0x148   :  { %v4298_v48 = vpop.permute.xlu0 %789 }
 0x14b   :  { %v844_v49 = vpop.permute.xlu1 %843 }
 0x14c   :  { %v842_v4 = vpop.permute.xlu0 %841  ;;  %v1190_v12 = vsel %vm1180_vm4, %v1173_v10, %v844_v49 }
 0x14f   :  { %v4300_v5 = vpop.permute.xlu1 %847 }
 0x150   :  { %v4302_v0 = vpop.permute.xlu0 %845 }
 0x153   :  { %v4304_v29 = vpop.permute.xlu1 %851 }
 0x154   :  { %v4306_v24 = vpop.permute.xlu0 %849 }
 0x157   :  { %v4308_v25 = vpop.permute.xlu1 %855 }
 0x158   :  { %v4310_v30 = vpop.permute.xlu0 %853 }
 0x159   :  { %5074 = vst [vmem:[#allocation7_spill] sm:$0xff] %v4310_v30 }
 0x15b   :  { %v908_v46 = vpop.permute.xlu1 %907 }
 0x15c   :  { %v906_v14 = vpop.permute.xlu0 %905 }
 0x15f   :  { %v4312_v47 = vpop.permute.xlu1 %911 }
 0x160   :  { %v4314_v40 = vpop.permute.xlu0 %909 }
 0x163   :  { %v4316_v53 = vpop.permute.xlu1 %915 }
 0x164   :  { %v4318_v54 = vpop.permute.xlu0 %913 }
 0x167   :  { %v4320_v38 = vpop.permute.xlu1 %919 }
 0x168   :  { %5075 = vst [vmem:[#allocation8_spill] sm:$0xff] %v4320_v38  ;;  %v4322_v41 = vpop.permute.xlu0 %917  ;;  %v5082_v38 = vld [vmem:[#allocation13_spill] sm:$0xff] }
 0x169   :  { %5076 = vst [vmem:[#allocation9_spill] sm:$0xff] %v4322_v41  ;;  %v1140_v30 = vsel %vm1129_vm1, %v476_v27, %v5082_v38  ;;  %v1145_v38 = vsel %vm1129_vm1, %v481_v45, %v4119_v15 }
 0x16b   :  { %v972_v16 = vpop.permute.xlu1 %971 }
 0x16c   :  { %v970_v20 = vpop.permute.xlu0 %969 }
 0x16f   :  { %v4324_v18 = vpop.permute.xlu1 %975 }
 0x170   :  { %v4326_v8 = vpop.permute.xlu0 %973 }
 0x173   :  { %v4328_v9 = vpop.permute.xlu1 %979 }
 0x174   :  { %v4330_v37 = vpop.permute.xlu0 %977 }
 0x177   :  { %v4332_v11 = vpop.permute.xlu1 %983 }
 0x178   :  { %5077 = vst [vmem:[#allocation14_spill] sm:$0xff] %v4332_v11  ;;  %v4334_v59 = vpop.permute.xlu0 %981  ;;  %v5081_v11 = vld [vmem:[#allocation12_spill] sm:$0xff] }
 0x179   :  { %5078 = vst [vmem:[#allocation15_spill] sm:$0xff] %v4334_v59  ;;  %v1155_v59 = vsel %vm1146_vm2, %v1138_v32, %v4200_v44  ;;  %v1141_v41 = vsel %vm1129_vm1, %v477_v50, %v5081_v11  ;;  %v1142_v44 = vsel %vm1129_vm1, %v478_v35, %v4113_v58  ;;  %v1157_v58 = vsel %vm1146_vm2, %v1140_v30, %v4218_v23  ;;  %v1707_v50 = vld [vmem:[#allocation3 + $0x16] sm:$0x3]  ;;  %v1721_v23 = vld [vmem:[#allocation3 + $0x18] sm:$0x3] }
 0x17a   :  { %v1172_v57 = vsel %vm1163_vm3, %v1155_v59, %v778_v61  ;;  %v1207_v61 = vsel %vm1197_vm5, %v1190_v12, %v908_v46  ;;  %v1158_v51 = vsel %vm1146_vm2, %v1141_v41, %v4216_v39  ;;  %v1174_v17 = vsel %vm1163_vm3, %v1157_v58, %v4290_v22  ;;  %2049 = vrot.lane.b32.xlu1 %v1707_v50, %s3170_s3 }
 0x17b   :  { %v1036_v28 = vpop.permute.xlu1 %1035  ;;  %v1189_v11 = vsel %vm1180_vm4, %v1172_v57, %v842_v4  ;;  %v1224_v49 = vsel %vm1214_vm6, %v1207_v61, %v972_v16  ;;  %v1175_v15 = vsel %vm1163_vm3, %v1158_v51, %v4288_v62  ;;  %v1191_v41 = vsel %vm1180_vm4, %v1174_v17, %v4302_v0  ;;  %2107 = vrot.lane.b32.xlu0 %v1721_v23, %s3171_s13  ;;  %v1679_v17 = vld [vmem:[#allocation3 + $0x24] sm:$0x3] }
 0x17c   :  { %v1034_v7 = vpop.permute.xlu0 %1033  ;;  %v1206_v59 = vsel %vm1197_vm5, %v1189_v11, %v906_v14  ;;  %v1241_v46 = vsel %vm1231_vm7, %v1224_v49, %v1036_v28  ;;  %v1192_v30 = vsel %vm1180_vm4, %v1175_v15, %v4300_v5  ;;  %v1160_v16 = vsel %vm1146_vm2, %v1143_v43, %v4276_v55  ;;  %v1665_v15 = vld [vmem:[#allocation3 + $0x22] sm:$0x3] }
 0x17d   :  { %v1223_v4 = vsel %vm1214_vm6, %v1206_v59, %v970_v20  ;;  %v1159_v20 = vsel %vm1146_vm2, %v1142_v44, %v4278_v1  ;;  %v1209_v28 = vsel %vm1197_vm5, %v1192_v30, %v4312_v47  ;;  %v1208_v5 = vsel %vm1197_vm5, %v1191_v41, %v4314_v40  ;;  %v1675_v1 = vld [vmem:[#allocation3 + $0x18] sm:$0x3]  ;;  %v1725_v44 = vld [vmem:[#allocation3 + $0x24] sm:$0x3] }
 0x17e   :  { %v1240_v14 = vsel %vm1231_vm7, %v1223_v4, %v1034_v7  ;;  %v1162_v0 = vsel %vm1146_vm2, %v1145_v38, %v4282_v60  ;;  %v1177_v7 = vsel %vm1163_vm3, %v1160_v16, %v4292_v3  ;;  %v1226_v32 = vsel %vm1214_vm6, %v1209_v28, %v4324_v18  ;;  %1865 = vrot.lane.b32.xlu1 %v1661_v6, %s3164_s22  ;;  %v5085_v59 = vld [vmem:[#allocation9_spill] sm:$0xff] }
 0x17f   :  { %v1040_v31 = vpop.permute.xlu1 %1039  ;;  %v1225_v55 = vsel %vm1214_vm6, %v1208_v5, %v4326_v8  ;;  %v1176_v47 = vsel %vm1163_vm3, %v1159_v20, %v4294_v19  ;;  %v1194_v3 = vsel %vm1180_vm4, %v1177_v7, %v4304_v29  ;;  %1923 = vrot.lane.b32.xlu0 %v1675_v1, %s3166_s19  ;;  %v1161_v19 = vsel %vm1146_vm2, %v1144_v21, %v4285_v63  ;;  %v1711_v63 = vld [vmem:[#allocation3 + $0x22] sm:$0x3]  ;;  %v4474_v28 = vld [vmem:[%s5057_s5] ss:$0 sm:$0xff] }
 0x180   :  { %v1038_v33 = vpop.permute.xlu0 %1037  ;;  %v1243_v35 = vsel %vm1231_vm7, %v1226_v32, %v1040_v31  ;;  %v1193_v18 = vsel %vm1180_vm4, %v1176_v47, %v4306_v24  ;;  %v1211_v31 = vsel %vm1197_vm5, %v1194_v3, %v4316_v53  ;;  %v1179_v29 = vsel %vm1163_vm3, %v1162_v0, %v4296_v42  ;;  %v5086_v49 = vld [vmem:[#allocation14_spill] sm:$0xff] }
 0x181   :  { %v1242_v40 = vsel %vm1231_vm7, %v1225_v55, %v1038_v33  ;;  %v1210_v33 = vsel %vm1197_vm5, %v1193_v18, %v4318_v54  ;;  %v1178_v24 = vsel %vm1163_vm3, %v1161_v19, %v4298_v48  ;;  %v1228_v57 = vsel %vm1214_vm6, %v1211_v31, %v4328_v9 }
 0x182   :  { %v1227_v43 = vsel %vm1214_vm6, %v1210_v33, %v4330_v37  ;;  %2057 = vrot.lane.b32.xlu1 %v1711_v63, %s3170_s3  ;;  %v1196_v9 = vsel %vm1180_vm4, %v1179_v29, %v4308_v25  ;;  %v5083_v37 = vld [vmem:[#allocation7_spill] sm:$0xff] }
 0x183   :  { %v4336_v52 = vpop.permute.xlu1 %1043  ;;  %v1195_v38 = vsel %vm1180_vm4, %v1178_v24, %v5083_v37  ;;  %2115 = vrot.lane.b32.xlu0 %v1725_v44, %s3171_s13  ;;  %v5087_v25 = vld [vmem:[#allocation15_spill] sm:$0xff] }
 0x184   :  { %v4338_v56 = vpop.permute.xlu0 %1041  ;;  %v1245_v53 = vsel %vm1231_vm7, %v1228_v57, %v4336_v52  ;;  %v1212_v51 = vsel %vm1197_vm5, %v1195_v38, %v5085_v59  ;;  %v2495_v59 = vld [vmem:[%s5058_s6 + $0x8] sm:$0xff] }
 0x185   :  { %v1244_v54 = vsel %vm1231_vm7, %v1227_v43, %v4338_v56  ;;  %v5084_v56 = vld [vmem:[#allocation8_spill] sm:$0xff]  ;;  %v1229_v50 = vsel %vm1214_vm6, %v1212_v51, %v5087_v25  ;;  %v2496_v25 = vld [vmem:[%s5058_s6 + $0x10] sm:$0xff] }
 0x186   :  { %v1213_v61 = vsel %vm1197_vm5, %v1196_v9, %v5084_v56  ;;  %1873 = vrot.lane.b32.xlu1 %v1665_v15, %s3164_s22 }
 0x187   :  { %v4354_v13 = vpop.permute.xlu1 %1047  ;;  %v1230_v4 = vsel %vm1214_vm6, %v1213_v61, %v5086_v49  ;;  %1931 = vrot.lane.b32.xlu0 %v1679_v17, %s3166_s19  ;;  %v2494_v61 = vld [vmem:[%s5058_s6] sm:$0xff]  ;;  %v3173_v49 = vmov 0.0|0.0  }
 0x188   :  { %v4356_v34 = vpop.permute.xlu0 %1045  ;;  %3077 = vmatprep.subr.bf16.mxu1 %v3173_v49 }
 0x18b   :  { %v1100_v27 = vpop.permute.xlu1 %1099 }
 0x18c   :  { %v1098_v39 = vpop.permute.xlu0 %1097  ;;  %v1258_v62 = vsel %vm1248_vm8, %v1241_v46, %v1100_v27  ;;  %v1247_v46 = vsel %vm1231_vm7, %v1230_v4, %v4354_v13  ;;  %v3078_v4 = vpack.c.bf16 %v2495_v59, %v2494_v61 }
 0x18d   :  { %v1257_v22 = vsel %vm1248_vm8, %v1240_v14, %v1098_v39  ;;  %v1246_v14 = vsel %vm1231_vm7, %v1229_v50, %v4356_v34  ;;  %v4469_v34 = vld [vmem:[%s5056_s4] ss:$0 sm:$0xff]  ;;  %s3172_s4 = smov 112   ;;  %v2497_v50 = vld [vmem:[%s5058_s6 + $0x18] sm:$0xff] }
 0x18e   :  { %v1324_v45 = vcombine.low %v1257_v22, %v1258_v62  ;;  %3079 = vmatpush1.bf16.msra.mxu1 %v3078_v4  ;;  %v3081_v15 = vpack.c.bf16 %v2497_v50, %v2496_v25 }
 0x18f   :  { %v1104_v60 = vpop.permute.xlu1 %1103  ;;  %3080 = vmatprep.subr.bf16.mxu1 %v3173_v49 }
 0x190   :  { %v1102_v26 = vpop.permute.xlu0 %1101  ;;  %v1260_v8 = vsel %vm1248_vm8, %v1243_v35, %v1104_v60  ;;  %v1332_v12 = vrot.slane %v1324_v45, %v4105_v36 }
 0x191   :  { %v1259_v2 = vsel %vm1248_vm8, %v1242_v40, %v1102_v26 }
 0x192   :  { %v1325_v10 = vcombine.low %v1259_v2, %v1260_v8  ;;  %3082 = vmatpush1.bf16.msra.mxu1 %v3081_v15 }
 0x193   :  { %v1108_v11 = vpop.permute.xlu1 %1107  ;;  %3083 = vmatprep.subr.bf16.mxu1 %v3173_v49 }
 0x194   :  { %v1339_v42 = vrot.slane %v1325_v10, %v4105_v36  ;;  %v1106_v48 = vpop.permute.xlu0 %1105  ;;  %v1262_v21 = vsel %vm1248_vm8, %v1245_v53, %v1108_v11 }
 0x195   :  { %v1261_v52 = vsel %vm1248_vm8, %v1244_v54, %v1106_v48 }
 0x196   :  { %v1340_v58 = vcombine.low %v1332_v12, %v1339_v42  ;;  %v1341_v27 = vcombine.low %v1261_v52, %v1262_v21 }
 0x197   :  { %v1112_v39 = vpop.permute.xlu1 %1111 }
 0x198   :  { %3050 = vmatprep.mubr.msk.f32.mxu0 %vm1358_vm9, %v1340_v58  ;;  %v1110_v23 = vpop.permute.xlu0 %1109  ;;  %v1264_v30 = vsel %vm1248_vm8, %v1247_v46, %v1112_v39  ;;  %v1349_v22 = vrot.slane %v1341_v27, %v4105_v36  ;;  %v2499_v27 = vld [vmem:[%s5058_s6 + $0x28] sm:$0xff] }
 0x199   :  { %v1263_v41 = vsel %vm1248_vm8, %v1246_v14, %v1110_v23  ;;  %v2498_v14 = vld [vmem:[%s5058_s6 + $0x20] sm:$0xff] }
 0x19a   :  { %v1342_v62 = vcombine.low %v1263_v41, %v1264_v30  ;;  %v3084_v30 = vpack.c.bf16 %v2499_v27, %v2498_v14  ;;  %v2500_v41 = vld [vmem:[%s5058_s6 + $0x30] sm:$0xff] }
 0x19c   :  { %v1356_v13 = vrot.slane %v1342_v62, %v4105_v36  ;;  %3085 = vmatpush1.bf16.msra.mxu1 %v3084_v30  ;;  %v2501_v62 = vld [vmem:[%s5058_s6 + $0x38] sm:$0xff] }
 0x19d   :  { %3086 = vmatprep.subr.bf16.mxu1 %v3173_v49 }
 0x19e   :  { %v1357_v16 = vcombine.low %v1349_v22, %v1356_v13  ;;  %v3087_v22 = vpack.c.bf16 %v2501_v62, %v2500_v41 }
 0x1a0   :  { %3051 = vmatmul.mubr.msk.f32.gmra.mrb[2].mxu0 %vm1358_vm9, %v1357_v16  ;;  %3088 = vmatpush1.bf16.msra.mxu1 %v3087_v22 }
 0x1a1   :  { %3089 = vmatprep.subr.bf16.mxu1 %v3173_v49 }
 0x20b   :  { %v3049_v20 = vpop.f32.mrb[0].mxu0 }
 0x20c   :  { %v1460_v5 = vmul.f32 %v3049_v20, %v4469_v34  ;;  %v1433_v0 = vpop.f32.mrb[1].mxu0  ;;  %v2502_v20 = vld [vmem:[%s5058_s6 + $0x40] sm:$0xff] }
 0x20d   :  { %v1459_v7 = vmul.f32 %v4469_v34, %v1433_v0 }
 0x20e   :  { %v1471_v32 = vadd.f32 %v4474_v28, %v1460_v5  ;;  %v2503_v5 = vld [vmem:[%s5058_s6 + $0x48] sm:$0xff] }
 0x20f   :  { %v1470_v55 = vadd.f32 %v4474_v28, %v1459_v7  ;;  %v3090_v0 = vpack.c.bf16 %v2503_v5, %v2502_v20 }
 0x210   :  { %v1475_v6 = vmax.f32 %v1471_v32, 0.0 }
 0x211   :  { %v1474_v1 = vmax.f32 %v1470_v55, 0.0  ;;  %v4559_v55 = vpop.permute.xlu0 %1787  ;;  %3091 = vmatpush1.bf16.msra.mxu1 %v3090_v0 }
 0x212   :  { %v1536_v47 = vcombine.high %v1475_v6, %v1475_v6  ;;  %v1543_v35 = vrot.slane %v1475_v6, %v4105_v36  ;;  %3092 = vmatprep.subr.bf16.mxu1 %v3173_v49  ;;  %v2504_v6 = vld [vmem:[%s5058_s6 + $0x50] sm:$0xff] }
 0x213   :  { %v1519_v40 = vcombine.high %v1474_v1, %v1474_v1  ;;  %v1526_v45 = vrot.slane %v1474_v1, %v4105_v36  ;;  %v2505_v1 = vld [vmem:[%s5058_s6 + $0x58] sm:$0xff] }
 0x214   :  { %v1550_v60 = vrot.slane %v1536_v47, %v4105_v36  ;;  %v1551_v26 = vcombine.high %v1543_v35, %v1543_v35  ;;  %1608 = vst.msk [vmem:[#allocation3 + $0x1a] sm:$0x3] %vm1478_vm10, %v1543_v35 }
 0x215   :  { %v1533_v3 = vrot.slane %v1519_v40, %v4105_v36  ;;  %v1534_v18 = vcombine.high %v1526_v45, %v1526_v45  ;;  %1604 = vst.msk [vmem:[#allocation3 + $0xe] sm:$0x3] %vm1478_vm10, %v1526_v45  ;;  %v3093_v40 = vpack.c.bf16 %v2505_v1, %v2504_v6  ;;  %v4570_v45 = vpop.permute.xlu1 %1789 }
 0x216   :  { %v1552_v8 = vcombine.high %v1550_v60, %v1550_v60  ;;  %1609 = vst.msk [vmem:[#allocation3 + $0x1c] sm:$0x3] %vm1478_vm10, %v1551_v26  ;;  %1610 = vst.msk [vmem:[#allocation3 + $0x1e] sm:$0x3] %vm1478_vm10, %v1550_v60  ;;  %v4572_v60 = vpop.permute.xlu0 %1791  ;;  %v2506_v26 = vld [vmem:[%s5058_s6 + $0x60] sm:$0xff] }
 0x217   :  { %v1535_v2 = vcombine.high %v1533_v3, %v1533_v3  ;;  %1605 = vst.msk [vmem:[#allocation3 + $0x10] sm:$0x3] %vm1478_vm10, %v1534_v18  ;;  %1606 = vst.msk [vmem:[#allocation3 + $0x12] sm:$0x3] %vm1478_vm10, %v1533_v3  ;;  %3094 = vmatpush1.bf16.msra.mxu1 %v3093_v40  ;;  %v2507_v3 = vld [vmem:[%s5058_s6 + $0x68] sm:$0xff] }
 0x218   :  { %1611 = vst.msk [vmem:[#allocation3 + $0x20] sm:$0x3] %vm1478_vm10, %v1552_v8  ;;  %3095 = vmatprep.subr.bf16.mxu1 %v3173_v49 }
 0x219   :  { %1607 = vst.msk [vmem:[#allocation3 + $0x14] sm:$0x3] %vm1478_vm10, %v1535_v2  ;;  %v3096_v2 = vpack.c.bf16 %v2507_v3, %v2506_v26 }
 0x21b   :  { %v1738_v19 = vld [vmem:[#allocation3 + $0x1a] sm:$0x3]  ;;  %3097 = vmatpush1.bf16.msra.mxu1 %v3096_v2 }
 0x21c   :  { %v1722_v31 = vld [vmem:[#allocation3 + $0x1a] sm:$0x3]  ;;  %2171 = vrot.lane.b32.xlu0 %v1738_v19, %s3172_s4  ;;  %v1672_v24 = vld [vmem:[#allocation3 + $0xe] sm:$0x3]  ;;  %3098 = vmatprep.subr.bf16.mxu1 %v3173_v49 }
 0x21d   :  { %2109 = vrot.lane.b32.xlu1 %v1722_v31, %s3171_s13  ;;  %v1691_v33 = vld [vmem:[#allocation3 + $0x1a] sm:$0x3]  ;;  %v1687_v57 = vld [vmem:[#allocation3 + $0xe] sm:$0x3]  ;;  %v1724_v43 = vld [vmem:[#allocation3 + $0x1e] sm:$0x3] }
 0x21e   :  { %v1676_v10 = vld [vmem:[#allocation3 + $0x1a] sm:$0x3]  ;;  %v1678_v63 = vld [vmem:[#allocation3 + $0x1e] sm:$0x3]  ;;  %v1641_v44 = vld [vmem:[#allocation3 + $0xe] sm:$0x3] }
 0x21f   :  { %v1645_v29 = vld [vmem:[#allocation3 + $0x1a] sm:$0x3]  ;;  %v1739_v53 = vld [vmem:[#allocation3 + $0x1c] sm:$0x3]  ;;  %v1740_v48 = vld [vmem:[#allocation3 + $0x1e] sm:$0x3] }
 0x220   :  { %1987 = vrot.lane.b32.xlu0 %v1691_v33, %s3168_s0  ;;  %v1723_v54 = vld [vmem:[#allocation3 + $0x1c] sm:$0x3]  ;;  %v1709_v9 = vld [vmem:[#allocation3 + $0x1e] sm:$0x3]  ;;  %v1674_v56 = vld [vmem:[#allocation3 + $0x12] sm:$0x3] }
 0x221   :  { %1925 = vrot.lane.b32.xlu1 %v1676_v10, %s3166_s19  ;;  %v1692_v12 = vld [vmem:[#allocation3 + $0x1c] sm:$0x3]  ;;  %v1693_v37 = vld [vmem:[#allocation3 + $0x1e] sm:$0x3]  ;;  %v1688_v58 = vld [vmem:[#allocation3 + $0x10] sm:$0x3] }
 0x222   :  { %v1677_v42 = vld [vmem:[#allocation3 + $0x1c] sm:$0x3]  ;;  %v1663_v38 = vld [vmem:[#allocation3 + $0x1e] sm:$0x3]  ;;  %v1673_v17 = vld [vmem:[#allocation3 + $0x10] sm:$0x3] }
 0x223   :  { %v1646_v11 = vld [vmem:[#allocation3 + $0x1c] sm:$0x3]  ;;  %v1647_v21 = vld [vmem:[#allocation3 + $0x1e] sm:$0x3]  ;;  %v1642_v46 = vld [vmem:[#allocation3 + $0x10] sm:$0x3] }
 0x224   :  { %1803 = vrot.lane.b32.xlu0 %v1645_v29, %s3162_s10  ;;  %v1708_v52 = vld [vmem:[#allocation3 + $0x1c] sm:$0x3]  ;;  %v1689_v39 = vld [vmem:[#allocation3 + $0x12] sm:$0x3]  ;;  %v1741_v7 = vld [vmem:[#allocation3 + $0x20] sm:$0x3] }
 0x225   :  { %1917 = vrot.lane.b32.xlu1 %v1672_v24, %s3166_s19  ;;  %v1662_v51 = vld [vmem:[#allocation3 + $0x1c] sm:$0x3]  ;;  %v1705_v23 = vld [vmem:[#allocation3 + $0x12] sm:$0x3]  ;;  %v1704_v32 = vld [vmem:[#allocation3 + $0x10] sm:$0x3]  ;;  %v4592_v24 = vpop.permute.xlu1 %1793 }
 0x226   :  { %v1659_v13 = vld [vmem:[#allocation3 + $0x12] sm:$0x3]  ;;  %v1694_v47 = vld [vmem:[#allocation3 + $0x20] sm:$0x3]  ;;  %v1658_v35 = vld [vmem:[#allocation3 + $0x10] sm:$0x3] }
 0x227   :  { %v1643_v16 = vld [vmem:[#allocation3 + $0x12] sm:$0x3]  ;;  %v1648_v18 = vld [vmem:[#allocation3 + $0x20] sm:$0x3]  ;;  %v2508_v19 = vld [vmem:[%s5058_s6 + $0x70] sm:$0xff] }
 0x228   :  { %1979 = vrot.lane.b32.xlu0 %v1687_v57, %s3168_s0  ;;  %v1710_v8 = vld [vmem:[#allocation3 + $0x20] sm:$0x3]  ;;  %v2509_v31 = vld [vmem:[%s5058_s6 + $0x78] sm:$0xff]  ;;  %v4594_v57 = vpop.permute.xlu0 %1851 }
 0x229   :  { %2113 = vrot.lane.b32.xlu1 %v1724_v43, %s3171_s13  ;;  %v3099_v33 = vpack.c.bf16 %v2509_v31, %v2508_v19  ;;  %v1690_v10 = vld [vmem:[#allocation3 + $0x14] sm:$0x3]  ;;  %v1664_v29 = vld [vmem:[#allocation3 + $0x20] sm:$0x3]  ;;  %v2510_v43 = vld [vmem:[%s5058_s6 + $0x80] sm:$0xff] }
 0x22b   :  { %3100 = vmatpush1.bf16.msra.mxu1 %v3099_v33 }
 0x22c   :  { %1795 = vrot.lane.b32.xlu0 %v1641_v44, %s3162_s10  ;;  %v2697_v44 = vld [vmem:[%s5059_s7] sm:$0xff]  ;;  %3101 = vmatprep.subr.bf16.mxu1 %v3173_v49 }
 0x22d   :  { %1929 = vrot.lane.b32.xlu1 %v1678_v63, %s3166_s19  ;;  %v2511_v63 = vld [vmem:[%s5058_s6 + $0x88] sm:$0xff]  ;;  %3053 = vmatprep.subr.mxu0 %v2697_v44  ;;  %s3174_s6 = smov [#allocation4]  }
 0x22e   :  { %3054 = vmatpush3.msra.mxu0 %v2697_v44  ;;  %s2984_s7 = sshll.u32 %s3174_s6, 4  ;;  %s2985_s7 = int_to_ptr.vmem [resolvable:$true] %s2984_s7 }
 0x22f   :  { %p3141_p1 = scmp.lt.s32.totalorder %s2985_s7, %s2985_s7 }
 0x230   :  { %2111 = vrot.lane.b32.xlu0 %v1723_v54, %s3171_s13  ;;  %v3128_v54 = vld.sshfl [vmem:[#allocation2 + $0x16] sm:$0xf pattern:$0x76325410] }
 0x231   :  { %2173 = vrot.lane.b32.xlu1 %v1739_v53, %s3172_s4  ;;  %v3102_v53 = vpack.c.bf16 %v2511_v63, %v2510_v43 }
 0x233   :  { %3103 = vmatpush1.bf16.msra.mxu1 %v3102_v53 }
 0x234   :  { %1927 = vrot.lane.b32.xlu0 %v1677_v42, %s3166_s19  ;;  %v1644_v42 = vld [vmem:[#allocation3 + $0x14] sm:$0x3] }
 0x235   :  { %1989 = vrot.lane.b32.xlu1 %v1692_v12, %s3168_s0  ;;  %v3129_v12 = vld.sshfl [vmem:[#allocation2 + $0x1e] sm:$0xf pattern:$0x76325410] }
 0x238   :  { %2175 = vrot.lane.b32.xlu0 %v1740_v48, %s3172_s4  ;;  %v3130_v48 = vld.sshfl [vmem:[#allocation2 + $0x3e] sm:$0xf pattern:$0x76325410] }
 0x239   :  { %1805 = vrot.lane.b32.xlu1 %v1646_v11, %s3162_s10  ;;  %v1706_v11 = vld [vmem:[#allocation3 + $0x14] sm:$0x3] }
 0x23c   :  { %1991 = vrot.lane.b32.xlu0 %v1693_v37, %s3168_s0  ;;  %v4608_v37 = vpop.permute.xlu1 %1853 }
 0x23d   :  { %2053 = vrot.lane.b32.xlu1 %v1709_v9, %s3170_s3  ;;  %v3131_v9 = vld.sshfl [vmem:[#allocation2 + $0x46] sm:$0xf pattern:$0x76325410] }
 0x240   :  { %1807 = vrot.lane.b32.xlu0 %v1647_v21, %s3162_s10  ;;  %v2730_v21 = vcombine.low %v3128_v54, %v3129_v12  ;;  %v4615_v61 = vpop.permute.xlu1 %1857 }
 0x241   :  { %1869 = vrot.lane.b32.xlu1 %v1663_v38, %s3164_s22  ;;  %v4610_v38 = vpop.permute.xlu0 %1855 }
 0x242   :  { %3055 = vmatprep.mubr.msk.f32.mxu0 %vm1129_vm1, %v2730_v21 }
 0x244   :  { %2051 = vrot.lane.b32.xlu0 %v1708_v52, %s3170_s3  ;;  %v1660_v52 = vld [vmem:[#allocation3 + $0x14] sm:$0x3]  ;;  %v4622_v50 = vpop.permute.xlu1 %2049 }
 0x245   :  { %1921 = vrot.lane.b32.xlu1 %v1674_v56, %s3166_s19  ;;  %v2747_v56 = vcombine.low %v3130_v48, %v3131_v9  ;;  %v4617_v59 = vpop.permute.xlu0 %1915 }
 0x247   :  { %3056 = vmatmul.mubr.msk.f32.vlgmr.msra.gmra.mrb[4].mxu0 %vm1129_vm1, %v2747_v56 }
 0x248   :  { %1867 = vrot.lane.b32.xlu0 %v1662_v51, %s3164_s22 }
 0x249   :  { %1981 = vrot.lane.b32.xlu1 %v1688_v58, %s3168_s0  ;;  %v4624_v15 = vpop.permute.xlu0 %2107 }
 0x24c   :  { %1919 = vrot.lane.b32.xlu0 %v1673_v17, %s3166_s19 }
 0x24d   :  { %1797 = vrot.lane.b32.xlu1 %v1642_v46, %s3162_s10  ;;  %v4633_v22 = vpop.permute.xlu0 %1923 }
 0x250   :  { %1983 = vrot.lane.b32.xlu0 %v1689_v39, %s3168_s0 }
 0x251   :  { %2045 = vrot.lane.b32.xlu1 %v1705_v23, %s3170_s3  ;;  %v4645_v0 = vpop.permute.xlu0 %2115 }
 0x254   :  { %1799 = vrot.lane.b32.xlu0 %v1643_v16, %s3162_s10 }
 0x255   :  { %1861 = vrot.lane.b32.xlu1 %v1659_v13, %s3164_s22 }
 0x258   :  { %2043 = vrot.lane.b32.xlu0 %v1704_v32, %s3170_s3 }
 0x259   :  { %2177 = vrot.lane.b32.xlu1 %v1741_v7, %s3172_s4 }
 0x25c   :  { %1859 = vrot.lane.b32.xlu0 %v1658_v35, %s3164_s22 }
 0x25d   :  { %1993 = vrot.lane.b32.xlu1 %v1694_v47, %s3168_s0  ;;  %v4651_v47 = vpop.permute.xlu0 %1931 }
 0x260   :  { %2055 = vrot.lane.b32.xlu0 %v1710_v8, %s3170_s3 }
 0x261   :  { %1809 = vrot.lane.b32.xlu1 %v1648_v18, %s3162_s10 }
 0x264   :  { %1871 = vrot.lane.b32.xlu0 %v1664_v29, %s3164_s22 }
 0x265   :  { %1985 = vrot.lane.b32.xlu1 %v1690_v10, %s3168_s0 }
 0x268   :  { %2047 = vrot.lane.b32.xlu0 %v1706_v11, %s3170_s3 }
 0x269   :  { %1801 = vrot.lane.b32.xlu1 %v1644_v42, %s3162_s10 }
 0x26c   :  { %1863 = vrot.lane.b32.xlu0 %v1660_v52, %s3164_s22 }
 0x273   :  { %v3052_v51 = vpop.f32.mrb[2].mxu0 }
 0x274   :  { %v1462_v58 = vmul.f32 %v3052_v51, %v4469_v34  ;;  %v1443_v49 = vpop.f32.mrb[3].mxu0 }
 0x275   :  { %v1461_v4 = vmul.f32 %v4469_v34, %v1443_v49  ;;  %v4631_v34 = vpop.permute.xlu1 %1865 }
 0x276   :  { %v1473_v25 = vadd.f32 %v4474_v28, %v1462_v58 }
 0x277   :  { %v1472_v17 = vadd.f32 %v4474_v28, %v1461_v4 }
 0x278   :  { %v1477_v46 = vmax.f32 %v1473_v25, 0.0 }
 0x279   :  { %v1476_v14 = vmax.f32 %v1472_v17, 0.0  ;;  %v4643_v5 = vpop.permute.xlu1 %2057 }
 0x27a   :  { %v1570_v27 = vcombine.high %v1477_v46, %v1477_v46  ;;  %v1577_v39 = vrot.slane %v1477_v46, %v4105_v36 }
 0x27b   :  { %v1553_v23 = vcombine.high %v1476_v14, %v1476_v14  ;;  %v1560_v30 = vrot.slane %v1476_v14, %v4105_v36 }
 0x27c   :  { %v1584_v41 = vrot.slane %v1570_v27, %v4105_v36  ;;  %v1585_v62 = vcombine.high %v1577_v39, %v1577_v39  ;;  %1616 = vst.msk [vmem:[#allocation3 + $0x32] sm:$0x3] %vm1478_vm10, %v1577_v39 }
 0x27d   :  { %v1567_v13 = vrot.slane %v1553_v23, %v4105_v36  ;;  %v1568_v28 = vcombine.high %v1560_v30, %v1560_v30  ;;  %1612 = vst.msk [vmem:[#allocation3 + $0x26] sm:$0x3] %vm1478_vm10, %v1560_v30  ;;  %v4649_v1 = vpop.permute.xlu1 %1873 }
 0x27e   :  { %v1586_v16 = vcombine.high %v1584_v41, %v1584_v41  ;;  %1617 = vst.msk [vmem:[#allocation3 + $0x34] sm:$0x3] %vm1478_vm10, %v1585_v62  ;;  %1618 = vst.msk [vmem:[#allocation3 + $0x36] sm:$0x3] %vm1478_vm10, %v1584_v41  ;;  %v1715_v41 = vld [vmem:[#allocation3 + $0x2e] sm:$0x3] }
 0x27f   :  { %v1569_v20 = vcombine.high %v1567_v13, %v1567_v13  ;;  %1613 = vst.msk [vmem:[#allocation3 + $0x28] sm:$0x3] %vm1478_vm10, %v1568_v28  ;;  %1614 = vst.msk [vmem:[#allocation3 + $0x2a] sm:$0x3] %vm1478_vm10, %v1567_v13  ;;  %v1629_v62 = vld [vmem:[#allocation3 + $0x1a] sm:$0x3] }
 0x280   :  { %1619 = vst.msk [vmem:[#allocation3 + $0x38] sm:$0x3] %vm1478_vm10, %v1586_v16 }
 0x281   :  { %1615 = vst.msk [vmem:[#allocation3 + $0x2c] sm:$0x3] %vm1478_vm10, %v1569_v20 }
 0x284   :  { %v1726_v7 = vld [vmem:[#allocation3 + $0x26] sm:$0x3] }
 0x285   :  { %2117 = vrot.lane.b32.xlu1 %v1726_v7, %s3171_s13  ;;  %v1680_v6 = vld [vmem:[#allocation3 + $0x26] sm:$0x3] }
 0x286   :  { %v1727_v32 = vld [vmem:[#allocation3 + $0x28] sm:$0x3]  ;;  %v1728_v40 = vld [vmem:[#allocation3 + $0x2a] sm:$0x3]  ;;  %v1742_v18 = vld [vmem:[#allocation3 + $0x26] sm:$0x3] }
 0x287   :  { %2119 = vrot.lane.b32.xlu0 %v1727_v32, %s3171_s13  ;;  %v1681_v35 = vld [vmem:[#allocation3 + $0x28] sm:$0x3]  ;;  %v1682_v8 = vld [vmem:[#allocation3 + $0x2a] sm:$0x3]  ;;  %v1695_v43 = vld [vmem:[#allocation3 + $0x26] sm:$0x3] }
 0x288   :  { %v1744_v31 = vld [vmem:[#allocation3 + $0x2a] sm:$0x3]  ;;  %v1743_v33 = vld [vmem:[#allocation3 + $0x28] sm:$0x3]  ;;  %v1745_v63 = vld [vmem:[#allocation3 + $0x2c] sm:$0x3] }
 0x289   :  { %1933 = vrot.lane.b32.xlu1 %v1680_v6, %s3166_s19  ;;  %v1697_v54 = vld [vmem:[#allocation3 + $0x2a] sm:$0x3]  ;;  %v1696_v12 = vld [vmem:[#allocation3 + $0x28] sm:$0x3]  ;;  %v1649_v48 = vld [vmem:[#allocation3 + $0x26] sm:$0x3] }
 0x28a   :  { %v1698_v9 = vld [vmem:[#allocation3 + $0x2c] sm:$0x3]  ;;  %v1651_v56 = vld [vmem:[#allocation3 + $0x2a] sm:$0x3]  ;;  %v1650_v51 = vld [vmem:[#allocation3 + $0x28] sm:$0x3] }
 0x28b   :  { %1935 = vrot.lane.b32.xlu0 %v1681_v35, %s3166_s19  ;;  %v1712_v4 = vld [vmem:[#allocation3 + $0x28] sm:$0x3]  ;;  %v1652_v25 = vld [vmem:[#allocation3 + $0x2c] sm:$0x3]  ;;  %v1713_v27 = vld [vmem:[#allocation3 + $0x2a] sm:$0x3] }
 0x28c   :  { %v1714_v14 = vld [vmem:[#allocation3 + $0x2c] sm:$0x3]  ;;  %v1666_v30 = vld [vmem:[#allocation3 + $0x28] sm:$0x3]  ;;  %v1667_v32 = vld [vmem:[#allocation3 + $0x2a] sm:$0x3] }
 0x28d   :  { %2121 = vrot.lane.b32.xlu1 %v1728_v40, %s3171_s13  ;;  %v1668_v20 = vld [vmem:[#allocation3 + $0x2c] sm:$0x3]  ;;  %v1729_v6 = vld [vmem:[#allocation3 + $0x30] sm:$0x3] }
 0x28e   :  { %v4658_v3 = vpop.permute.xlu0 %2171 }
 0x28f   :  { %v4656_v26 = vpop.permute.xlu1 %2109  ;;  %2179 = vrot.lane.b32.xlu0 %v1742_v18, %s3172_s4  ;;  %v1669_v18 = vld [vmem:[#allocation3 + $0x2e] sm:$0x3] }
 0x291   :  { %1937 = vrot.lane.b32.xlu1 %v1682_v8, %s3166_s19  ;;  %v1628_v8 = vld [vmem:[#allocation3 + $0x18] sm:$0x3] }
 0x292   :  { %v4664_v19 = vpop.permute.xlu0 %1987 }
 0x293   :  { %v4662_v2 = vpop.permute.xlu1 %1925  ;;  %2183 = vrot.lane.b32.xlu0 %v1744_v31, %s3172_s4  ;;  %v1621_v31 = vld [vmem:[#allocation3 + $0x2] sm:$0x3] }
 0x295   :  { %2181 = vrot.lane.b32.xlu1 %v1743_v33, %s3172_s4 }
 0x296   :  { %v1804_v29 = vpop.permute.xlu0 %1803 }
 0x297   :  { %v4668_v10 = vpop.permute.xlu1 %1917  ;;  %1995 = vrot.lane.b32.xlu0 %v1695_v43, %s3168_s0  ;;  %v2227_v33 = vsel %vm1146_vm2, %v1628_v8, %v1804_v29 }
 0x299   :  { %2185 = vrot.lane.b32.xlu1 %v1745_v63, %s3172_s4 }
 0x29a   :  { %v4674_v53 = vpop.permute.xlu0 %1979 }
 0x29b   :  { %v4672_v44 = vpop.permute.xlu1 %2113  ;;  %1999 = vrot.lane.b32.xlu0 %v1697_v54, %s3168_s0  ;;  %v1731_v54 = vld [vmem:[#allocation3 + $0x34] sm:$0x3] }
 0x29d   :  { %1997 = vrot.lane.b32.xlu1 %v1696_v12, %s3168_s0 }
 0x29e   :  { %v4680_v11 = vpop.permute.xlu0 %1795 }
 0x29f   :  { %v4678_v42 = vpop.permute.xlu1 %1929  ;;  %1811 = vrot.lane.b32.xlu0 %v1649_v48, %s3162_s10  ;;  %v1730_v48 = vld [vmem:[#allocation3 + $0x32] sm:$0x3] }
 0x2a1   :  { %2001 = vrot.lane.b32.xlu1 %v1698_v9, %s3168_s0  ;;  %v1683_v9 = vld [vmem:[#allocation3 + $0x30] sm:$0x3] }
 0x2a2   :  { %v4686_v52 = vpop.permute.xlu0 %2111 }
 0x2a3   :  { %v4684_v21 = vpop.permute.xlu1 %2173  ;;  %1815 = vrot.lane.b32.xlu0 %v1651_v56, %s3162_s10 }
 0x2a5   :  { %1813 = vrot.lane.b32.xlu1 %v1650_v51, %s3162_s10  ;;  %v2220_v51 = vsel %vm1146_vm2, %v1621_v31, %v4570_v45 }
 0x2a6   :  { %v4692_v49 = vpop.permute.xlu0 %1927 }
 0x2a7   :  { %v4690_v58 = vpop.permute.xlu1 %1989  ;;  %2059 = vrot.lane.b32.xlu0 %v1712_v4, %s3170_s3 }
 0x2a9   :  { %1817 = vrot.lane.b32.xlu1 %v1652_v25, %s3162_s10  ;;  %v1620_v25 = vld [vmem:[#allocation3] sm:$0x3]  ;;  %s3136_s10 = scalar_lea.vmem %s2985_s7, 512 }
 0x2aa   :  { %v4696_v46 = vpop.permute.xlu0 %2175  ;;  %p3137_p0 = scmp.ne.s32.totalorder %s2985_s7, %s3136_s10  ;;  %p3142_p2 = scmp.lt.s32.totalorder %s3136_s10, %s3136_s10 }
 0x2ab   :  { %v1806_v17 = vpop.permute.xlu1 %1805  ;;  %2063 = vrot.lane.b32.xlu0 %v1714_v14, %s3170_s3  ;;  %v1732_v14 = vld [vmem:[#allocation3 + $0x36] sm:$0x3] }
 0x2ac   :  { %v2228_v13 = vsel %vm1146_vm2, %v1629_v62, %v1806_v17  ;;  %v2236_v17 = vsel %vm1180_vm4, %v2220_v51, %v4608_v37  ;;  %v2219_v62 = vsel %vm1146_vm2, %v1620_v25, %v4559_v55  ;;  %v1684_v37 = vld [vmem:[#allocation3 + $0x32] sm:$0x3]  ;;  %p3143_p3 = por %p3142_p2, %p3141_p1 }
 0x2ad   :  { %2061 = vrot.lane.b32.xlu1 %v1713_v27, %s3170_s3  ;;  %v1746_v55 = vld [vmem:[#allocation3 + $0x32] sm:$0x3] }
 0x2ae   :  { %v4702_v23 = vpop.permute.xlu0 %1991  ;;  %p3144_p4 = pnand %p3143_p3, %p3137_p0 }
 0x2af   :  { %v4700_v39 = vpop.permute.xlu1 %2053  ;;  %1875 = vrot.lane.b32.xlu0 %v1666_v30, %s3164_s22 }
 0x2b1   :  { %2065 = vrot.lane.b32.xlu1 %v1715_v41, %s3170_s3  ;;  %v1685_v41 = vld [vmem:[#allocation3 + $0x34] sm:$0x3] }
 0x2b2   :  { %v4707_v16 = vpop.permute.xlu0 %1807 }
 0x2b3   :  { %v1870_v28 = vpop.permute.xlu1 %1869  ;;  %1879 = vrot.lane.b32.xlu0 %v1668_v20, %s3164_s22  ;;  %v2235_v20 = vsel %vm1180_vm4, %v2219_v62, %v4594_v57  ;;  %v3134_v62 = vld.sshfl [vmem:[#allocation2 + $0x8e] sm:$0xf pattern:$0x76325410] }
 0x2b4   :  { %v4710_v7 = vsel %vm1180_vm4, %v2228_v13, %v1870_v28  ;;  %v1625_v28 = vld [vmem:[#allocation3 + $0xe] sm:$0x3]  ;;  %v2251_v57 = vsel %vm1214_vm6, %v2235_v20, %v4617_v59 }
 0x2b5   :  { %1877 = vrot.lane.b32.xlu1 %v1667_v32, %s3164_s22 }
 0x2b6   :  { %v4716_v40 = vpop.permute.xlu0 %2051 }
 0x2b7   :  { %v4714_v35 = vpop.permute.xlu1 %1921  ;;  %2123 = vrot.lane.b32.xlu0 %v1729_v6, %s3171_s13 }
 0x2b9   :  { %1881 = vrot.lane.b32.xlu1 %v1669_v18, %s3164_s22 }
 0x2ba   :  { %v1868_v63 = vpop.permute.xlu0 %1867 }
 0x2bb   :  { %v1982_v43 = vpop.permute.xlu1 %1981  ;;  %v2243_v12 = vsel %vm1180_vm4, %v2227_v33, %v1868_v63  ;;  %2127 = vrot.lane.b32.xlu0 %v1731_v54, %s3171_s13  ;;  %v1686_v33 = vld [vmem:[#allocation3 + $0x36] sm:$0x3]  ;;  %v2267_v63 = vsel %vm1248_vm8, %v2251_v57, %v4674_v53  ;;  %v1756_v54 = vld [vmem:[#allocation3 + $0x1e] sm:$0x3]  ;;  %v1755_v53 = vld [vmem:[#allocation3 + $0x1c] sm:$0x3] }
 0x2bc   :  { %v4725_v56 = vsel %vm1214_vm6, %v2243_v12, %v4651_v47  ;;  %v2252_v47 = vsel %vm1214_vm6, %v2236_v17, %v4668_v10  ;;  %v1699_v17 = vld [vmem:[#allocation3 + $0x32] sm:$0x3]  ;;  %v1700_v57 = vld [vmem:[#allocation3 + $0x34] sm:$0x3] }
 0x2bd   :  { %2125 = vrot.lane.b32.xlu1 %v1730_v48, %s3171_s13  ;;  %v2268_v45 = vsel %vm1248_vm8, %v2252_v47, %v1982_v43 }
 0x2be   :  { %v4730_v29 = vpop.permute.xlu0 %1919 }
 0x2bf   :  { %v1798_v4 = vpop.permute.xlu1 %1797  ;;  %1939 = vrot.lane.b32.xlu0 %v1683_v9, %s3166_s19  ;;  %v1624_v9 = vld [vmem:[#allocation3 + $0xc] sm:$0x3] }
 0x2c0   :  { %v2224_v32 = vsel %vm1146_vm2, %v1625_v28, %v1798_v4  ;;  %v1747_v4 = vld [vmem:[#allocation3 + $0x34] sm:$0x3] }
 0x2c1   :  { %2129 = vrot.lane.b32.xlu1 %v1732_v14, %s3171_s13 }
 0x2c2   :  { %v4739_v30 = vpop.permute.xlu0 %1983 }
 0x2c3   :  { %v2046_v27 = vpop.permute.xlu1 %2045  ;;  %1943 = vrot.lane.b32.xlu0 %v1685_v41, %s3166_s19  ;;  %v3133_v41 = vld.sshfl [vmem:[#allocation2 + $0x6e] sm:$0xf pattern:$0x76325410] }
 0x2c4   :  { %v2285_v13 = vsel %vm2283_vm11, %v2268_v45, %v2046_v27  ;;  %v3132_v27 = vld.sshfl [vmem:[#allocation2 + $0x66] sm:$0xf pattern:$0x76325410] }
 0x2c5   :  { %v2302_v10 = vsel %vm2300_vm12, %v2285_v13, %v4656_v26  ;;  %1941 = vrot.lane.b32.xlu1 %v1684_v37, %s3166_s19  ;;  %v1623_v13 = vld [vmem:[#allocation3 + $0x6] sm:$0x3]  ;;  %v3135_v37 = vld.sshfl [vmem:[#allocation2 + $0x96] sm:$0xf pattern:$0x76325410] }
 0x2c6   :  { %v4751_v18 = vpop.permute.xlu0 %1799  ;;  %v2319_v31 = vsel %vm2317_vm13, %v2302_v10, %v4684_v21  ;;  %v1748_v21 = vld [vmem:[#allocation3 + $0x36] sm:$0x3] }
 0x2c7   :  { %v1862_v6 = vpop.permute.xlu1 %1861  ;;  %2187 = vrot.lane.b32.xlu0 %v1746_v55, %s3172_s4  ;;  %v2374_v51 = vcombine.low %v2319_v31, %v1756_v54  ;;  %v1701_v31 = vld [vmem:[#allocation3 + $0x36] sm:$0x3] }
 0x2c8   :  { %v2240_v8 = vsel %vm1180_vm4, %v2224_v32, %v1862_v6  ;;  %v1622_v32 = vld [vmem:[#allocation3 + $0x4] sm:$0x3]  ;;  %v2222_v6 = vsel %vm1146_vm2, %v1623_v13, %v4592_v24  ;;  %v1719_v13 = vld [vmem:[#allocation3 + $0x3a] sm:$0x3] }
 0x2c9   :  { %v2256_v26 = vsel %vm1214_vm6, %v2240_v8, %v4662_v2  ;;  %1945 = vrot.lane.b32.xlu1 %v1686_v33, %s3166_s19  ;;  %v2764_v33 = vcombine.low %v3132_v27, %v3133_v41  ;;  %v2221_v24 = vsel %vm1146_vm2, %v1622_v32, %v4572_v60  ;;  %v1757_v27 = vld [vmem:[#allocation3 + $0x20] sm:$0x3] }
 0x2ca   :  { %v2272_v43 = vsel %vm1248_vm8, %v2256_v26, %v4690_v58  ;;  %v2044_v48 = vpop.permute.xlu0 %2043 }
 0x2cb   :  { %v4766_v12 = vpop.permute.xlu1 %2177  ;;  %v4770_v2 = vsel %vm2283_vm11, %v2272_v43, %v4700_v39  ;;  %v2284_v59 = vsel %vm2283_vm11, %v2267_v63, %v2044_v48  ;;  %2191 = vrot.lane.b32.xlu0 %v1748_v21, %s3172_s4  ;;  %v2223_v39 = vsel %vm1146_vm2, %v1624_v9, %v4680_v11  ;;  %v1749_v11 = vld [vmem:[#allocation3 + $0x38] sm:$0x3]  ;;  %3058 = vmatprep.mubr.msk.f32.mxu0 %vm1129_vm1, %v2764_v33  ;;  %v1630_v63 = vld [vmem:[#allocation3 + $0x1c] sm:$0x3]  ;;  %v1716_v9 = vld [vmem:[#allocation3 + $0x34] sm:$0x3] }
 0x2cc   :  { %v2301_v58 = vsel %vm2300_vm12, %v2284_v59, %v4624_v15  ;;  %v2238_v43 = vsel %vm1180_vm4, %v2222_v6, %v4615_v61  ;;  %v2237_v61 = vsel %vm1180_vm4, %v2221_v24, %v4610_v38  ;;  %v1736_v6 = vld [vmem:[#allocation3 + $0x42] sm:$0x3] }
 0x2cd   :  { %v2318_v25 = vsel %vm2317_vm13, %v2301_v58, %v4658_v3  ;;  %2189 = vrot.lane.b32.xlu1 %v1747_v4, %s3172_s4  ;;  %v4786_v3 = vrot.slane %v2374_v51, %v4105_v36  ;;  %v2254_v54 = vsel %vm1214_vm6, %v2238_v43, %v4714_v35  ;;  %v2253_v35 = vsel %vm1214_vm6, %v2237_v61, %v4730_v29  ;;  %v1758_v4 = vld [vmem:[#allocation3 + $0x22] sm:$0x3] }
 0x2ce   :  { %v2366_v14 = vcombine.low %v2318_v25, %v1755_v53  ;;  %v1860_v45 = vpop.permute.xlu0 %1859  ;;  %v2269_v53 = vsel %vm1248_vm8, %v2253_v35, %v4739_v30  ;;  %v1752_v33 = vld [vmem:[#allocation3 + $0x42] sm:$0x3] }
 0x2cf   :  { %v4781_v47 = vpop.permute.xlu1 %1993  ;;  %v2239_v15 = vsel %vm1180_vm4, %v2223_v39, %v1860_v45  ;;  %2003 = vrot.lane.b32.xlu0 %v1699_v17, %s3168_s0  ;;  %v1718_v17 = vld [vmem:[#allocation3 + $0x38] sm:$0x3]  ;;  %v1717_v39 = vld [vmem:[#allocation3 + $0x36] sm:$0x3]  ;;  %v1626_v45 = vld [vmem:[#allocation3 + $0x10] sm:$0x3] }
 0x2d0   :  { %v2255_v28 = vsel %vm1214_vm6, %v2239_v15, %v4633_v22  ;;  %v4791_v10 = vrot.slane %v2366_v14, %v4105_v36 }
 0x2d1   :  { %v2271_v20 = vsel %vm1248_vm8, %v2255_v28, %v4664_v19  ;;  %2193 = vrot.lane.b32.xlu1 %v1749_v11, %s3172_s4  ;;  %v2781_v19 = vcombine.low %v3134_v62, %v3135_v37  ;;  %v1734_v28 = vld [vmem:[#allocation3 + $0x3e] sm:$0x3] }
 0x2d2   :  { %v4800_v8 = vpop.permute.xlu0 %2055  ;;  %v2512_v22 = vcombine.low %v4791_v10, %v4786_v3  ;;  %v4806_v26 = vsel %vm2283_vm11, %v2271_v20, %v4716_v40  ;;  %v2229_v40 = vsel %vm1146_vm2, %v1630_v63, %v4707_v16  ;;  %v1702_v16 = vld [vmem:[#allocation3 + $0x38] sm:$0x3]  ;;  %v1735_v3 = vld [vmem:[#allocation3 + $0x40] sm:$0x3]  ;;  %v1750_v10 = vld [vmem:[#allocation3 + $0x3e] sm:$0x3] }
 0x2d3   :  { %v4798_v55 = vpop.permute.xlu1 %1809  ;;  %2007 = vrot.lane.b32.xlu0 %v1701_v31, %s3168_s0  ;;  %3059 = vmatmul.mubr.msk.f32.gmra.mrb[6].mxu0 %vm1129_vm1, %v2781_v19  ;;  %v2305_v61 = vsel %vm2300_vm12, %v4806_v26, %v4645_v0 }
 0x2d4   :  { %v2520_v20 = vrot.slane %v2512_v22, %v4105_v36  ;;  %v1753_v22 = vld [vmem:[#allocation3 + $0x44] sm:$0x3] }
 0x2d5   :  { %2005 = vrot.lane.b32.xlu1 %v1700_v57, %s3168_s0 }
 0x2d6   :  { %v1872_v21 = vpop.permute.xlu0 %1871 }
 0x2d7   :  { %v1986_v48 = vpop.permute.xlu1 %1985  ;;  %v4822_v60 = vsel %vm1180_vm4, %v2229_v40, %v1872_v21  ;;  %2067 = vrot.lane.b32.xlu0 %v1716_v9, %s3170_s3  ;;  %v1627_v40 = vld [vmem:[#allocation3 + $0x12] sm:$0x3] }
 0x2d8   :  { %v2270_v51 = vsel %vm1248_vm8, %v2254_v54, %v1986_v48 }
 0x2d9   :  { %v2287_v59 = vsel %vm2283_vm11, %v2270_v51, %v4622_v50  ;;  %2009 = vrot.lane.b32.xlu1 %v1702_v16, %s3168_s0 }
 0x2da   :  { %v2304_v58 = vsel %vm2300_vm12, %v2287_v59, %v4672_v44  ;;  %v2048_v38 = vpop.permute.xlu0 %2047  ;;  %v1733_v44 = vld [vmem:[#allocation3 + $0x3c] sm:$0x3] }
 0x2db   :  { %v2321_v25 = vsel %vm2317_vm13, %v2304_v58, %v4766_v12  ;;  %v2286_v50 = vsel %vm2283_vm11, %v2269_v53, %v2048_v38  ;;  %2071 = vrot.lane.b32.xlu0 %v1718_v17, %s3170_s3  ;;  %v2225_v12 = vsel %vm1146_vm2, %v1626_v45, %v4751_v18  ;;  %v1802_v19 = vpop.permute.xlu1 %1801 }
 0x2dc   :  { %v2303_v29 = vsel %vm2300_vm12, %v2286_v50, %v4686_v52  ;;  %v2390_v14 = vcombine.low %v2321_v25, %v1758_v4  ;;  %v2226_v48 = vsel %vm1146_vm2, %v1627_v40, %v1802_v19  ;;  %v1759_v4 = vld [vmem:[#allocation3 + $0x28] sm:$0x3] }
 0x2dd   :  { %v2320_v30 = vsel %vm2317_vm13, %v2303_v29, %v4696_v46  ;;  %2069 = vrot.lane.b32.xlu1 %v1717_v39, %s3170_s3  ;;  %v2242_v9 = vsel %vm1180_vm4, %v2226_v48, %v4631_v34  ;;  %v1761_v39 = vld [vmem:[#allocation3 + $0x2c] sm:$0x3] }
 0x2de   :  { %v2382_v41 = vcombine.low %v2320_v30, %v1757_v27  ;;  %v1864_v62 = vpop.permute.xlu0 %1863  ;;  %v2397_v46 = vrot.slane %v2390_v14, %v4105_v36 }
 0x2df   :  { %v2241_v15 = vsel %vm1180_vm4, %v2225_v12, %v1864_v62  ;;  %2131 = vrot.lane.b32.xlu0 %v1733_v44, %s3171_s13  ;;  %v1762_v44 = vld [vmem:[#allocation3 + $0x2e] sm:$0x3] }
 0x2e0   :  { %v2257_v52 = vsel %vm1214_vm6, %v2241_v15, %v4692_v49  ;;  %v2389_v37 = vrot.slane %v2382_v41, %v4105_v36 }
 0x2e1   :  { %2073 = vrot.lane.b32.xlu1 %v1719_v13, %s3170_s3  ;;  %v2273_v18 = vsel %vm1248_vm8, %v2257_v52, %v4702_v23  ;;  %v1751_v23 = vld [vmem:[#allocation3 + $0x40] sm:$0x3] }
 0x2e2   :  { %v2513_v11 = vcombine.low %v2389_v37, %v2397_v46  ;;  %v2290_v58 = vsel %vm2283_vm11, %v2273_v18, %v4800_v8 }
 0x2e3   :  { %2135 = vrot.lane.b32.xlu0 %v1735_v3, %s3171_s13 }
 0x2e4   :  { %v2527_v32 = vrot.slane %v2513_v11, %v4105_v36 }
 0x2e5   :  { %2133 = vrot.lane.b32.xlu1 %v1734_v28, %s3171_s13 }
 0x2e6   :  { %v2529_v49 = vcombine.high %v2520_v20, %v2527_v32  ;;  %v2528_v31 = vcombine.low %v2520_v20, %v2527_v32 }
 0x2e7   :  { %2195 = vrot.lane.b32.xlu0 %v1750_v10, %s3172_s4 }
 0x2e8   :  { %3003 = vmatprep.mubr.msk.f32.mxu1 %vm1146_vm2, %v2529_v49 }
 0x2e9   :  { %2137 = vrot.lane.b32.xlu1 %v1736_v6, %s3171_s13  ;;  %2661 = vmatmul.mubr.f32.vlgmr.msra.gmra.mrb[0].mxu1 %v2528_v31 }
 0x2eb   :  { %2199 = vrot.lane.b32.xlu0 %v1752_v33, %s3172_s4 }
 0x2ed   :  { %2197 = vrot.lane.b32.xlu1 %v1751_v23, %s3172_s4 }
 0x2f1   :  { %2201 = vrot.lane.b32.xlu1 %v1753_v22, %s3172_s4 }
 0x2f7   :  { %v2118_v57 = vpop.permute.xlu1 %2117 }
 0x2f8   :  { %v2306_v34 = vsel %vm2300_vm12, %v4770_v2, %v2118_v57 }
 0x2f9   :  { %v2120_v24 = vpop.permute.xlu0 %2119 }
 0x2fa   :  { %v2307_v53 = vsel %vm2300_vm12, %v2290_v58, %v2120_v24 }
 0x2fb   :  { %v1934_v43 = vpop.permute.xlu1 %1933 }
 0x2fc   :  { %v4868_v63 = vsel %vm1214_vm6, %v4710_v7, %v1934_v43  ;;  %v2258_v7 = vsel %vm1214_vm6, %v2242_v9, %v4678_v42  ;;  %v1760_v42 = vld [vmem:[#allocation3 + $0x2a] sm:$0x3] }
 0x2fd   :  { %v4870_v54 = vpop.permute.xlu0 %1935  ;;  %v2274_v0 = vsel %vm1248_vm8, %v2258_v7, %v4781_v47 }
 0x2fe   :  { %v2291_v8 = vsel %vm2283_vm11, %v2274_v0, %v4643_v5 }
 0x2ff   :  { %v2122_v21 = vpop.permute.xlu1 %2121 }
 0x300   :  { %v2308_v2 = vsel %vm2300_vm12, %v2291_v8, %v2122_v21 }
 0x301   :  { %v2180_v51 = vpop.permute.xlu0 %2179 }
 0x302   :  { %v2322_v16 = vsel %vm2317_vm13, %v2305_v61, %v2180_v51 }
 0x303   :  { %v4878_v59 = vpop.permute.xlu1 %1937  ;;  %v2398_v26 = vcombine.low %v2322_v16, %v1759_v4 }
 0x305   :  { %v2184_v35 = vpop.permute.xlu0 %2183  ;;  %v2405_v14 = vrot.slane %v2398_v26, %v4105_v36 }
 0x306   :  { %v2324_v38 = vsel %vm2317_vm13, %v2307_v53, %v2184_v35  ;;  %v1631_v35 = vld [vmem:[#allocation3 + $0x1e] sm:$0x3]  ;;  %v2261_v53 = vsel %vm1214_vm6, %v4822_v60, %v4870_v54 }
 0x307   :  { %v2182_v25 = vpop.permute.xlu1 %2181  ;;  %v2414_v45 = vcombine.low %v2324_v38, %v1761_v39  ;;  %v1764_v39 = vld [vmem:[#allocation3 + $0x36] sm:$0x3] }
 0x308   :  { %v2323_v17 = vsel %vm2317_vm13, %v2306_v34, %v2182_v25  ;;  %v2230_v34 = vsel %vm1146_vm2, %v1631_v35, %v4798_v55 }
 0x309   :  { %v2406_v50 = vcombine.low %v2323_v17, %v1760_v42  ;;  %v1996_v29 = vpop.permute.xlu0 %1995  ;;  %v2421_v13 = vrot.slane %v2414_v45, %v4105_v36  ;;  %v1763_v17 = vld [vmem:[#allocation3 + $0x34] sm:$0x3]  ;;  %v2246_v55 = vsel %vm1180_vm4, %v2230_v34, %v4649_v1 }
 0x30a   :  { %v2275_v61 = vsel %vm1248_vm8, %v4725_v56, %v1996_v29  ;;  %v2262_v8 = vsel %vm1214_vm6, %v2246_v55, %v4878_v59 }
 0x30b   :  { %v2413_v47 = vrot.slane %v2406_v50, %v4105_v36  ;;  %v2186_v27 = vpop.permute.xlu1 %2185 }
 0x30c   :  { %v2325_v30 = vsel %vm2317_vm13, %v2308_v2, %v2186_v27  ;;  %v1765_v27 = vld [vmem:[#allocation3 + $0x38] sm:$0x3] }
 0x30d   :  { %v2530_v12 = vcombine.low %v2405_v14, %v2413_v47  ;;  %v2422_v41 = vcombine.low %v2325_v30, %v1762_v44  ;;  %v2000_v62 = vpop.permute.xlu0 %1999  ;;  %v1766_v30 = vld [vmem:[#allocation3 + $0x3a] sm:$0x3] }
 0x30e   :  { %v2277_v26 = vsel %vm1248_vm8, %v2261_v53, %v2000_v62 }
 0x30f   :  { %v2429_v15 = vrot.slane %v2422_v41, %v4105_v36  ;;  %v1998_v5 = vpop.permute.xlu1 %1997  ;;  %v2538_v37 = vrot.slane %v2530_v12, %v4105_v36 }
 0x310   :  { %v2276_v56 = vsel %vm1248_vm8, %v4868_v63, %v1998_v5 }
 0x311   :  { %v2531_v52 = vcombine.low %v2421_v13, %v2429_v15  ;;  %v4900_v3 = vpop.permute.xlu0 %1811 }
 0x313   :  { %v2545_v46 = vrot.slane %v2531_v52, %v4105_v36  ;;  %v2002_v18 = vpop.permute.xlu1 %2001 }
 0x314   :  { %v2278_v2 = vsel %vm1248_vm8, %v2262_v8, %v2002_v18  ;;  %v1635_v8 = vld [vmem:[#allocation3 + $0x2a] sm:$0x3] }
 0x315   :  { %v4904_v28 = vpop.permute.xlu0 %1815  ;;  %v2547_v11 = vcombine.high %v2538_v37, %v2545_v46  ;;  %v2546_v10 = vcombine.low %v2538_v37, %v2545_v46 }
 0x317   :  { %v4906_v20 = vpop.permute.xlu1 %1813  ;;  %3004 = vmatprep.mubr.msk.f32.mxu1 %vm1146_vm2, %v2547_v11 }
 0x318   :  { %2666 = vmatmul.mubr.f32.gmra.mrb[2].mxu1 %v2546_v10 }
 0x319   :  { %v2060_v32 = vpop.permute.xlu0 %2059 }
 0x31a   :  { %v2292_v16 = vsel %vm2283_vm11, %v2275_v61, %v2060_v32  ;;  %v4951_v47 = vpop.f32.mrb[4].mxu0 }
 0x31b   :  { %v4909_v49 = vpop.permute.xlu1 %1817  ;;  %v4954_v12 = vpop.f32.mrb[5].mxu0 }
 0x31d   :  { %v2064_v6 = vpop.permute.xlu0 %2063 }
 0x31e   :  { %v2294_v38 = vsel %vm2283_vm11, %v2277_v26, %v2064_v6 }
 0x31f   :  { %v2062_v31 = vpop.permute.xlu1 %2061 }
 0x320   :  { %v2293_v42 = vsel %vm2283_vm11, %v2276_v56, %v2062_v31  ;;  %v1634_v56 = vld [vmem:[#allocation3 + $0x28] sm:$0x3] }
 0x321   :  { %v4911_v33 = vpop.permute.xlu0 %1875 }
 0x323   :  { %v2066_v23 = vpop.permute.xlu1 %2065 }
 0x324   :  { %v2295_v1 = vsel %vm2283_vm11, %v2278_v2, %v2066_v23 }
 0x325   :  { %v4913_v22 = vpop.permute.xlu0 %1879 }
 0x327   :  { %v4915_v19 = vpop.permute.xlu1 %1877 }
 0x329   :  { %v2124_v57 = vpop.permute.xlu0 %2123 }
 0x32a   :  { %v2309_v58 = vsel %vm2300_vm12, %v2292_v16, %v2124_v57  ;;  %v1632_v16 = vld [vmem:[#allocation3 + $0x24] sm:$0x3] }
 0x32b   :  { %v4917_v24 = vpop.permute.xlu1 %1881  ;;  %v2231_v34 = vsel %vm1146_vm2, %v1632_v16, %v4900_v3 }
 0x32c   :  { %v2247_v53 = vsel %vm1180_vm4, %v2231_v34, %v4911_v33 }
 0x32d   :  { %v2128_v43 = vpop.permute.xlu0 %2127 }
 0x32e   :  { %v2311_v50 = vsel %vm2300_vm12, %v2294_v38, %v2128_v43 }
 0x32f   :  { %v2126_v40 = vpop.permute.xlu1 %2125 }
 0x330   :  { %v2310_v60 = vsel %vm2300_vm12, %v2293_v42, %v2126_v40 }
 0x331   :  { %v4919_v48 = vpop.permute.xlu0 %1939 }
 0x332   :  { %v2263_v26 = vsel %vm1214_vm6, %v2247_v53, %v4919_v48 }
 0x333   :  { %v2130_v21 = vpop.permute.xlu1 %2129 }
 0x334   :  { %v2312_v41 = vsel %vm2300_vm12, %v2295_v1, %v2130_v21 }
 0x335   :  { %v4921_v9 = vpop.permute.xlu0 %1943 }
 0x337   :  { %v4923_v51 = vpop.permute.xlu1 %1941 }
 0x339   :  { %v2188_v7 = vpop.permute.xlu0 %2187 }
 0x33a   :  { %v2326_v0 = vsel %vm2317_vm13, %v2309_v58, %v2188_v7 }
 0x33b   :  { %v4929_v4 = vpop.permute.xlu1 %1945  ;;  %v2430_v54 = vcombine.low %v2326_v0, %v1763_v17  ;;  %v2233_v17 = vsel %vm1146_vm2, %v1634_v56, %v4904_v28 }
 0x33c   :  { %v2249_v33 = vsel %vm1180_vm4, %v2233_v17, %v4913_v22 }
 0x33d   :  { %v2192_v25 = vpop.permute.xlu0 %2191  ;;  %v2437_v59 = vrot.slane %v2430_v54, %v4105_v36  ;;  %v2265_v54 = vsel %vm1214_vm6, %v2249_v33, %v4921_v9  ;;  %v1768_v9 = vld [vmem:[#allocation3 + $0x42] sm:$0x3] }
 0x33e   :  { %v2328_v63 = vsel %vm2317_vm13, %v2311_v50, %v2192_v25  ;;  %v1633_v25 = vld [vmem:[#allocation3 + $0x26] sm:$0x3] }
 0x33f   :  { %v2190_v29 = vpop.permute.xlu1 %2189  ;;  %v2446_v62 = vcombine.low %v2328_v63, %v1765_v27  ;;  %v2232_v55 = vsel %vm1146_vm2, %v1633_v25, %v4906_v20 }
 0x340   :  { %v2327_v44 = vsel %vm2317_vm13, %v2310_v60, %v2190_v29  ;;  %v2248_v50 = vsel %vm1180_vm4, %v2232_v55, %v4915_v19  ;;  %v1767_v29 = vld [vmem:[#allocation3 + $0x40] sm:$0x3]  ;;  %v2234_v19 = vsel %vm1146_vm2, %v1635_v8, %v4909_v49 }
 0x341   :  { %v2438_v14 = vcombine.low %v2327_v44, %v1764_v39  ;;  %v2004_v45 = vpop.permute.xlu0 %2003  ;;  %v2453_v18 = vrot.slane %v2446_v62, %v4105_v36  ;;  %v2264_v28 = vsel %vm1214_vm6, %v2248_v50, %v4923_v51  ;;  %v2250_v51 = vsel %vm1180_vm4, %v2234_v19, %v4917_v24  ;;  %v1770_v24 = vld [vmem:[#allocation3 + $0x46] sm:$0x3] }
 0x342   :  { %v2279_v38 = vsel %vm1248_vm8, %v2263_v26, %v2004_v45 }
 0x343   :  { %v2445_v13 = vrot.slane %v2438_v14, %v4105_v36  ;;  %v2194_v15 = vpop.permute.xlu1 %2193 }
 0x344   :  { %v2329_v5 = vsel %vm2317_vm13, %v2312_v41, %v2194_v15  ;;  %v1769_v41 = vld [vmem:[#allocation3 + $0x44] sm:$0x3] }
 0x345   :  { %v2548_v52 = vcombine.low %v2437_v59, %v2445_v13  ;;  %v2454_v37 = vcombine.low %v2329_v5, %v1766_v30  ;;  %v2008_v46 = vpop.permute.xlu0 %2007  ;;  %v2266_v30 = vsel %vm1214_vm6, %v2250_v51, %v4929_v4 }
 0x346   :  { %v2281_v63 = vsel %vm1248_vm8, %v2265_v54, %v2008_v46 }
 0x347   :  { %v2461_v11 = vrot.slane %v2454_v37, %v4105_v36  ;;  %v2006_v10 = vpop.permute.xlu1 %2005  ;;  %v2556_v31 = vrot.slane %v2548_v52, %v4105_v36 }
 0x348   :  { %v2280_v22 = vsel %vm1248_vm8, %v2264_v28, %v2006_v10 }
 0x349   :  { %v2549_v32 = vcombine.low %v2453_v18, %v2461_v11  ;;  %v2068_v6 = vpop.permute.xlu0 %2067 }
 0x34a   :  { %v2296_v3 = vsel %vm2283_vm11, %v2279_v38, %v2068_v6 }
 0x34b   :  { %v2563_v23 = vrot.slane %v2549_v32, %v4105_v36  ;;  %v2010_v57 = vpop.permute.xlu1 %2009 }
 0x34c   :  { %v2282_v62 = vsel %vm1248_vm8, %v2266_v30, %v2010_v57 }
 0x34d   :  { %v2072_v43 = vpop.permute.xlu0 %2071  ;;  %v2565_v40 = vcombine.high %v2556_v31, %v2563_v23  ;;  %v2564_v21 = vcombine.low %v2556_v31, %v2563_v23 }
 0x34e   :  { %v2298_v44 = vsel %vm2283_vm11, %v2281_v63, %v2072_v43 }
 0x34f   :  { %v2070_v61 = vpop.permute.xlu1 %2069  ;;  %3005 = vmatprep.mubr.msk.f32.mxu1 %vm1146_vm2, %v2565_v40 }
 0x350   :  { %2671 = vmatmul.mubr.f32.gmra.mrb[4].mxu1 %v2564_v21  ;;  %v2297_v2 = vsel %vm2283_vm11, %v2280_v22, %v2070_v61 }
 0x351   :  { %v2132_v7 = vpop.permute.xlu0 %2131 }
 0x352   :  { %v2313_v48 = vsel %vm2300_vm12, %v2296_v3, %v2132_v7 }
 0x353   :  { %v2074_v35 = vpop.permute.xlu1 %2073 }
 0x354   :  { %v2299_v15 = vsel %vm2283_vm11, %v2282_v62, %v2074_v35 }
 0x355   :  { %v2136_v58 = vpop.permute.xlu0 %2135 }
 0x356   :  { %v2315_v14 = vsel %vm2300_vm12, %v2298_v44, %v2136_v58 }
 0x357   :  { %v2134_v0 = vpop.permute.xlu1 %2133 }
 0x358   :  { %v2314_v45 = vsel %vm2300_vm12, %v2297_v2, %v2134_v0 }
 0x359   :  { %v2196_v42 = vpop.permute.xlu0 %2195 }
 0x35a   :  { %v2330_v20 = vsel %vm2317_vm13, %v2313_v48, %v2196_v42 }
 0x35b   :  { %v2138_v60 = vpop.permute.xlu1 %2137  ;;  %v2462_v1 = vcombine.low %v2330_v20, %v1767_v29 }
 0x35c   :  { %v2316_v52 = vsel %vm2300_vm12, %v2299_v15, %v2138_v60 }
 0x35d   :  { %v2200_v39 = vpop.permute.xlu0 %2199  ;;  %v2469_v5 = vrot.slane %v2462_v1, %v4105_v36 }
 0x35e   :  { %v2332_v49 = vsel %vm2317_vm13, %v2315_v14, %v2200_v39 }
 0x35f   :  { %v2198_v27 = vpop.permute.xlu1 %2197  ;;  %v2478_v37 = vcombine.low %v2332_v49, %v1769_v41 }
 0x360   :  { %v2331_v59 = vsel %vm2317_vm13, %v2314_v45, %v2198_v27 }
 0x361   :  { %v2470_v13 = vcombine.low %v2331_v59, %v1768_v9  ;;  %v2485_v32 = vrot.slane %v2478_v37, %v4105_v36 }
 0x363   :  { %v2477_v46 = vrot.slane %v2470_v13, %v4105_v36  ;;  %v2202_v18 = vpop.permute.xlu1 %2201 }
 0x364   :  { %v2333_v4 = vsel %vm2317_vm13, %v2316_v52, %v2202_v18 }
 0x365   :  { %v2566_v11 = vcombine.low %v2469_v5, %v2477_v46  ;;  %v2486_v10 = vcombine.low %v2333_v4, %v1770_v24 }
 0x367   :  { %v2493_v6 = vrot.slane %v2486_v10, %v4105_v36  ;;  %v2574_v23 = vrot.slane %v2566_v11, %v4105_v36 }
 0x369   :  { %v2567_v31 = vcombine.low %v2485_v32, %v2493_v6 }
 0x36b   :  { %v2581_v57 = vrot.slane %v2567_v31, %v4105_v36 }
 0x36d   :  { %v2583_v43 = vcombine.high %v2574_v23, %v2581_v57  ;;  %v2582_v40 = vcombine.low %v2574_v23, %v2581_v57 }
 0x36f   :  { %3006 = vmatprep.mubr.msk.f32.mxu1 %vm1146_vm2, %v2583_v43 }
 0x370   :  { %2676 = vmatmul.mubr.f32.gmra.mrb[6].mxu1 %v2582_v40 }
 0x3a6   :  { %v3060_v21 = vpop.f32.mrb[6].mxu0 }
 0x3a7   :  { %v2866_v61 = vpop.f32.mrb[7].mxu0 }
 0x3bc   :  { %v2662_v7 = vpop.f32.mrb[0].mxu1 }
 0x3bd   :  { %v2857_v16 = vadd.f32 %v4954_v12, %v2662_v7  ;;  %v2664_v35 = vpop.f32.mrb[1].mxu1 }
 0x3bf   :  { %v2879_v58 = vcombine.high %v2857_v16, %v2857_v16  ;;  %v2886_v34 = vrot.slane %v2857_v16, %v4105_v36 }
 0x3c1   :  { %v2893_v53 = vrot.slane %v2879_v58, %v4105_v36  ;;  %v2894_v0 = vcombine.high %v2886_v34, %v2886_v34  ;;  %2963 = vst.msk [vmem:[#allocation4] sm:$0x3] %vm1478_vm10, %v2886_v34 }
 0x3c3   :  { %v2895_v26 = vcombine.high %v2893_v53, %v2893_v53  ;;  %2964 = vst.msk [vmem:[#allocation4 + $0x2] sm:$0x3] %vm1478_vm10, %v2894_v0  ;;  %2965 = vst.msk [vmem:[#allocation4 + $0x4] sm:$0x3] %vm1478_vm10, %v2893_v53 }
 0x3c5   :  { %2966 = vst.msk [vmem:[#allocation4 + $0x6] sm:$0x3] %vm1478_vm10, %v2895_v26 }
 0x3eb   :  { %v2667_v56 = vpop.f32.mrb[2].mxu1 }
 0x3ec   :  { %v2862_v25 = vadd.f32 %v4951_v47, %v2667_v56  ;;  %v2669_v12 = vpop.f32.mrb[3].mxu1 }
 0x3ee   :  { %v2896_v38 = vcombine.high %v2862_v25, %v2862_v25  ;;  %v2903_v42 = vrot.slane %v2862_v25, %v4105_v36 }
 0x3f0   :  { %v2910_v17 = vrot.slane %v2896_v38, %v4105_v36  ;;  %v2911_v55 = vcombine.high %v2903_v42, %v2903_v42  ;;  %2967 = vst.msk [vmem:[#allocation4 + $0x8] sm:$0x3] %vm1478_vm10, %v2903_v42 }
 0x3f2   :  { %v2912_v3 = vcombine.high %v2910_v17, %v2910_v17  ;;  %2968 = vst.msk [vmem:[#allocation4 + $0xa] sm:$0x3] %vm1478_vm10, %v2911_v55  ;;  %2969 = vst.msk [vmem:[#allocation4 + $0xc] sm:$0x3] %vm1478_vm10, %v2910_v17 }
 0x3f4   :  { %2970 = vst.msk [vmem:[#allocation4 + $0xe] sm:$0x3] %vm1478_vm10, %v2912_v3 }
 0x423   :  { %v2672_v33 = vpop.f32.mrb[4].mxu1 }
 0x424   :  { %v2867_v50 = vadd.f32 %v2866_v61, %v2672_v33  ;;  %v2674_v48 = vpop.f32.mrb[5].mxu1 }
 0x426   :  { %v2913_v47 = vcombine.high %v2867_v50, %v2867_v50  ;;  %v2920_v60 = vrot.slane %v2867_v50, %v4105_v36 }
 0x428   :  { %v2927_v54 = vrot.slane %v2913_v47, %v4105_v36  ;;  %v2928_v28 = vcombine.high %v2920_v60, %v2920_v60  ;;  %2971 = vst.msk [vmem:[#allocation4 + $0x10] sm:$0x3] %vm1478_vm10, %v2920_v60 }
 0x42a   :  { %v2929_v29 = vcombine.high %v2927_v54, %v2927_v54  ;;  %2972 = vst.msk [vmem:[#allocation4 + $0x12] sm:$0x3] %vm1478_vm10, %v2928_v28  ;;  %2973 = vst.msk [vmem:[#allocation4 + $0x14] sm:$0x3] %vm1478_vm10, %v2927_v54 }
 0x42c   :  { %2974 = vst.msk [vmem:[#allocation4 + $0x16] sm:$0x3] %vm1478_vm10, %v2929_v29 }
 0x443   :  { %v2677_v20 = vpop.f32.mrb[6].mxu1 }
 0x444   :  { %v2872_v8 = vadd.f32 %v3060_v21, %v2677_v20  ;;  %v2679_v63 = vpop.f32.mrb[7].mxu1 }
 0x446   :  { %v2930_v22 = vcombine.high %v2872_v8, %v2872_v8  ;;  %v2937_v39 = vrot.slane %v2872_v8, %v4105_v36 }
 0x448   :  { %v2944_v19 = vrot.slane %v2930_v22, %v4105_v36  ;;  %v2945_v44 = vcombine.high %v2937_v39, %v2937_v39  ;;  %2975 = vst.msk [vmem:[#allocation4 + $0x18] sm:$0x3] %vm1478_vm10, %v2937_v39 }
 0x44a   :  { %v2946_v2 = vcombine.high %v2944_v19, %v2944_v19  ;;  %2976 = vst.msk [vmem:[#allocation4 + $0x1a] sm:$0x3] %vm1478_vm10, %v2945_v44  ;;  %2977 = vst.msk [vmem:[#allocation4 + $0x1c] sm:$0x3] %vm1478_vm10, %v2944_v19 }
 0x44c   :  { %2978 = vst.msk [vmem:[#allocation4 + $0x1e] sm:$0x3] %vm1478_vm10, %v2946_v2 }
 0x44d   :  { %3147 = shalt.err (!%p3144_p4)
}
 0x44e   :  { %s3148_s3 = scalar_lea.hbm %s5060_s8, 512 }
 0x44f   :  { %p3149_p5 = scmp.ne.s32.totalorder %s5060_s8, %s3148_s3  ;;  %p3152_p6 = scmp.lt.u32.totalorder %s3148_s3, %s5060_s8 }
 0x451   :  { %p3154_p7 = pnand %p3152_p6, %p3149_p5 }
 0x453   :  { %3157 = shalt.err (!%p3154_p7)
}
 0x454   :  { %s3175_s11 = smov 2  }
 0x455   :  { %2990 = dma.vmem_to_hbm [thread:$0]  %s2985_s7, 512, %s5060_s8, [#allocation5], %s3164_s22, %s3164_s22, %s3175_s11  }
 0x456   :  { %3158 = dma.done.wait [#allocation5], 512  }
 0x457   :  { %3159 = vsyncadd [#allocation5], 4294966784 }
 0x458   :  { %2994 = vsyncpa [#allocation5], 1 }

</bundles_post_ra>
